<compile_context>
chip_gen: v7x
topology: tpu7x:2x2x1
jax: 0.10.0
libtpu: 0.0.40
codegen_flags: <defaults>
</compile_context>

<pallas_src>
import functools

import jax
import jax.numpy as jnp
from jax import lax
from jax.experimental import pallas as pl
from jax.experimental.pallas import tpu as pltpu

VMEM_SPEC = pl.BlockSpec(memory_space=pltpu.MemorySpace.VMEM)


# ----------------------------------------------------------------------------
# Fused kernel: 2x TransformerEncoderLayer (post-norm) + predictor MLP
# ----------------------------------------------------------------------------
def mtrec_kernel(x_ref, u_ref, it_ref,
                 wqkv_ref, bqkv_ref, wo_ref, bo_ref, ln1w_ref, ln1b_ref,
                 w1_ref, b1_ref, w2_ref, b2_ref, ln2w_ref, ln2b_ref,
                 pw1u_ref, pw1s_ref, pw1i_ref, pb1_ref, pw2_ref, pb2_ref,
                 o_ref, *, B, S, H):
    M, D = x_ref.shape                      # M = B * S
    hd = D // H
    scale = 1.0 / float(hd) ** 0.5
    eps = 1e-5
    L = wqkv_ref.shape[0]
    bf16 = jnp.bfloat16

    def layernorm(v, w, b):                 # f32 statistics
        mu = jnp.mean(v, axis=-1, keepdims=True)
        var = jnp.mean((v - mu) ** 2, axis=-1, keepdims=True)
        return (v - mu) * lax.rsqrt(var + eps) * w + b

    x = x_ref[...].astype(jnp.float32)      # [M, D] activation, resident in VMEM

    for l in range(L):                      # 2 layers, weights stacked on axis 0
        # ---- fused QKV projection: one MXU matmul (bf16 in, f32 acc) -------
        qkv = jnp.dot(x.astype(bf16), wqkv_ref[l],
                      preferred_element_type=jnp.float32) + bqkv_ref[l]
        q = qkv[:, 0 * D:1 * D] * scale     # q scaling after bias (PyTorch MHA)
        k = qkv[:, 1 * D:2 * D]
        v = qkv[:, 2 * D:3 * D]

        # ---- attention scores / context (tiny 8x8 einsums per head) --------
        ctx_heads = []
        for h in range(H):
            qh = q[:, h * hd:(h + 1) * hd].reshape(B, S, hd).astype(bf16)
            kh = k[:, h * hd:(h + 1) * hd].reshape(B, S, hd).astype(bf16)
            vh = v[:, h * hd:(h + 1) * hd].reshape(B, S, hd).astype(bf16)
            s = jnp.einsum('bqe,bke->bqk', qh, kh,
                           preferred_element_type=jnp.float32)
            s = s - jnp.max(s, axis=-1, keepdims=True)
            e = jnp.exp(s)                                       # f32 softmax
            p = e * pl.reciprocal(jnp.sum(e, axis=-1, keepdims=True),
                                  approx=True)
            ctx = jnp.einsum('bqk,bke->bqe', p.astype(bf16), vh,
                             preferred_element_type=jnp.float32)
            ctx_heads.append(ctx.reshape(M, hd))
        ctx_full = jnp.concatenate(ctx_heads, axis=-1)           # [M, D]

        # ---- fused output projection: one MXU matmul ------------------------
        attn = jnp.dot(ctx_full.astype(bf16), wo_ref[l],
                       preferred_element_type=jnp.float32) + bo_ref[l]

        # ---- residual + LayerNorm 1 (f32) -----------------------------------
        x = layernorm(x + attn, ln1w_ref[l], ln1b_ref[l])

        # ---- feed-forward (bf16 MXU, f32 acc) --------------------------------
        h1 = jnp.dot(x.astype(bf16), w1_ref[l],
                     preferred_element_type=jnp.float32) + b1_ref[l]
        h1 = jnp.maximum(h1, 0.0)
        ff = jnp.dot(h1.astype(bf16), w2_ref[l],
                     preferred_element_type=jnp.float32) + b2_ref[l]

        # ---- residual + LayerNorm 2 (f32) -----------------------------------
        x = layernorm(x + ff, ln2w_ref[l], ln2b_ref[l])

    # last sequence position per batch element -> [B, D]
    seq_out = x.reshape(B, S, D)[:, S - 1, :]

    # ---- predictor: concat([user, seq, item]) folded into 3 partial matmuls -
    hp = (jnp.dot(u_ref[...].astype(bf16), pw1u_ref[...],
                  preferred_element_type=jnp.float32)
          + jnp.dot(seq_out.astype(bf16), pw1s_ref[...],
                    preferred_element_type=jnp.float32)
          + jnp.dot(it_ref[...].astype(bf16), pw1i_ref[...],
                    preferred_element_type=jnp.float32)
          + pb1_ref[...])
    hp = jnp.maximum(hp, 0.0)
    y = jnp.dot(hp.astype(bf16), pw2_ref[...],
                preferred_element_type=jnp.float32) + pb2_ref[...]   # [B, 1]

    # lane-dense store: broadcast the scalar column across 128 lanes
    o_ref[...] = jnp.broadcast_to(y, o_ref.shape).astype(o_ref.dtype)


# ----------------------------------------------------------------------------
# Parameter init (deterministic; mirrors the PyTorch module's shapes).
# Large matmul weights are pre-transposed, stacked along a layer axis and
# cast to bf16; biases / LayerNorm params stay f32.
# ----------------------------------------------------------------------------
def init_params(key, num_users, num_items, embed_dim, nhead, dim_ff,
                num_layers, pred_hidden=128):
    D = embed_dim
    keys = iter(jax.random.split(key, 64))
    bf16 = jnp.bfloat16

    def nrm(shape, scale=0.05):
        return (scale * jax.random.normal(next(keys), shape)).astype(jnp.float32)

    wqkv, bqkv, wo, bo, ln1w, ln1b = [], [], [], [], [], []
    w1, b1, w2, b2, ln2w, ln2b = [], [], [], [], [], []
    for _ in range(num_layers):
        in_proj_w = nrm((3 * D, D))          # nn.MultiheadAttention.in_proj_weight
        in_proj_b = nrm((3 * D,))
        out_w, out_b = nrm((D, D)), nrm((D,))
        l1w, l1b = nrm((dim_ff, D)), nrm((dim_ff,))
        l2w, l2b = nrm((D, dim_ff)), nrm((D,))
        wqkv.append(in_proj_w.T)                          # [D, 3D]  (q|k|v cols)
        bqkv.append(in_proj_b.reshape(1, 3 * D))
        wo.append(out_w.T)                                # [D, D]
        bo.append(out_b.reshape(1, D))
        ln1w.append(jnp.ones((1, D), jnp.float32))
        ln1b.append(jnp.zeros((1, D), jnp.float32))
        w1.append(l1w.T)                                  # [D, dim_ff]
        b1.append(l1b.reshape(1, dim_ff))
        w2.append(l2w.T)                                  # [dim_ff, D]
        b2.append(l2b.reshape(1, D))
        ln2w.append(jnp.ones((1, D), jnp.float32))
        ln2b.append(jnp.zeros((1, D), jnp.float32))

    pred_w1, pred_b1 = nrm((pred_hidden, 3 * D)), nrm((pred_hidden,))
    pred_w2, pred_b2 = nrm((1, pred_hidden)), nrm((1,))

    return {
        'user_embed': nrm((num_users, D), 1.0),
        'item_embed': nrm((num_items, D), 1.0),
        # encoder weights, stacked [L, ...]
        'wqkv_t': jnp.stack(wqkv).astype(bf16),
        'wo_t':   jnp.stack(wo).astype(bf16),
        'w1_t':   jnp.stack(w1).astype(bf16),
        'w2_t':   jnp.stack(w2).astype(bf16),
        'bqkv': jnp.stack(bqkv), 'bo': jnp.stack(bo),
        'b1': jnp.stack(b1), 'b2': jnp.stack(b2),
        'ln1w': jnp.stack(ln1w), 'ln1b': jnp.stack(ln1b),
        'ln2w': jnp.stack(ln2w), 'ln2b': jnp.stack(ln2b),
        # predictor (concat folded into three column blocks of W1)
        'pw1u_t': pred_w1[:, 0 * D:1 * D].T.astype(bf16),
        'pw1s_t': pred_w1[:, 1 * D:2 * D].T.astype(bf16),
        'pw1i_t': pred_w1[:, 2 * D:3 * D].T.astype(bf16),
        'pb1': pred_b1.reshape(1, pred_hidden),
        'pw2_t': pred_w2.T.astype(bf16),
        'pb2': pred_b2.reshape(1, 1),
    }


# ----------------------------------------------------------------------------
# Full forward (single pallas_call for encoder stack + predictor)
# ----------------------------------------------------------------------------
@functools.partial(jax.jit, static_argnames=('nhead',))
def mtrec_forward(params, user_ids, item_ids, seq_items, *, nhead):
    # TODO(synk): embedding gathers are left to XLA (glue); the matmul /
    # attention / layernorm / MLP hot path runs inside the fused Pallas kernel.
    B, S = seq_items.shape
    D = params['user_embed'].shape[-1]
    P = params['pb1'].shape[-1]

    user_emb = params['user_embed'][user_ids]                   # [B, D]
    item_emb = params['item_embed'][item_ids]                   # [B, D]
    x_flat = params['item_embed'][seq_items].reshape(B * S, D)  # [B*S, D], (b,s) rows

    kernel = functools.partial(mtrec_kernel, B=B, S=S, H=nhead)
    ins = (x_flat, user_emb, item_emb,
           params['wqkv_t'], params['bqkv'], params['wo_t'], params['bo'],
           params['ln1w'], params['ln1b'],
           params['w1_t'], params['b1'], params['w2_t'], params['b2'],
           params['ln2w'], params['ln2b'],
           params['pw1u_t'], params['pw1s_t'], params['pw1i_t'],
           params['pb1'], params['pw2_t'], params['pb2'])

    # TODO(synk): at large B*S, add a row-tiled grid (TILE_M, D) with
    # dimension_semantics=("parallel",) for pipelining / megacore; at B=2, S=8
    # everything (~1.1 MiB of weights) fits in VMEM and a single grid-less
    # invocation is fastest.
    y = pl.pallas_call(
        kernel,
        out_shape=jax.ShapeDtypeStruct((B, P), jnp.float32),
        in_specs=[VMEM_SPEC] * len(ins),
        out_specs=VMEM_SPEC,
    )(*ins)
    return y[:, 0]                                              # [B]


# ----------------------------------------------------------------------------
# Pure-JAX f32 reference (same stored params) for a correctness check.
# ----------------------------------------------------------------------------
def mtrec_reference(params, user_ids, item_ids, seq_items, nhead):
    B, S = seq_items.shape
    D = params['user_embed'].shape[-1]
    H, hd = nhead, D // nhead
    f32 = jnp.float32

    u = params['user_embed'][user_ids]
    it = params['item_embed'][item_ids]
    x = params['item_embed'][seq_items].reshape(B * S, D).astype(f32)
    L = params['wqkv_t'].shape[0]
    scale = 1.0 / float(hd) ** 0.5

    def ln(v, w, b, eps=1e-5):
        mu = v.mean(-1, keepdims=True)
        var = ((v - mu) ** 2).mean(-1, keepdims=True)
        return (v - mu) / jnp.sqrt(var + eps) * w + b

    for l in range(L):
        qkv = x @ params['wqkv_t'][l].astype(f32) + params['bqkv'][l]
        q = (qkv[:, :D] * scale).reshape(B, S, H, hd).transpose(0, 2, 1, 3)
        k = qkv[:, D:2 * D].reshape(B, S, H, hd).transpose(0, 2, 1, 3)
        v = qkv[:, 2 * D:].reshape(B, S, H, hd).transpose(0, 2, 1, 3)
        s = jnp.einsum('bhqe,bhke->bhqk', q, k)
        p = jax.nn.softmax(s, axis=-1)
        ctx = jnp.einsum('bhqk,bhke->bhqe', p, v)
        ctx = ctx.transpose(0, 2, 1, 3).reshape(B * S, D)
        attn = ctx @ params['wo_t'][l].astype(f32) + params['bo'][l]
        x = ln(x + attn, params['ln1w'][l], params['ln1b'][l])
        h1 = jnp.maximum(x @ params['w1_t'][l].astype(f32) + params['b1'][l], 0.0)
        ff = h1 @ params['w2_t'][l].astype(f32) + params['b2'][l]
        x = ln(x + ff, params['ln2w'][l], params['ln2b'][l])

    seq_out = x.reshape(B, S, D)[:, S - 1, :]
    hp = (u @ params['pw1u_t'].astype(f32)
          + seq_out @ params['pw1s_t'].astype(f32)
          + it @ params['pw1i_t'].astype(f32) + params['pb1'])
    hp = jnp.maximum(hp, 0.0)
    return (hp @ params['pw2_t'].astype(f32) + params['pb2'])[:, 0]


if __name__ == "__main__":
    num_users, num_items = 50, 100
    embed_dim, nhead, dim_ff, num_layers = 64, 4, 2048, 2
    B, S = 2, 8

    key = jax.random.PRNGKey(0)
    k_param, k_u, k_i, k_s = jax.random.split(key, 4)
    params = init_params(k_param, num_users, num_items, embed_dim, nhead,
                         dim_ff, num_layers)

    user_ids = jax.random.randint(k_u, (B,), 0, num_users)
    item_ids = jax.random.randint(k_i, (B,), 0, num_items)
    seq_items = jax.random.randint(k_s, (B, S), 0, num_items)

    out = mtrec_forward(params, user_ids, item_ids, seq_items, nhead=nhead)
    out = jax.block_until_ready(out)
    assert out.shape == (B,), out.shape
    assert bool(jnp.all(jnp.isfinite(out)))

    ref = mtrec_reference(params, user_ids, item_ids, seq_items, nhead)
    ref = jax.block_until_ready(ref)
    # loose tolerance: kernel uses bf16 MXU inputs + approx reciprocal
    assert bool(jnp.allclose(out, ref, atol=5e-2, rtol=5e-2)), (out, ref)

    print("KERNEL_OK")
</pallas_src>

<mosaic_0001>
module attributes {stable_mosaic.version = 11 : i64} {
  func.func @mtrec_kernel(%arg0: memref<16x64xf32, #tpu.memory_space<vmem>>, %arg1: memref<2x64xf32, #tpu.memory_space<vmem>>, %arg2: memref<2x64xf32, #tpu.memory_space<vmem>>, %arg3: memref<2x64x192xbf16, #tpu.memory_space<vmem>>, %arg4: memref<2x1x192xf32, #tpu.memory_space<vmem>>, %arg5: memref<2x64x64xbf16, #tpu.memory_space<vmem>>, %arg6: memref<2x1x64xf32, #tpu.memory_space<vmem>>, %arg7: memref<2x1x64xf32, #tpu.memory_space<vmem>>, %arg8: memref<2x1x64xf32, #tpu.memory_space<vmem>>, %arg9: memref<2x64x2048xbf16, #tpu.memory_space<vmem>>, %arg10: memref<2x1x2048xf32, #tpu.memory_space<vmem>>, %arg11: memref<2x2048x64xbf16, #tpu.memory_space<vmem>>, %arg12: memref<2x1x64xf32, #tpu.memory_space<vmem>>, %arg13: memref<2x1x64xf32, #tpu.memory_space<vmem>>, %arg14: memref<2x1x64xf32, #tpu.memory_space<vmem>>, %arg15: memref<64x128xbf16, #tpu.memory_space<vmem>>, %arg16: memref<64x128xbf16, #tpu.memory_space<vmem>>, %arg17: memref<64x128xbf16, #tpu.memory_space<vmem>>, %arg18: memref<1x128xf32, #tpu.memory_space<vmem>>, %arg19: memref<128x1xbf16, #tpu.memory_space<vmem>>, %arg20: memref<1x1xf32, #tpu.memory_space<vmem>>, %arg21: memref<2x128xf32, #tpu.memory_space<vmem>>) attributes {dimension_semantics = [], scalar_prefetch = 0 : i64, scratch_operands = 0 : i64, tpu.core_type = #tpu.core_type<tc>} {
    %c0 = arith.constant 0 : index
    %c0_0 = arith.constant 0 : index
    %0 = vector.load %arg0[%c0, %c0_0] : memref<16x64xf32, #tpu.memory_space<vmem>>, vector<16x64xf32>
    %1 = arith.truncf %0 : vector<16x64xf32> to vector<16x64xbf16>
    %c0_1 = arith.constant 0 : index
    %c0_2 = arith.constant 0 : index
    %c0_3 = arith.constant 0 : index
    %2 = vector.load %arg3[%c0_1, %c0_2, %c0_3] : memref<2x64x192xbf16, #tpu.memory_space<vmem>>, vector<1x64x192xbf16>
    %3 = vector.shape_cast %2 : vector<1x64x192xbf16> to vector<64x192xbf16>
    %cst = arith.constant dense<0.000000e+00> : vector<16x192xf32>
    %4 = tpu.matmul %1, %3, %cst {dimension_numbers = #tpu.dot_dimension_numbers<[1], [0], [0], [1], [0, 0, 1, 1], [], []>} : vector<16x64xbf16>, vector<64x192xbf16>, vector<16x192xf32> -> vector<16x192xf32>
    %c0_4 = arith.constant 0 : index
    %c0_5 = arith.constant 0 : index
    %c0_6 = arith.constant 0 : index
    %5 = vector.load %arg4[%c0_4, %c0_5, %c0_6] : memref<2x1x192xf32, #tpu.memory_space<vmem>>, vector<1x1x192xf32>
    %6 = vector.shape_cast %5 : vector<1x1x192xf32> to vector<1x192xf32>
    %7 = vector.broadcast %6 : vector<1x192xf32> to vector<16x192xf32>
    %8 = arith.addf %4, %7 : vector<16x192xf32>
    %9 = vector.extract_strided_slice %8 {offsets = [0, 0], sizes = [16, 64], strides = [1, 1]} : vector<16x192xf32> to vector<16x64xf32>
    %cst_7 = arith.constant 2.500000e-01 : f32
    %10 = vector.broadcast %cst_7 : f32 to vector<16x64xf32>
    %11 = arith.mulf %9, %10 : vector<16x64xf32>
    %12 = vector.extract_strided_slice %8 {offsets = [0, 64], sizes = [16, 64], strides = [1, 1]} : vector<16x192xf32> to vector<16x64xf32>
    %13 = vector.extract_strided_slice %8 {offsets = [0, 128], sizes = [16, 64], strides = [1, 1]} : vector<16x192xf32> to vector<16x64xf32>
    %14 = vector.extract_strided_slice %11 {offsets = [0, 0], sizes = [16, 16], strides = [1, 1]} : vector<16x64xf32> to vector<16x16xf32>
    %15 = vector.shape_cast %14 : vector<16x16xf32> to vector<2x8x16xf32>
    %16 = arith.truncf %15 : vector<2x8x16xf32> to vector<2x8x16xbf16>
    %17 = vector.extract_strided_slice %12 {offsets = [0, 0], sizes = [16, 16], strides = [1, 1]} : vector<16x64xf32> to vector<16x16xf32>
    %18 = vector.shape_cast %17 : vector<16x16xf32> to vector<2x8x16xf32>
    %19 = arith.truncf %18 : vector<2x8x16xf32> to vector<2x8x16xbf16>
    %20 = vector.extract_strided_slice %13 {offsets = [0, 0], sizes = [16, 16], strides = [1, 1]} : vector<16x64xf32> to vector<16x16xf32>
    %21 = vector.shape_cast %20 : vector<16x16xf32> to vector<2x8x16xf32>
    %22 = arith.truncf %21 : vector<2x8x16xf32> to vector<2x8x16xbf16>
    "tpu.trace_start"() <{level = 10 : i32, message = "bqe,bke->bqk"}> : () -> ()
    %cst_8 = arith.constant dense<0.000000e+00> : vector<2x8x8xf32>
    %23 = tpu.matmul %16, %19, %cst_8 {dimension_numbers = #tpu.dot_dimension_numbers<[2], [2], [1], [1], [0, 0, 0, 1, 1, 1], [0], [0]>} : vector<2x8x16xbf16>, vector<2x8x16xbf16>, vector<2x8x8xf32> -> vector<2x8x8xf32>
    "tpu.trace_stop"() : () -> ()
    %cst_9 = arith.constant dense<0xFF800000> : vector<2x8xf32>
    %24 = vector.multi_reduction <maximumf>, %23, %cst_9 [2] : vector<2x8x8xf32> to vector<2x8xf32>
    %25 = vector.shape_cast %24 : vector<2x8xf32> to vector<2x8x1xf32>
    %26 = vector.broadcast %25 : vector<2x8x1xf32> to vector<2x8x8xf32>
    %27 = arith.subf %23, %26 : vector<2x8x8xf32>
    %28 = math.exp %27 : vector<2x8x8xf32>
    %cst_10 = arith.constant dense<0.000000e+00> : vector<2x8xf32>
    %29 = vector.multi_reduction <add>, %28, %cst_10 [2] : vector<2x8x8xf32> to vector<2x8xf32>
    %30 = vector.shape_cast %29 : vector<2x8xf32> to vector<2x8x1xf32>
    %31 = tpu.reciprocal %30 {approx = true} : vector<2x8x1xf32> -> vector<2x8x1xf32>
    %32 = vector.broadcast %31 : vector<2x8x1xf32> to vector<2x8x8xf32>
    %33 = arith.mulf %28, %32 : vector<2x8x8xf32>
    %34 = arith.truncf %33 : vector<2x8x8xf32> to vector<2x8x8xbf16>
    "tpu.trace_start"() <{level = 10 : i32, message = "bqk,bke->bqe"}> : () -> ()
    %cst_11 = arith.constant dense<0.000000e+00> : vector<2x8x16xf32>
    %35 = tpu.matmul %34, %22, %cst_11 {dimension_numbers = #tpu.dot_dimension_numbers<[2], [1], [1], [2], [0, 0, 0, 1, 1, 2], [0], [0]>} : vector<2x8x8xbf16>, vector<2x8x16xbf16>, vector<2x8x16xf32> -> vector<2x8x16xf32>
    "tpu.trace_stop"() : () -> ()
    %36 = vector.shape_cast %35 : vector<2x8x16xf32> to vector<16x16xf32>
    %37 = vector.extract_strided_slice %11 {offsets = [0, 16], sizes = [16, 16], strides = [1, 1]} : vector<16x64xf32> to vector<16x16xf32>
    %38 = vector.shape_cast %37 : vector<16x16xf32> to vector<2x8x16xf32>
    %39 = arith.truncf %38 : vector<2x8x16xf32> to vector<2x8x16xbf16>
    %40 = vector.extract_strided_slice %12 {offsets = [0, 16], sizes = [16, 16], strides = [1, 1]} : vector<16x64xf32> to vector<16x16xf32>
    %41 = vector.shape_cast %40 : vector<16x16xf32> to vector<2x8x16xf32>
    %42 = arith.truncf %41 : vector<2x8x16xf32> to vector<2x8x16xbf16>
    %43 = vector.extract_strided_slice %13 {offsets = [0, 16], sizes = [16, 16], strides = [1, 1]} : vector<16x64xf32> to vector<16x16xf32>
    %44 = vector.shape_cast %43 : vector<16x16xf32> to vector<2x8x16xf32>
    %45 = arith.truncf %44 : vector<2x8x16xf32> to vector<2x8x16xbf16>
    "tpu.trace_start"() <{level = 10 : i32, message = "bqe,bke->bqk"}> : () -> ()
    %cst_12 = arith.constant dense<0.000000e+00> : vector<2x8x8xf32>
    %46 = tpu.matmul %39, %42, %cst_12 {dimension_numbers = #tpu.dot_dimension_numbers<[2], [2], [1], [1], [0, 0, 0, 1, 1, 1], [0], [0]>} : vector<2x8x16xbf16>, vector<2x8x16xbf16>, vector<2x8x8xf32> -> vector<2x8x8xf32>
    "tpu.trace_stop"() : () -> ()
    %cst_13 = arith.constant dense<0xFF800000> : vector<2x8xf32>
    %47 = vector.multi_reduction <maximumf>, %46, %cst_13 [2] : vector<2x8x8xf32> to vector<2x8xf32>
    %48 = vector.shape_cast %47 : vector<2x8xf32> to vector<2x8x1xf32>
    %49 = vector.broadcast %48 : vector<2x8x1xf32> to vector<2x8x8xf32>
    %50 = arith.subf %46, %49 : vector<2x8x8xf32>
    %51 = math.exp %50 : vector<2x8x8xf32>
    %cst_14 = arith.constant dense<0.000000e+00> : vector<2x8xf32>
    %52 = vector.multi_reduction <add>, %51, %cst_14 [2] : vector<2x8x8xf32> to vector<2x8xf32>
    %53 = vector.shape_cast %52 : vector<2x8xf32> to vector<2x8x1xf32>
    %54 = tpu.reciprocal %53 {approx = true} : vector<2x8x1xf32> -> vector<2x8x1xf32>
    %55 = vector.broadcast %54 : vector<2x8x1xf32> to vector<2x8x8xf32>
    %56 = arith.mulf %51, %55 : vector<2x8x8xf32>
    %57 = arith.truncf %56 : vector<2x8x8xf32> to vector<2x8x8xbf16>
    "tpu.trace_start"() <{level = 10 : i32, message = "bqk,bke->bqe"}> : () -> ()
    %cst_15 = arith.constant dense<0.000000e+00> : vector<2x8x16xf32>
    %58 = tpu.matmul %57, %45, %cst_15 {dimension_numbers = #tpu.dot_dimension_numbers<[2], [1], [1], [2], [0, 0, 0, 1, 1, 2], [0], [0]>} : vector<2x8x8xbf16>, vector<2x8x16xbf16>, vector<2x8x16xf32> -> vector<2x8x16xf32>
    "tpu.trace_stop"() : () -> ()
    %59 = vector.shape_cast %58 : vector<2x8x16xf32> to vector<16x16xf32>
    %60 = vector.extract_strided_slice %11 {offsets = [0, 32], sizes = [16, 16], strides = [1, 1]} : vector<16x64xf32> to vector<16x16xf32>
    %61 = vector.shape_cast %60 : vector<16x16xf32> to vector<2x8x16xf32>
    %62 = arith.truncf %61 : vector<2x8x16xf32> to vector<2x8x16xbf16>
    %63 = vector.extract_strided_slice %12 {offsets = [0, 32], sizes = [16, 16], strides = [1, 1]} : vector<16x64xf32> to vector<16x16xf32>
    %64 = vector.shape_cast %63 : vector<16x16xf32> to vector<2x8x16xf32>
    %65 = arith.truncf %64 : vector<2x8x16xf32> to vector<2x8x16xbf16>
    %66 = vector.extract_strided_slice %13 {offsets = [0, 32], sizes = [16, 16], strides = [1, 1]} : vector<16x64xf32> to vector<16x16xf32>
    %67 = vector.shape_cast %66 : vector<16x16xf32> to vector<2x8x16xf32>
    %68 = arith.truncf %67 : vector<2x8x16xf32> to vector<2x8x16xbf16>
    "tpu.trace_start"() <{level = 10 : i32, message = "bqe,bke->bqk"}> : () -> ()
    %cst_16 = arith.constant dense<0.000000e+00> : vector<2x8x8xf32>
    %69 = tpu.matmul %62, %65, %cst_16 {dimension_numbers = #tpu.dot_dimension_numbers<[2], [2], [1], [1], [0, 0, 0, 1, 1, 1], [0], [0]>} : vector<2x8x16xbf16>, vector<2x8x16xbf16>, vector<2x8x8xf32> -> vector<2x8x8xf32>
    "tpu.trace_stop"() : () -> ()
    %cst_17 = arith.constant dense<0xFF800000> : vector<2x8xf32>
    %70 = vector.multi_reduction <maximumf>, %69, %cst_17 [2] : vector<2x8x8xf32> to vector<2x8xf32>
    %71 = vector.shape_cast %70 : vector<2x8xf32> to vector<2x8x1xf32>
    %72 = vector.broadcast %71 : vector<2x8x1xf32> to vector<2x8x8xf32>
    %73 = arith.subf %69, %72 : vector<2x8x8xf32>
    %74 = math.exp %73 : vector<2x8x8xf32>
    %cst_18 = arith.constant dense<0.000000e+00> : vector<2x8xf32>
    %75 = vector.multi_reduction <add>, %74, %cst_18 [2] : vector<2x8x8xf32> to vector<2x8xf32>
    %76 = vector.shape_cast %75 : vector<2x8xf32> to vector<2x8x1xf32>
    %77 = tpu.reciprocal %76 {approx = true} : vector<2x8x1xf32> -> vector<2x8x1xf32>
    %78 = vector.broadcast %77 : vector<2x8x1xf32> to vector<2x8x8xf32>
    %79 = arith.mulf %74, %78 : vector<2x8x8xf32>
    %80 = arith.truncf %79 : vector<2x8x8xf32> to vector<2x8x8xbf16>
    "tpu.trace_start"() <{level = 10 : i32, message = "bqk,bke->bqe"}> : () -> ()
    %cst_19 = arith.constant dense<0.000000e+00> : vector<2x8x16xf32>
    %81 = tpu.matmul %80, %68, %cst_19 {dimension_numbers = #tpu.dot_dimension_numbers<[2], [1], [1], [2], [0, 0, 0, 1, 1, 2], [0], [0]>} : vector<2x8x8xbf16>, vector<2x8x16xbf16>, vector<2x8x16xf32> -> vector<2x8x16xf32>
    "tpu.trace_stop"() : () -> ()
    %82 = vector.shape_cast %81 : vector<2x8x16xf32> to vector<16x16xf32>
    %83 = vector.extract_strided_slice %11 {offsets = [0, 48], sizes = [16, 16], strides = [1, 1]} : vector<16x64xf32> to vector<16x16xf32>
    %84 = vector.shape_cast %83 : vector<16x16xf32> to vector<2x8x16xf32>
    %85 = arith.truncf %84 : vector<2x8x16xf32> to vector<2x8x16xbf16>
    %86 = vector.extract_strided_slice %12 {offsets = [0, 48], sizes = [16, 16], strides = [1, 1]} : vector<16x64xf32> to vector<16x16xf32>
    %87 = vector.shape_cast %86 : vector<16x16xf32> to vector<2x8x16xf32>
    %88 = arith.truncf %87 : vector<2x8x16xf32> to vector<2x8x16xbf16>
    %89 = vector.extract_strided_slice %13 {offsets = [0, 48], sizes = [16, 16], strides = [1, 1]} : vector<16x64xf32> to vector<16x16xf32>
    %90 = vector.shape_cast %89 : vector<16x16xf32> to vector<2x8x16xf32>
    %91 = arith.truncf %90 : vector<2x8x16xf32> to vector<2x8x16xbf16>
    "tpu.trace_start"() <{level = 10 : i32, message = "bqe,bke->bqk"}> : () -> ()
    %cst_20 = arith.constant dense<0.000000e+00> : vector<2x8x8xf32>
    %92 = tpu.matmul %85, %88, %cst_20 {dimension_numbers = #tpu.dot_dimension_numbers<[2], [2], [1], [1], [0, 0, 0, 1, 1, 1], [0], [0]>} : vector<2x8x16xbf16>, vector<2x8x16xbf16>, vector<2x8x8xf32> -> vector<2x8x8xf32>
    "tpu.trace_stop"() : () -> ()
    %cst_21 = arith.constant dense<0xFF800000> : vector<2x8xf32>
    %93 = vector.multi_reduction <maximumf>, %92, %cst_21 [2] : vector<2x8x8xf32> to vector<2x8xf32>
    %94 = vector.shape_cast %93 : vector<2x8xf32> to vector<2x8x1xf32>
    %95 = vector.broadcast %94 : vector<2x8x1xf32> to vector<2x8x8xf32>
    %96 = arith.subf %92, %95 : vector<2x8x8xf32>
    %97 = math.exp %96 : vector<2x8x8xf32>
    %cst_22 = arith.constant dense<0.000000e+00> : vector<2x8xf32>
    %98 = vector.multi_reduction <add>, %97, %cst_22 [2] : vector<2x8x8xf32> to vector<2x8xf32>
    %99 = vector.shape_cast %98 : vector<2x8xf32> to vector<2x8x1xf32>
    %100 = tpu.reciprocal %99 {approx = true} : vector<2x8x1xf32> -> vector<2x8x1xf32>
    %101 = vector.broadcast %100 : vector<2x8x1xf32> to vector<2x8x8xf32>
    %102 = arith.mulf %97, %101 : vector<2x8x8xf32>
    %103 = arith.truncf %102 : vector<2x8x8xf32> to vector<2x8x8xbf16>
    "tpu.trace_start"() <{level = 10 : i32, message = "bqk,bke->bqe"}> : () -> ()
    %cst_23 = arith.constant dense<0.000000e+00> : vector<2x8x16xf32>
    %104 = tpu.matmul %103, %91, %cst_23 {dimension_numbers = #tpu.dot_dimension_numbers<[2], [1], [1], [2], [0, 0, 0, 1, 1, 2], [0], [0]>} : vector<2x8x8xbf16>, vector<2x8x16xbf16>, vector<2x8x16xf32> -> vector<2x8x16xf32>
    "tpu.trace_stop"() : () -> ()
    %105 = vector.shape_cast %104 : vector<2x8x16xf32> to vector<16x16xf32>
    %106 = tpu.concatenate %36, %59, %82, %105 in 1 : vector<16x16xf32>, vector<16x16xf32>, vector<16x16xf32>, vector<16x16xf32> -> vector<16x64xf32>
    %107 = arith.truncf %106 : vector<16x64xf32> to vector<16x64xbf16>
    %c0_24 = arith.constant 0 : index
    %c0_25 = arith.constant 0 : index
    %c0_26 = arith.constant 0 : index
    %108 = vector.load %arg5[%c0_24, %c0_25, %c0_26] : memref<2x64x64xbf16, #tpu.memory_space<vmem>>, vector<1x64x64xbf16>
    %109 = vector.shape_cast %108 : vector<1x64x64xbf16> to vector<64x64xbf16>
    %cst_27 = arith.constant dense<0.000000e+00> : vector<16x64xf32>
    %110 = tpu.matmul %107, %109, %cst_27 {dimension_numbers = #tpu.dot_dimension_numbers<[1], [0], [0], [1], [0, 0, 1, 1], [], []>} : vector<16x64xbf16>, vector<64x64xbf16>, vector<16x64xf32> -> vector<16x64xf32>
    %c0_28 = arith.constant 0 : index
    %c0_29 = arith.constant 0 : index
    %c0_30 = arith.constant 0 : index
    %111 = vector.load %arg6[%c0_28, %c0_29, %c0_30] : memref<2x1x64xf32, #tpu.memory_space<vmem>>, vector<1x1x64xf32>
    %112 = vector.shape_cast %111 : vector<1x1x64xf32> to vector<1x64xf32>
    %113 = vector.broadcast %112 : vector<1x64xf32> to vector<16x64xf32>
    %114 = arith.addf %110, %113 : vector<16x64xf32>
    %115 = arith.addf %0, %114 : vector<16x64xf32>
    %c0_31 = arith.constant 0 : index
    %c0_32 = arith.constant 0 : index
    %c0_33 = arith.constant 0 : index
    %116 = vector.load %arg7[%c0_31, %c0_32, %c0_33] : memref<2x1x64xf32, #tpu.memory_space<vmem>>, vector<1x1x64xf32>
    %117 = vector.shape_cast %116 : vector<1x1x64xf32> to vector<1x64xf32>
    %c0_34 = arith.constant 0 : index
    %c0_35 = arith.constant 0 : index
    %c0_36 = arith.constant 0 : index
    %118 = vector.load %arg8[%c0_34, %c0_35, %c0_36] : memref<2x1x64xf32, #tpu.memory_space<vmem>>, vector<1x1x64xf32>
    %119 = vector.shape_cast %118 : vector<1x1x64xf32> to vector<1x64xf32>
    %cst_37 = arith.constant dense<0.000000e+00> : vector<16xf32>
    %120 = vector.multi_reduction <add>, %115, %cst_37 [1] : vector<16x64xf32> to vector<16xf32>
    %121 = vector.shape_cast %120 : vector<16xf32> to vector<16x1xf32>
    %cst_38 = arith.constant 6.400000e+01 : f32
    %122 = vector.broadcast %cst_38 : f32 to vector<16x1xf32>
    %123 = arith.divf %121, %122 : vector<16x1xf32>
    %124 = vector.broadcast %123 : vector<16x1xf32> to vector<16x64xf32>
    %125 = arith.subf %115, %124 : vector<16x64xf32>
    %126 = arith.mulf %125, %125 : vector<16x64xf32>
    %cst_39 = arith.constant dense<0.000000e+00> : vector<16xf32>
    %127 = vector.multi_reduction <add>, %126, %cst_39 [1] : vector<16x64xf32> to vector<16xf32>
    %128 = vector.shape_cast %127 : vector<16xf32> to vector<16x1xf32>
    %cst_40 = arith.constant 6.400000e+01 : f32
    %129 = vector.broadcast %cst_40 : f32 to vector<16x1xf32>
    %130 = arith.divf %128, %129 : vector<16x1xf32>
    %131 = vector.broadcast %123 : vector<16x1xf32> to vector<16x64xf32>
    %132 = arith.subf %115, %131 : vector<16x64xf32>
    %cst_41 = arith.constant 9.99999974E-6 : f32
    %133 = vector.broadcast %cst_41 : f32 to vector<16x1xf32>
    %134 = arith.addf %130, %133 : vector<16x1xf32>
    %135 = math.rsqrt %134 : vector<16x1xf32>
    %136 = vector.broadcast %135 : vector<16x1xf32> to vector<16x64xf32>
    %137 = arith.mulf %132, %136 : vector<16x64xf32>
    %138 = vector.broadcast %117 : vector<1x64xf32> to vector<16x64xf32>
    %139 = arith.mulf %137, %138 : vector<16x64xf32>
    %140 = vector.broadcast %119 : vector<1x64xf32> to vector<16x64xf32>
    %141 = arith.addf %139, %140 : vector<16x64xf32>
    %142 = arith.truncf %141 : vector<16x64xf32> to vector<16x64xbf16>
    %c0_42 = arith.constant 0 : index
    %c0_43 = arith.constant 0 : index
    %c0_44 = arith.constant 0 : index
    %143 = vector.load %arg9[%c0_42, %c0_43, %c0_44] : memref<2x64x2048xbf16, #tpu.memory_space<vmem>>, vector<1x64x2048xbf16>
    %144 = vector.shape_cast %143 : vector<1x64x2048xbf16> to vector<64x2048xbf16>
    %cst_45 = arith.constant dense<0.000000e+00> : vector<16x2048xf32>
    %145 = tpu.matmul %142, %144, %cst_45 {dimension_numbers = #tpu.dot_dimension_numbers<[1], [0], [0], [1], [0, 0, 1, 1], [], []>} : vector<16x64xbf16>, vector<64x2048xbf16>, vector<16x2048xf32> -> vector<16x2048xf32>
    %c0_46 = arith.constant 0 : index
    %c0_47 = arith.constant 0 : index
    %c0_48 = arith.constant 0 : index
    %146 = vector.load %arg10[%c0_46, %c0_47, %c0_48] : memref<2x1x2048xf32, #tpu.memory_space<vmem>>, vector<1x1x2048xf32>
    %147 = vector.shape_cast %146 : vector<1x1x2048xf32> to vector<1x2048xf32>
    %148 = vector.broadcast %147 : vector<1x2048xf32> to vector<16x2048xf32>
    %149 = arith.addf %145, %148 : vector<16x2048xf32>
    %cst_49 = arith.constant 0.000000e+00 : f32
    %150 = vector.broadcast %cst_49 : f32 to vector<16x2048xf32>
    %151 = arith.maximumf %149, %150 : vector<16x2048xf32>
    %152 = arith.truncf %151 : vector<16x2048xf32> to vector<16x2048xbf16>
    %c0_50 = arith.constant 0 : index
    %c0_51 = arith.constant 0 : index
    %c0_52 = arith.constant 0 : index
    %153 = vector.load %arg11[%c0_50, %c0_51, %c0_52] : memref<2x2048x64xbf16, #tpu.memory_space<vmem>>, vector<1x2048x64xbf16>
    %154 = vector.shape_cast %153 : vector<1x2048x64xbf16> to vector<2048x64xbf16>
    %cst_53 = arith.constant dense<0.000000e+00> : vector<16x64xf32>
    %155 = tpu.matmul %152, %154, %cst_53 {dimension_numbers = #tpu.dot_dimension_numbers<[1], [0], [0], [1], [0, 0, 1, 1], [], []>} : vector<16x2048xbf16>, vector<2048x64xbf16>, vector<16x64xf32> -> vector<16x64xf32>
    %c0_54 = arith.constant 0 : index
    %c0_55 = arith.constant 0 : index
    %c0_56 = arith.constant 0 : index
    %156 = vector.load %arg12[%c0_54, %c0_55, %c0_56] : memref<2x1x64xf32, #tpu.memory_space<vmem>>, vector<1x1x64xf32>
    %157 = vector.shape_cast %156 : vector<1x1x64xf32> to vector<1x64xf32>
    %158 = vector.broadcast %157 : vector<1x64xf32> to vector<16x64xf32>
    %159 = arith.addf %155, %158 : vector<16x64xf32>
    %160 = arith.addf %141, %159 : vector<16x64xf32>
    %c0_57 = arith.constant 0 : index
    %c0_58 = arith.constant 0 : index
    %c0_59 = arith.constant 0 : index
    %161 = vector.load %arg13[%c0_57, %c0_58, %c0_59] : memref<2x1x64xf32, #tpu.memory_space<vmem>>, vector<1x1x64xf32>
    %162 = vector.shape_cast %161 : vector<1x1x64xf32> to vector<1x64xf32>
    %c0_60 = arith.constant 0 : index
    %c0_61 = arith.constant 0 : index
    %c0_62 = arith.constant 0 : index
    %163 = vector.load %arg14[%c0_60, %c0_61, %c0_62] : memref<2x1x64xf32, #tpu.memory_space<vmem>>, vector<1x1x64xf32>
    %164 = vector.shape_cast %163 : vector<1x1x64xf32> to vector<1x64xf32>
    %cst_63 = arith.constant dense<0.000000e+00> : vector<16xf32>
    %165 = vector.multi_reduction <add>, %160, %cst_63 [1] : vector<16x64xf32> to vector<16xf32>
    %166 = vector.shape_cast %165 : vector<16xf32> to vector<16x1xf32>
    %cst_64 = arith.constant 6.400000e+01 : f32
    %167 = vector.broadcast %cst_64 : f32 to vector<16x1xf32>
    %168 = arith.divf %166, %167 : vector<16x1xf32>
    %169 = vector.broadcast %168 : vector<16x1xf32> to vector<16x64xf32>
    %170 = arith.subf %160, %169 : vector<16x64xf32>
    %171 = arith.mulf %170, %170 : vector<16x64xf32>
    %cst_65 = arith.constant dense<0.000000e+00> : vector<16xf32>
    %172 = vector.multi_reduction <add>, %171, %cst_65 [1] : vector<16x64xf32> to vector<16xf32>
    %173 = vector.shape_cast %172 : vector<16xf32> to vector<16x1xf32>
    %cst_66 = arith.constant 6.400000e+01 : f32
    %174 = vector.broadcast %cst_66 : f32 to vector<16x1xf32>
    %175 = arith.divf %173, %174 : vector<16x1xf32>
    %176 = vector.broadcast %168 : vector<16x1xf32> to vector<16x64xf32>
    %177 = arith.subf %160, %176 : vector<16x64xf32>
    %cst_67 = arith.constant 9.99999974E-6 : f32
    %178 = vector.broadcast %cst_67 : f32 to vector<16x1xf32>
    %179 = arith.addf %175, %178 : vector<16x1xf32>
    %180 = math.rsqrt %179 : vector<16x1xf32>
    %181 = vector.broadcast %180 : vector<16x1xf32> to vector<16x64xf32>
    %182 = arith.mulf %177, %181 : vector<16x64xf32>
    %183 = vector.broadcast %162 : vector<1x64xf32> to vector<16x64xf32>
    %184 = arith.mulf %182, %183 : vector<16x64xf32>
    %185 = vector.broadcast %164 : vector<1x64xf32> to vector<16x64xf32>
    %186 = arith.addf %184, %185 : vector<16x64xf32>
    %187 = arith.truncf %186 : vector<16x64xf32> to vector<16x64xbf16>
    %c1 = arith.constant 1 : index
    %c0_68 = arith.constant 0 : index
    %c0_69 = arith.constant 0 : index
    %188 = vector.load %arg3[%c1, %c0_68, %c0_69] : memref<2x64x192xbf16, #tpu.memory_space<vmem>>, vector<1x64x192xbf16>
    %189 = vector.shape_cast %188 : vector<1x64x192xbf16> to vector<64x192xbf16>
    %cst_70 = arith.constant dense<0.000000e+00> : vector<16x192xf32>
    %190 = tpu.matmul %187, %189, %cst_70 {dimension_numbers = #tpu.dot_dimension_numbers<[1], [0], [0], [1], [0, 0, 1, 1], [], []>} : vector<16x64xbf16>, vector<64x192xbf16>, vector<16x192xf32> -> vector<16x192xf32>
    %c1_71 = arith.constant 1 : index
    %c0_72 = arith.constant 0 : index
    %c0_73 = arith.constant 0 : index
    %191 = vector.load %arg4[%c1_71, %c0_72, %c0_73] : memref<2x1x192xf32, #tpu.memory_space<vmem>>, vector<1x1x192xf32>
    %192 = vector.shape_cast %191 : vector<1x1x192xf32> to vector<1x192xf32>
    %193 = vector.broadcast %192 : vector<1x192xf32> to vector<16x192xf32>
    %194 = arith.addf %190, %193 : vector<16x192xf32>
    %195 = vector.extract_strided_slice %194 {offsets = [0, 0], sizes = [16, 64], strides = [1, 1]} : vector<16x192xf32> to vector<16x64xf32>
    %cst_74 = arith.constant 2.500000e-01 : f32
    %196 = vector.broadcast %cst_74 : f32 to vector<16x64xf32>
    %197 = arith.mulf %195, %196 : vector<16x64xf32>
    %198 = vector.extract_strided_slice %194 {offsets = [0, 64], sizes = [16, 64], strides = [1, 1]} : vector<16x192xf32> to vector<16x64xf32>
    %199 = vector.extract_strided_slice %194 {offsets = [0, 128], sizes = [16, 64], strides = [1, 1]} : vector<16x192xf32> to vector<16x64xf32>
    %200 = vector.extract_strided_slice %197 {offsets = [0, 0], sizes = [16, 16], strides = [1, 1]} : vector<16x64xf32> to vector<16x16xf32>
    %201 = vector.shape_cast %200 : vector<16x16xf32> to vector<2x8x16xf32>
    %202 = arith.truncf %201 : vector<2x8x16xf32> to vector<2x8x16xbf16>
    %203 = vector.extract_strided_slice %198 {offsets = [0, 0], sizes = [16, 16], strides = [1, 1]} : vector<16x64xf32> to vector<16x16xf32>
    %204 = vector.shape_cast %203 : vector<16x16xf32> to vector<2x8x16xf32>
    %205 = arith.truncf %204 : vector<2x8x16xf32> to vector<2x8x16xbf16>
    %206 = vector.extract_strided_slice %199 {offsets = [0, 0], sizes = [16, 16], strides = [1, 1]} : vector<16x64xf32> to vector<16x16xf32>
    %207 = vector.shape_cast %206 : vector<16x16xf32> to vector<2x8x16xf32>
    %208 = arith.truncf %207 : vector<2x8x16xf32> to vector<2x8x16xbf16>
    "tpu.trace_start"() <{level = 10 : i32, message = "bqe,bke->bqk"}> : () -> ()
    %cst_75 = arith.constant dense<0.000000e+00> : vector<2x8x8xf32>
    %209 = tpu.matmul %202, %205, %cst_75 {dimension_numbers = #tpu.dot_dimension_numbers<[2], [2], [1], [1], [0, 0, 0, 1, 1, 1], [0], [0]>} : vector<2x8x16xbf16>, vector<2x8x16xbf16>, vector<2x8x8xf32> -> vector<2x8x8xf32>
    "tpu.trace_stop"() : () -> ()
    %cst_76 = arith.constant dense<0xFF800000> : vector<2x8xf32>
    %210 = vector.multi_reduction <maximumf>, %209, %cst_76 [2] : vector<2x8x8xf32> to vector<2x8xf32>
    %211 = vector.shape_cast %210 : vector<2x8xf32> to vector<2x8x1xf32>
    %212 = vector.broadcast %211 : vector<2x8x1xf32> to vector<2x8x8xf32>
    %213 = arith.subf %209, %212 : vector<2x8x8xf32>
    %214 = math.exp %213 : vector<2x8x8xf32>
    %cst_77 = arith.constant dense<0.000000e+00> : vector<2x8xf32>
    %215 = vector.multi_reduction <add>, %214, %cst_77 [2] : vector<2x8x8xf32> to vector<2x8xf32>
    %216 = vector.shape_cast %215 : vector<2x8xf32> to vector<2x8x1xf32>
    %217 = tpu.reciprocal %216 {approx = true} : vector<2x8x1xf32> -> vector<2x8x1xf32>
    %218 = vector.broadcast %217 : vector<2x8x1xf32> to vector<2x8x8xf32>
    %219 = arith.mulf %214, %218 : vector<2x8x8xf32>
    %220 = arith.truncf %219 : vector<2x8x8xf32> to vector<2x8x8xbf16>
    "tpu.trace_start"() <{level = 10 : i32, message = "bqk,bke->bqe"}> : () -> ()
    %cst_78 = arith.constant dense<0.000000e+00> : vector<2x8x16xf32>
    %221 = tpu.matmul %220, %208, %cst_78 {dimension_numbers = #tpu.dot_dimension_numbers<[2], [1], [1], [2], [0, 0, 0, 1, 1, 2], [0], [0]>} : vector<2x8x8xbf16>, vector<2x8x16xbf16>, vector<2x8x16xf32> -> vector<2x8x16xf32>
    "tpu.trace_stop"() : () -> ()
    %222 = vector.shape_cast %221 : vector<2x8x16xf32> to vector<16x16xf32>
    %223 = vector.extract_strided_slice %197 {offsets = [0, 16], sizes = [16, 16], strides = [1, 1]} : vector<16x64xf32> to vector<16x16xf32>
    %224 = vector.shape_cast %223 : vector<16x16xf32> to vector<2x8x16xf32>
    %225 = arith.truncf %224 : vector<2x8x16xf32> to vector<2x8x16xbf16>
    %226 = vector.extract_strided_slice %198 {offsets = [0, 16], sizes = [16, 16], strides = [1, 1]} : vector<16x64xf32> to vector<16x16xf32>
    %227 = vector.shape_cast %226 : vector<16x16xf32> to vector<2x8x16xf32>
    %228 = arith.truncf %227 : vector<2x8x16xf32> to vector<2x8x16xbf16>
    %229 = vector.extract_strided_slice %199 {offsets = [0, 16], sizes = [16, 16], strides = [1, 1]} : vector<16x64xf32> to vector<16x16xf32>
    %230 = vector.shape_cast %229 : vector<16x16xf32> to vector<2x8x16xf32>
    %231 = arith.truncf %230 : vector<2x8x16xf32> to vector<2x8x16xbf16>
    "tpu.trace_start"() <{level = 10 : i32, message = "bqe,bke->bqk"}> : () -> ()
    %cst_79 = arith.constant dense<0.000000e+00> : vector<2x8x8xf32>
    %232 = tpu.matmul %225, %228, %cst_79 {dimension_numbers = #tpu.dot_dimension_numbers<[2], [2], [1], [1], [0, 0, 0, 1, 1, 1], [0], [0]>} : vector<2x8x16xbf16>, vector<2x8x16xbf16>, vector<2x8x8xf32> -> vector<2x8x8xf32>
    "tpu.trace_stop"() : () -> ()
    %cst_80 = arith.constant dense<0xFF800000> : vector<2x8xf32>
    %233 = vector.multi_reduction <maximumf>, %232, %cst_80 [2] : vector<2x8x8xf32> to vector<2x8xf32>
    %234 = vector.shape_cast %233 : vector<2x8xf32> to vector<2x8x1xf32>
    %235 = vector.broadcast %234 : vector<2x8x1xf32> to vector<2x8x8xf32>
    %236 = arith.subf %232, %235 : vector<2x8x8xf32>
    %237 = math.exp %236 : vector<2x8x8xf32>
    %cst_81 = arith.constant dense<0.000000e+00> : vector<2x8xf32>
    %238 = vector.multi_reduction <add>, %237, %cst_81 [2] : vector<2x8x8xf32> to vector<2x8xf32>
    %239 = vector.shape_cast %238 : vector<2x8xf32> to vector<2x8x1xf32>
    %240 = tpu.reciprocal %239 {approx = true} : vector<2x8x1xf32> -> vector<2x8x1xf32>
    %241 = vector.broadcast %240 : vector<2x8x1xf32> to vector<2x8x8xf32>
    %242 = arith.mulf %237, %241 : vector<2x8x8xf32>
    %243 = arith.truncf %242 : vector<2x8x8xf32> to vector<2x8x8xbf16>
    "tpu.trace_start"() <{level = 10 : i32, message = "bqk,bke->bqe"}> : () -> ()
    %cst_82 = arith.constant dense<0.000000e+00> : vector<2x8x16xf32>
    %244 = tpu.matmul %243, %231, %cst_82 {dimension_numbers = #tpu.dot_dimension_numbers<[2], [1], [1], [2], [0, 0, 0, 1, 1, 2], [0], [0]>} : vector<2x8x8xbf16>, vector<2x8x16xbf16>, vector<2x8x16xf32> -> vector<2x8x16xf32>
    "tpu.trace_stop"() : () -> ()
    %245 = vector.shape_cast %244 : vector<2x8x16xf32> to vector<16x16xf32>
    %246 = vector.extract_strided_slice %197 {offsets = [0, 32], sizes = [16, 16], strides = [1, 1]} : vector<16x64xf32> to vector<16x16xf32>
    %247 = vector.shape_cast %246 : vector<16x16xf32> to vector<2x8x16xf32>
    %248 = arith.truncf %247 : vector<2x8x16xf32> to vector<2x8x16xbf16>
    %249 = vector.extract_strided_slice %198 {offsets = [0, 32], sizes = [16, 16], strides = [1, 1]} : vector<16x64xf32> to vector<16x16xf32>
    %250 = vector.shape_cast %249 : vector<16x16xf32> to vector<2x8x16xf32>
    %251 = arith.truncf %250 : vector<2x8x16xf32> to vector<2x8x16xbf16>
    %252 = vector.extract_strided_slice %199 {offsets = [0, 32], sizes = [16, 16], strides = [1, 1]} : vector<16x64xf32> to vector<16x16xf32>
    %253 = vector.shape_cast %252 : vector<16x16xf32> to vector<2x8x16xf32>
    %254 = arith.truncf %253 : vector<2x8x16xf32> to vector<2x8x16xbf16>
    "tpu.trace_start"() <{level = 10 : i32, message = "bqe,bke->bqk"}> : () -> ()
    %cst_83 = arith.constant dense<0.000000e+00> : vector<2x8x8xf32>
    %255 = tpu.matmul %248, %251, %cst_83 {dimension_numbers = #tpu.dot_dimension_numbers<[2], [2], [1], [1], [0, 0, 0, 1, 1, 1], [0], [0]>} : vector<2x8x16xbf16>, vector<2x8x16xbf16>, vector<2x8x8xf32> -> vector<2x8x8xf32>
    "tpu.trace_stop"() : () -> ()
    %cst_84 = arith.constant dense<0xFF800000> : vector<2x8xf32>
    %256 = vector.multi_reduction <maximumf>, %255, %cst_84 [2] : vector<2x8x8xf32> to vector<2x8xf32>
    %257 = vector.shape_cast %256 : vector<2x8xf32> to vector<2x8x1xf32>
    %258 = vector.broadcast %257 : vector<2x8x1xf32> to vector<2x8x8xf32>
    %259 = arith.subf %255, %258 : vector<2x8x8xf32>
    %260 = math.exp %259 : vector<2x8x8xf32>
    %cst_85 = arith.constant dense<0.000000e+00> : vector<2x8xf32>
    %261 = vector.multi_reduction <add>, %260, %cst_85 [2] : vector<2x8x8xf32> to vector<2x8xf32>
    %262 = vector.shape_cast %261 : vector<2x8xf32> to vector<2x8x1xf32>
    %263 = tpu.reciprocal %262 {approx = true} : vector<2x8x1xf32> -> vector<2x8x1xf32>
    %264 = vector.broadcast %263 : vector<2x8x1xf32> to vector<2x8x8xf32>
    %265 = arith.mulf %260, %264 : vector<2x8x8xf32>
    %266 = arith.truncf %265 : vector<2x8x8xf32> to vector<2x8x8xbf16>
    "tpu.trace_start"() <{level = 10 : i32, message = "bqk,bke->bqe"}> : () -> ()
    %cst_86 = arith.constant dense<0.000000e+00> : vector<2x8x16xf32>
    %267 = tpu.matmul %266, %254, %cst_86 {dimension_numbers = #tpu.dot_dimension_numbers<[2], [1], [1], [2], [0, 0, 0, 1, 1, 2], [0], [0]>} : vector<2x8x8xbf16>, vector<2x8x16xbf16>, vector<2x8x16xf32> -> vector<2x8x16xf32>
    "tpu.trace_stop"() : () -> ()
    %268 = vector.shape_cast %267 : vector<2x8x16xf32> to vector<16x16xf32>
    %269 = vector.extract_strided_slice %197 {offsets = [0, 48], sizes = [16, 16], strides = [1, 1]} : vector<16x64xf32> to vector<16x16xf32>
    %270 = vector.shape_cast %269 : vector<16x16xf32> to vector<2x8x16xf32>
    %271 = arith.truncf %270 : vector<2x8x16xf32> to vector<2x8x16xbf16>
    %272 = vector.extract_strided_slice %198 {offsets = [0, 48], sizes = [16, 16], strides = [1, 1]} : vector<16x64xf32> to vector<16x16xf32>
    %273 = vector.shape_cast %272 : vector<16x16xf32> to vector<2x8x16xf32>
    %274 = arith.truncf %273 : vector<2x8x16xf32> to vector<2x8x16xbf16>
    %275 = vector.extract_strided_slice %199 {offsets = [0, 48], sizes = [16, 16], strides = [1, 1]} : vector<16x64xf32> to vector<16x16xf32>
    %276 = vector.shape_cast %275 : vector<16x16xf32> to vector<2x8x16xf32>
    %277 = arith.truncf %276 : vector<2x8x16xf32> to vector<2x8x16xbf16>
    "tpu.trace_start"() <{level = 10 : i32, message = "bqe,bke->bqk"}> : () -> ()
    %cst_87 = arith.constant dense<0.000000e+00> : vector<2x8x8xf32>
    %278 = tpu.matmul %271, %274, %cst_87 {dimension_numbers = #tpu.dot_dimension_numbers<[2], [2], [1], [1], [0, 0, 0, 1, 1, 1], [0], [0]>} : vector<2x8x16xbf16>, vector<2x8x16xbf16>, vector<2x8x8xf32> -> vector<2x8x8xf32>
    "tpu.trace_stop"() : () -> ()
    %cst_88 = arith.constant dense<0xFF800000> : vector<2x8xf32>
    %279 = vector.multi_reduction <maximumf>, %278, %cst_88 [2] : vector<2x8x8xf32> to vector<2x8xf32>
    %280 = vector.shape_cast %279 : vector<2x8xf32> to vector<2x8x1xf32>
    %281 = vector.broadcast %280 : vector<2x8x1xf32> to vector<2x8x8xf32>
    %282 = arith.subf %278, %281 : vector<2x8x8xf32>
    %283 = math.exp %282 : vector<2x8x8xf32>
    %cst_89 = arith.constant dense<0.000000e+00> : vector<2x8xf32>
    %284 = vector.multi_reduction <add>, %283, %cst_89 [2] : vector<2x8x8xf32> to vector<2x8xf32>
    %285 = vector.shape_cast %284 : vector<2x8xf32> to vector<2x8x1xf32>
    %286 = tpu.reciprocal %285 {approx = true} : vector<2x8x1xf32> -> vector<2x8x1xf32>
    %287 = vector.broadcast %286 : vector<2x8x1xf32> to vector<2x8x8xf32>
    %288 = arith.mulf %283, %287 : vector<2x8x8xf32>
    %289 = arith.truncf %288 : vector<2x8x8xf32> to vector<2x8x8xbf16>
    "tpu.trace_start"() <{level = 10 : i32, message = "bqk,bke->bqe"}> : () -> ()
    %cst_90 = arith.constant dense<0.000000e+00> : vector<2x8x16xf32>
    %290 = tpu.matmul %289, %277, %cst_90 {dimension_numbers = #tpu.dot_dimension_numbers<[2], [1], [1], [2], [0, 0, 0, 1, 1, 2], [0], [0]>} : vector<2x8x8xbf16>, vector<2x8x16xbf16>, vector<2x8x16xf32> -> vector<2x8x16xf32>
    "tpu.trace_stop"() : () -> ()
    %291 = vector.shape_cast %290 : vector<2x8x16xf32> to vector<16x16xf32>
    %292 = tpu.concatenate %222, %245, %268, %291 in 1 : vector<16x16xf32>, vector<16x16xf32>, vector<16x16xf32>, vector<16x16xf32> -> vector<16x64xf32>
    %293 = arith.truncf %292 : vector<16x64xf32> to vector<16x64xbf16>
    %c1_91 = arith.constant 1 : index
    %c0_92 = arith.constant 0 : index
    %c0_93 = arith.constant 0 : index
    %294 = vector.load %arg5[%c1_91, %c0_92, %c0_93] : memref<2x64x64xbf16, #tpu.memory_space<vmem>>, vector<1x64x64xbf16>
    %295 = vector.shape_cast %294 : vector<1x64x64xbf16> to vector<64x64xbf16>
    %cst_94 = arith.constant dense<0.000000e+00> : vector<16x64xf32>
    %296 = tpu.matmul %293, %295, %cst_94 {dimension_numbers = #tpu.dot_dimension_numbers<[1], [0], [0], [1], [0, 0, 1, 1], [], []>} : vector<16x64xbf16>, vector<64x64xbf16>, vector<16x64xf32> -> vector<16x64xf32>
    %c1_95 = arith.constant 1 : index
    %c0_96 = arith.constant 0 : index
    %c0_97 = arith.constant 0 : index
    %297 = vector.load %arg6[%c1_95, %c0_96, %c0_97] : memref<2x1x64xf32, #tpu.memory_space<vmem>>, vector<1x1x64xf32>
    %298 = vector.shape_cast %297 : vector<1x1x64xf32> to vector<1x64xf32>
    %299 = vector.broadcast %298 : vector<1x64xf32> to vector<16x64xf32>
    %300 = arith.addf %296, %299 : vector<16x64xf32>
    %301 = arith.addf %186, %300 : vector<16x64xf32>
    %c1_98 = arith.constant 1 : index
    %c0_99 = arith.constant 0 : index
    %c0_100 = arith.constant 0 : index
    %302 = vector.load %arg7[%c1_98, %c0_99, %c0_100] : memref<2x1x64xf32, #tpu.memory_space<vmem>>, vector<1x1x64xf32>
    %303 = vector.shape_cast %302 : vector<1x1x64xf32> to vector<1x64xf32>
    %c1_101 = arith.constant 1 : index
    %c0_102 = arith.constant 0 : index
    %c0_103 = arith.constant 0 : index
    %304 = vector.load %arg8[%c1_101, %c0_102, %c0_103] : memref<2x1x64xf32, #tpu.memory_space<vmem>>, vector<1x1x64xf32>
    %305 = vector.shape_cast %304 : vector<1x1x64xf32> to vector<1x64xf32>
    %cst_104 = arith.constant dense<0.000000e+00> : vector<16xf32>
    %306 = vector.multi_reduction <add>, %301, %cst_104 [1] : vector<16x64xf32> to vector<16xf32>
    %307 = vector.shape_cast %306 : vector<16xf32> to vector<16x1xf32>
    %cst_105 = arith.constant 6.400000e+01 : f32
    %308 = vector.broadcast %cst_105 : f32 to vector<16x1xf32>
    %309 = arith.divf %307, %308 : vector<16x1xf32>
    %310 = vector.broadcast %309 : vector<16x1xf32> to vector<16x64xf32>
    %311 = arith.subf %301, %310 : vector<16x64xf32>
    %312 = arith.mulf %311, %311 : vector<16x64xf32>
    %cst_106 = arith.constant dense<0.000000e+00> : vector<16xf32>
    %313 = vector.multi_reduction <add>, %312, %cst_106 [1] : vector<16x64xf32> to vector<16xf32>
    %314 = vector.shape_cast %313 : vector<16xf32> to vector<16x1xf32>
    %cst_107 = arith.constant 6.400000e+01 : f32
    %315 = vector.broadcast %cst_107 : f32 to vector<16x1xf32>
    %316 = arith.divf %314, %315 : vector<16x1xf32>
    %317 = vector.broadcast %309 : vector<16x1xf32> to vector<16x64xf32>
    %318 = arith.subf %301, %317 : vector<16x64xf32>
    %cst_108 = arith.constant 9.99999974E-6 : f32
    %319 = vector.broadcast %cst_108 : f32 to vector<16x1xf32>
    %320 = arith.addf %316, %319 : vector<16x1xf32>
    %321 = math.rsqrt %320 : vector<16x1xf32>
    %322 = vector.broadcast %321 : vector<16x1xf32> to vector<16x64xf32>
    %323 = arith.mulf %318, %322 : vector<16x64xf32>
    %324 = vector.broadcast %303 : vector<1x64xf32> to vector<16x64xf32>
    %325 = arith.mulf %323, %324 : vector<16x64xf32>
    %326 = vector.broadcast %305 : vector<1x64xf32> to vector<16x64xf32>
    %327 = arith.addf %325, %326 : vector<16x64xf32>
    %328 = arith.truncf %327 : vector<16x64xf32> to vector<16x64xbf16>
    %c1_109 = arith.constant 1 : index
    %c0_110 = arith.constant 0 : index
    %c0_111 = arith.constant 0 : index
    %329 = vector.load %arg9[%c1_109, %c0_110, %c0_111] : memref<2x64x2048xbf16, #tpu.memory_space<vmem>>, vector<1x64x2048xbf16>
    %330 = vector.shape_cast %329 : vector<1x64x2048xbf16> to vector<64x2048xbf16>
    %cst_112 = arith.constant dense<0.000000e+00> : vector<16x2048xf32>
    %331 = tpu.matmul %328, %330, %cst_112 {dimension_numbers = #tpu.dot_dimension_numbers<[1], [0], [0], [1], [0, 0, 1, 1], [], []>} : vector<16x64xbf16>, vector<64x2048xbf16>, vector<16x2048xf32> -> vector<16x2048xf32>
    %c1_113 = arith.constant 1 : index
    %c0_114 = arith.constant 0 : index
    %c0_115 = arith.constant 0 : index
    %332 = vector.load %arg10[%c1_113, %c0_114, %c0_115] : memref<2x1x2048xf32, #tpu.memory_space<vmem>>, vector<1x1x2048xf32>
    %333 = vector.shape_cast %332 : vector<1x1x2048xf32> to vector<1x2048xf32>
    %334 = vector.broadcast %333 : vector<1x2048xf32> to vector<16x2048xf32>
    %335 = arith.addf %331, %334 : vector<16x2048xf32>
    %cst_116 = arith.constant 0.000000e+00 : f32
    %336 = vector.broadcast %cst_116 : f32 to vector<16x2048xf32>
    %337 = arith.maximumf %335, %336 : vector<16x2048xf32>
    %338 = arith.truncf %337 : vector<16x2048xf32> to vector<16x2048xbf16>
    %c1_117 = arith.constant 1 : index
    %c0_118 = arith.constant 0 : index
    %c0_119 = arith.constant 0 : index
    %339 = vector.load %arg11[%c1_117, %c0_118, %c0_119] : memref<2x2048x64xbf16, #tpu.memory_space<vmem>>, vector<1x2048x64xbf16>
    %340 = vector.shape_cast %339 : vector<1x2048x64xbf16> to vector<2048x64xbf16>
    %cst_120 = arith.constant dense<0.000000e+00> : vector<16x64xf32>
    %341 = tpu.matmul %338, %340, %cst_120 {dimension_numbers = #tpu.dot_dimension_numbers<[1], [0], [0], [1], [0, 0, 1, 1], [], []>} : vector<16x2048xbf16>, vector<2048x64xbf16>, vector<16x64xf32> -> vector<16x64xf32>
    %c1_121 = arith.constant 1 : index
    %c0_122 = arith.constant 0 : index
    %c0_123 = arith.constant 0 : index
    %342 = vector.load %arg12[%c1_121, %c0_122, %c0_123] : memref<2x1x64xf32, #tpu.memory_space<vmem>>, vector<1x1x64xf32>
    %343 = vector.shape_cast %342 : vector<1x1x64xf32> to vector<1x64xf32>
    %344 = vector.broadcast %343 : vector<1x64xf32> to vector<16x64xf32>
    %345 = arith.addf %341, %344 : vector<16x64xf32>
    %346 = arith.addf %327, %345 : vector<16x64xf32>
    %c1_124 = arith.constant 1 : index
    %c0_125 = arith.constant 0 : index
    %c0_126 = arith.constant 0 : index
    %347 = vector.load %arg13[%c1_124, %c0_125, %c0_126] : memref<2x1x64xf32, #tpu.memory_space<vmem>>, vector<1x1x64xf32>
    %348 = vector.shape_cast %347 : vector<1x1x64xf32> to vector<1x64xf32>
    %c1_127 = arith.constant 1 : index
    %c0_128 = arith.constant 0 : index
    %c0_129 = arith.constant 0 : index
    %349 = vector.load %arg14[%c1_127, %c0_128, %c0_129] : memref<2x1x64xf32, #tpu.memory_space<vmem>>, vector<1x1x64xf32>
    %350 = vector.shape_cast %349 : vector<1x1x64xf32> to vector<1x64xf32>
    %cst_130 = arith.constant dense<0.000000e+00> : vector<16xf32>
    %351 = vector.multi_reduction <add>, %346, %cst_130 [1] : vector<16x64xf32> to vector<16xf32>
    %352 = vector.shape_cast %351 : vector<16xf32> to vector<16x1xf32>
    %cst_131 = arith.constant 6.400000e+01 : f32
    %353 = vector.broadcast %cst_131 : f32 to vector<16x1xf32>
    %354 = arith.divf %352, %353 : vector<16x1xf32>
    %355 = vector.broadcast %354 : vector<16x1xf32> to vector<16x64xf32>
    %356 = arith.subf %346, %355 : vector<16x64xf32>
    %357 = arith.mulf %356, %356 : vector<16x64xf32>
    %cst_132 = arith.constant dense<0.000000e+00> : vector<16xf32>
    %358 = vector.multi_reduction <add>, %357, %cst_132 [1] : vector<16x64xf32> to vector<16xf32>
    %359 = vector.shape_cast %358 : vector<16xf32> to vector<16x1xf32>
    %cst_133 = arith.constant 6.400000e+01 : f32
    %360 = vector.broadcast %cst_133 : f32 to vector<16x1xf32>
    %361 = arith.divf %359, %360 : vector<16x1xf32>
    %362 = vector.broadcast %354 : vector<16x1xf32> to vector<16x64xf32>
    %363 = arith.subf %346, %362 : vector<16x64xf32>
    %cst_134 = arith.constant 9.99999974E-6 : f32
    %364 = vector.broadcast %cst_134 : f32 to vector<16x1xf32>
    %365 = arith.addf %361, %364 : vector<16x1xf32>
    %366 = math.rsqrt %365 : vector<16x1xf32>
    %367 = vector.broadcast %366 : vector<16x1xf32> to vector<16x64xf32>
    %368 = arith.mulf %363, %367 : vector<16x64xf32>
    %369 = vector.broadcast %348 : vector<1x64xf32> to vector<16x64xf32>
    %370 = arith.mulf %368, %369 : vector<16x64xf32>
    %371 = vector.broadcast %350 : vector<1x64xf32> to vector<16x64xf32>
    %372 = arith.addf %370, %371 : vector<16x64xf32>
    %373 = vector.shape_cast %372 : vector<16x64xf32> to vector<2x8x64xf32>
    %374 = vector.extract_strided_slice %373 {offsets = [0, 7, 0], sizes = [2, 1, 64], strides = [1, 1, 1]} : vector<2x8x64xf32> to vector<2x1x64xf32>
    %375 = vector.shape_cast %374 : vector<2x1x64xf32> to vector<2x64xf32>
    %c0_135 = arith.constant 0 : index
    %c0_136 = arith.constant 0 : index
    %376 = vector.load %arg1[%c0_135, %c0_136] : memref<2x64xf32, #tpu.memory_space<vmem>>, vector<2x64xf32>
    %377 = arith.truncf %376 : vector<2x64xf32> to vector<2x64xbf16>
    %c0_137 = arith.constant 0 : index
    %c0_138 = arith.constant 0 : index
    %378 = vector.load %arg15[%c0_137, %c0_138] : memref<64x128xbf16, #tpu.memory_space<vmem>>, vector<64x128xbf16>
    %cst_139 = arith.constant dense<0.000000e+00> : vector<2x128xf32>
    %379 = tpu.matmul %377, %378, %cst_139 {dimension_numbers = #tpu.dot_dimension_numbers<[1], [0], [0], [1], [0, 0, 1, 1], [], []>} : vector<2x64xbf16>, vector<64x128xbf16>, vector<2x128xf32> -> vector<2x128xf32>
    %380 = arith.truncf %375 : vector<2x64xf32> to vector<2x64xbf16>
    %c0_140 = arith.constant 0 : index
    %c0_141 = arith.constant 0 : index
    %381 = vector.load %arg16[%c0_140, %c0_141] : memref<64x128xbf16, #tpu.memory_space<vmem>>, vector<64x128xbf16>
    %cst_142 = arith.constant dense<0.000000e+00> : vector<2x128xf32>
    %382 = tpu.matmul %380, %381, %cst_142 {dimension_numbers = #tpu.dot_dimension_numbers<[1], [0], [0], [1], [0, 0, 1, 1], [], []>} : vector<2x64xbf16>, vector<64x128xbf16>, vector<2x128xf32> -> vector<2x128xf32>
    %383 = arith.addf %379, %382 : vector<2x128xf32>
    %c0_143 = arith.constant 0 : index
    %c0_144 = arith.constant 0 : index
    %384 = vector.load %arg2[%c0_143, %c0_144] : memref<2x64xf32, #tpu.memory_space<vmem>>, vector<2x64xf32>
    %385 = arith.truncf %384 : vector<2x64xf32> to vector<2x64xbf16>
    %c0_145 = arith.constant 0 : index
    %c0_146 = arith.constant 0 : index
    %386 = vector.load %arg17[%c0_145, %c0_146] : memref<64x128xbf16, #tpu.memory_space<vmem>>, vector<64x128xbf16>
    %cst_147 = arith.constant dense<0.000000e+00> : vector<2x128xf32>
    %387 = tpu.matmul %385, %386, %cst_147 {dimension_numbers = #tpu.dot_dimension_numbers<[1], [0], [0], [1], [0, 0, 1, 1], [], []>} : vector<2x64xbf16>, vector<64x128xbf16>, vector<2x128xf32> -> vector<2x128xf32>
    %388 = arith.addf %383, %387 : vector<2x128xf32>
    %c0_148 = arith.constant 0 : index
    %c0_149 = arith.constant 0 : index
    %389 = vector.load %arg18[%c0_148, %c0_149] : memref<1x128xf32, #tpu.memory_space<vmem>>, vector<1x128xf32>
    %390 = vector.broadcast %389 : vector<1x128xf32> to vector<2x128xf32>
    %391 = arith.addf %388, %390 : vector<2x128xf32>
    %cst_150 = arith.constant 0.000000e+00 : f32
    %392 = vector.broadcast %cst_150 : f32 to vector<2x128xf32>
    %393 = arith.maximumf %391, %392 : vector<2x128xf32>
    %394 = arith.truncf %393 : vector<2x128xf32> to vector<2x128xbf16>
    %c0_151 = arith.constant 0 : index
    %c0_152 = arith.constant 0 : index
    %395 = vector.load %arg19[%c0_151, %c0_152] : memref<128x1xbf16, #tpu.memory_space<vmem>>, vector<128x1xbf16>
    %cst_153 = arith.constant dense<0.000000e+00> : vector<2x1xf32>
    %396 = tpu.matmul %394, %395, %cst_153 {dimension_numbers = #tpu.dot_dimension_numbers<[1], [0], [0], [1], [0, 0, 1, 1], [], []>} : vector<2x128xbf16>, vector<128x1xbf16>, vector<2x1xf32> -> vector<2x1xf32>
    %c0_154 = arith.constant 0 : index
    %c0_155 = arith.constant 0 : index
    %397 = vector.load %arg20[%c0_154, %c0_155] : memref<1x1xf32, #tpu.memory_space<vmem>>, vector<1x1xf32>
    %398 = vector.broadcast %397 : vector<1x1xf32> to vector<2x1xf32>
    %399 = arith.addf %396, %398 : vector<2x1xf32>
    %400 = vector.shape_cast %399 : vector<2x1xf32> to vector<2x1xf32>
    %401 = vector.broadcast %400 : vector<2x1xf32> to vector<2x128xf32>
    %c0_156 = arith.constant 0 : index
    %c0_157 = arith.constant 0 : index
    %402 = vector.load %arg21[%c0_156, %c0_157] : memref<2x128xf32, #tpu.memory_space<vmem>>, vector<2x128xf32>
    tpu.vector_store %arg21[%c0_156, %c0_157], %401 {strides = array<i32>} : memref<2x128xf32, #tpu.memory_space<vmem>>, vector<2x128xf32>,
    return
  }
}

</mosaic_0001>

<bundles_post_ra>
// kernel: mtrec_forward.1
= control target key start
LH: loop header
LB: loop body
LE: loop exit
PB: predicated region body
PF: predicated region fallthrough
CT: control target
= control target key end

     0   :  { %v9301_v1 = vmov 0   ;;  %vm134_vm0 = vcmask 523264   ;;  %v9302_v12 = vmov 0.0   ;;  %v84_v13 = vlaneseq  ;;  %s11460_s22 = smov 64   ;;  %s11458_s23 = smov 48   ;;  %s11420_s3 = inlined_call_operand.vmem [shape: bf16[2,64,192], index: 3, kind: input, shape index: {}]   ;;  %s11421_s0 = inlined_call_operand.vmem [shape: f32[16,64], index: 0, kind: input, shape index: {}]   ;;  %s11422_s4 = inlined_call_operand.vmem [shape: f32[2,1,192], index: 4, kind: input, shape index: {}]   ;;  %s11423_s5 = inlined_call_operand.vmem [shape: bf16[2,64,64], index: 5, kind: input, shape index: {}]   ;;  %s11424_s6 = inlined_call_operand.vmem [shape: f32[2,1,64], index: 6, kind: input, shape index: {}]   ;;  %s11425_s9 = inlined_call_operand.vmem [shape: bf16[2,64,2048], index: 9, kind: input, shape index: {}]   ;;  %s11426_s11 = inlined_call_operand.vmem [shape: bf16[2,2048,64], index: 11, kind: input, shape index: {}]   ;;  %s11427_s7 = inlined_call_operand.vmem [shape: f32[2,1,64], index: 7, kind: input, shape index: {}]   ;;  %s11428_s8 = inlined_call_operand.vmem [shape: f32[2,1,64], index: 8, kind: input, shape index: {}]   ;;  %s11429_s10 = inlined_call_operand.vmem [shape: f32[2,1,2048], index: 10, kind: input, shape index: {}]   ;;  %s11430_s12 = inlined_call_operand.vmem [shape: f32[2,1,64], index: 12, kind: input, shape index: {}]   ;;  %s11431_s13 = inlined_call_operand.vmem [shape: f32[2,1,64], index: 13, kind: input, shape index: {}]   ;;  %s11432_s14 = inlined_call_operand.vmem [shape: f32[2,1,64], index: 14, kind: input, shape index: {}]   ;;  %s11433_s16 = inlined_call_operand.vmem [shape: bf16[64,128], index: 16, kind: input, shape index: {}]   ;;  %s11434_s15 = inlined_call_operand.vmem [shape: bf16[64,128], index: 15, kind: input, shape index: {}]   ;;  %s11435_s1 = inlined_call_operand.vmem [shape: f32[2,64], index: 1, kind: input, shape index: {}]   ;;  %s11436_s17 = inlined_call_operand.vmem [shape: bf16[64,128], index: 17, kind: input, shape index: {}]   ;;  %s11437_s19 = inlined_call_operand.vmem [shape: bf16[128,1], index: 19, kind: input, shape index: {}]   ;;  %s11438_s2 = inlined_call_operand.vmem [shape: f32[2,64], index: 2, kind: input, shape index: {}]   ;;  %s11439_s20 = inlined_call_operand.<no memory space> [shape: f32[1,1], index: 20, kind: input, shape index: {}]   ;;  %s11440_s18 = inlined_call_operand.vmem [shape: f32[1,128], index: 18, kind: input, shape index: {}]   ;;  %s11441_s21 = inlined_call_operand.vmem [shape: f32[2,128], index: 21, kind: output, shape index: {}]  }
   0x1   :  { %11462 = sst [smem:[#allocation3_spill]] %s11420_s3  ;;  %170 = vmatprep.mubr.bf16.mxu1 %v9301_v1  ;;  %8912 = vset.pattern.permute.xlu0 %v9301_v1  ;;  %vm9303_vm1 = vmmov 0   ;;  %vm316_vm2 = vcmask 1043456   ;;  %vm192_vm3 = vcmask 130048   ;;  %vm288_vm4 = vcmask 64512   ;;  %s11454_s24 = smov 32  }
   0x2   :  { %11463 = sst [smem:[#allocation4_spill]] %s11421_s0  ;;  %s11468_s26 = sld [smem:[#allocation3_spill]]  ;;  %8612 = vmatprep.subr.bf16.mxu0 %v9302_v12  ;;  %v9462_v14 = vshrl.u32 %v84_v13, 7  ;;  %8614 = vmatprep.mubr.msk.bf16.mxu0 %vm9303_vm1, %v9302_v12  ;;  %vm1096_vm5 = vcmask 261120   ;;  %vm1099_vm6 = vcmask 392192   ;;  %vm6962_vm7 = vcmask 1041409  }
   0x3   :  { %11464 = sst [smem:[#allocation5_spill]] %s11422_s4  ;;  %s11469_s28 = sld [smem:[#allocation4_spill]] }
   0x4   :  { %11465 = sst [smem:[#allocation6_spill]] %s11423_s5  ;;  %v9465_v15 = vsub.s32 0, %v9462_v14  ;;  %v9471_v17 = vsub.s32 1, %v9462_v14  ;;  %s11456_s0 = smov 112  }
   0x5   :  { %11466 = sst [smem:[#allocation7_spill]] %s11424_s6  ;;  %s11452_s4 = smov 96  }
   0x6   :  { %11467 = sst [smem:[#allocation8_spill]] %s11425_s9  ;;  %s11470_s9 = sld [smem:[#allocation5_spill]] }
   0x7   :  { %s11450_s25 = smov 16   ;;  %s11448_s27 = smov 80  }
   0x8   :  { %v8913_v0 = vld [vmem:[%s11468_s26 + $0x4] ss:$8 sps:$4 sm:$0xff]   ;;  %v8915_v2 = vld [vmem:[%s11468_s26] ss:$8 sps:$4 sm:$0xff]   ;;  %v8916_v3 = vld [vmem:[%s11468_s26 + $0x14] ss:$8 sps:$4 sm:$0xff]  }
   0x9   :  { %138 = vmatprep.subr.bf16.mxu1 %v8913_v0  ;;  %v8918_v4 = vld [vmem:[%s11468_s26 + $0x10] ss:$8 sps:$4 sm:$0xff]   ;;  %v8919_v5 = vld [vmem:[%s11468_s26 + $0x24] ss:$8 sps:$4 sm:$0xff]   ;;  %v8921_v6 = vld [vmem:[%s11468_s26 + $0x20] ss:$8 sps:$4 sm:$0xff]  }
   0xa   :  { %139 = vmatpush1.bf16.msra.mxu1 %v8915_v2  ;;  %v8922_v7 = vld [vmem:[%s11468_s26 + $0x34] ss:$8 sps:$4 sm:$0xff]   ;;  %v8924_v8 = vld [vmem:[%s11468_s26 + $0x30] ss:$8 sps:$4 sm:$0xff]   ;;  %v9450_v9 = vld [vmem:[%s11469_s28] sm:$0xff]  ;;  %s11471_s29 = sld [smem:[#allocation6_spill]] }
   0xb   :  { %140 = vmatprep.subr.bf16.mxu1 %v8916_v3  ;;  %v9455_v10 = vld [vmem:[%s11469_s28 + $0x8] sm:$0xff]  ;;  %s11472_s28 = sld [smem:[#allocation7_spill]]  ;;  %s11473_s30 = sld [smem:[#allocation8_spill]] }
   0xc   :  { %v73_v11 = vpack.c.bf16 %v9455_v10, %v9450_v9  ;;  %v82_v16 = vld [vmem:[%s11470_s9] sm:$0x3]  ;;  %s11478_s3 = smov 96  }
   0xd   :  { %v87_v18 = vrot.slane %v82_v16, %v9465_v15  ;;  %v91_v19 = vrot.slane %v82_v16, %v9471_v17 }
   0xe   :  { %141 = vmatpush1.bf16.msra.mxu1 %v8918_v4 }
   0xf   :  { %142 = vmatprep.subr.bf16.mxu1 %v8919_v5 }
  0x12   :  { %143 = vmatpush1.bf16.msra.mxu1 %v8921_v6 }
  0x13   :  { %144 = vmatprep.subr.bf16.mxu1 %v8922_v7 }
  0x16   :  { %145 = vmatpush1.bf16.msra.mxu1 %v8924_v8 }
  0x17   :  { %8600 = vmatprep.subr.bf16.mxu1 %v9302_v12 }
  0x19   :  { %7316 = vmatmul.mubr.msk.bf16.vlgmr.msra.gmra.mrb[0].mxu1 %vm134_vm0, %v73_v11 }
  0x1a   :  { %8602 = vmatprep.mubr.msk.bf16.mxu1 %vm9303_vm1, %v9302_v12 }
  0xec   :  { %v172_v20 = vpop.f32.mrb[0].mxu1 }
  0xed   :  { %v173_v21 = vadd.f32 %v172_v20, %v87_v18  ;;  %v174_v22 = vpop.f32.mrb[1].mxu1 }
  0xee   :  { %v175_v23 = vadd.f32 %v174_v22, %v91_v19  ;;  %v176_v24 = vpop.f32.mrb[2].mxu1 }
  0xef   :  { %v9479_v25 = vpack.c.bf16 %v173_v21, %v173_v21  ;;  %v177_v26 = vadd.f32 %v176_v24, %v87_v18  ;;  %v178_v27 = vpop.f32.mrb[3].mxu1  ;;  %v181_v34 = vmul.f32 0.25, %v173_v21 }
  0xf0   :  { %v9481_v28 = vpack.c.bf16 %v175_v23, %v175_v23  ;;  %v179_v29 = vadd.f32 %v178_v27, %v91_v19 }
  0xf1   :  { %190 = vrot.lane.b32.xlu0 %v9479_v25, %s11460_s22  ;;  %v9487_v31 = vpack.c.bf16 %v177_v26, %v177_v26  ;;  %v9494_v36 = vpack.c.bf16 %v181_v34, %v181_v34  ;;  %v182_v38 = vmul.f32 0.25, %v177_v26 }
  0xf2   :  { %v318_v30 = vsel %vm316_vm2, %v9481_v28, 0  ;;  %v9502_v39 = vpack.c.bf16 %v179_v29, %v179_v29 }
  0xf3   :  { %8613 = vmatpush3.bf16.msra.mxu0 %v318_v30  ;;  %v9504_v40 = vpack.c.bf16 %v182_v38, %v182_v38 }
  0xf4   :  { %8624 = vmatprep.subr.bf16.mxu0 %v9302_v12  ;;  %v364_v41 = vsel %vm316_vm2, %v9502_v39, 0 }
  0xf5   :  { %240 = vrot.lane.b32.xlu0 %v9487_v31, %s11460_s22  ;;  %s11479_s22 = smov 16  }
 0x163   :  { %v191_v32 = vpop.permute.xlu0 %190 }
 0x164   :  { %v197_v33 = vsel %vm192_vm3, %v191_v32, 0 }
 0x165   :  { %8601 = vmatpush3.bf16.xpose.msra.mxu1 %v197_v33 }
 0x166   :  { %8606 = vmatprep.subr.bf16.mxu1 %v9302_v12 }
 0x167   :  { %v241_v35 = vpop.permute.xlu0 %240 }
 0x168   :  { %v246_v37 = vsel %vm192_vm3, %v241_v35, 0 }
 0x16c   :  { %8603 = vmatmul.mubr.msk.bf16.vlgmr.msra.gmra.mrb[4].mxu1 %vm192_vm3, %v9494_v36 }
 0x16d   :  { %8607 = vmatpush3.bf16.xpose.msra.mxu1 %v246_v37  ;;  %8608 = vmatprep.mubr.msk.bf16.mxu1 %vm9303_vm1, %v9302_v12 }
 0x16e   :  { %8618 = vmatprep.subr.bf16.mxu1 %v9302_v12 }
 0x174   :  { %8609 = vmatmul.mubr.msk.bf16.vlgmr.msra.gmra.mrb[8].mxu1 %vm192_vm3, %v9504_v40 }
 0x175   :  { %8619 = vmatpush3.bf16.msra.mxu1 %v364_v41  ;;  %8620 = vmatprep.mubr.msk.bf16.mxu1 %vm9303_vm1, %v9302_v12 }
 0x176   :  { %8630 = vmatprep.subr.bf16.mxu1 %v9302_v12 }
 0x23f   :  { %v233_v42 = vpop.f32.mrb[4].mxu1 }
 0x240   :  { %v8604_v43 = vpop.f32.mrb[5].mxu1  ;;  %v289_v44 = vsel %vm288_vm4, %v233_v42, -inf }
 0x241   :  { %290 = vmax.xlane.f32.xlu1 %v289_v44  ;;  %v236_v45 = vpop.f32.mrb[6].mxu1 }
 0x242   :  { %v8605_v46 = vpop.f32.mrb[7].mxu1 }
 0x247   :  { %v282_v47 = vpop.f32.mrb[8].mxu1 }
 0x248   :  { %v8610_v48 = vpop.f32.mrb[9].mxu1  ;;  %v292_v49 = vsel %vm288_vm4, %v282_v47, -inf }
 0x249   :  { %293 = vmax.xlane.f32.xlu1 %v292_v49  ;;  %v285_v50 = vpop.f32.mrb[10].mxu1 }
 0x24a   :  { %v8611_v51 = vpop.f32.mrb[11].mxu1 }
 0x25a   :  { %409 = vrot.lane.b32.xlu1 %v9479_v25, %s11458_s23 }
 0x25e   :  { %460 = vrot.lane.b32.xlu1 %v9487_v31, %s11458_s23 }
 0x2ce   :  { %v291_v52 = vpop.xlane.xlu1 %290 }
 0x2cf   :  { %v295_v53 = vsub.f32 %v233_v42, %v291_v52 }
 0x2d1   :  { %v297_v54 = vmul.f32 1.442695, %v295_v53 }
 0x2d3   :  { %9221 = vpow2.f32 %v297_v54 }
 0x2d6   :  { %v294_v55 = vpop.xlane.xlu1 %293 }
 0x2d7   :  { %v296_v56 = vsub.f32 %v282_v47, %v294_v55 }
 0x2d9   :  { %v299_v57 = vmul.f32 1.442695, %v296_v56 }
 0x2da   :  { %v410_v62 = vpop.permute.xlu1 %409 }
 0x2db   :  { %9223 = vpow2.f32 %v299_v57  ;;  %v415_v6 = vsel %vm192_vm3, %v410_v62, 0 }
 0x2dd   :  { %v9222_v58 = vpop.eup %9221 }
 0x2de   :  { %v301_v59 = vsel %vm288_vm4, %v9222_v58, 0.0  ;;  %v461_v0 = vpop.permute.xlu1 %460 }
 0x2df   :  { %302 = vadd.xlane.f32.xlu0 %v301_v59  ;;  %v466_v16 = vsel %vm192_vm3, %v461_v0, 0 }
 0x2e5   :  { %v9224_v60 = vpop.eup %9223 }
 0x2e6   :  { %v304_v61 = vsel %vm288_vm4, %v9224_v60, 0.0 }
 0x2e7   :  { %305 = vadd.xlane.f32.xlu1 %v304_v61 }
 0x2f8   :  { %407 = vrot.lane.b32.xlu1 %v9494_v36, %s11456_s0 }
 0x2fc   :  { %458 = vrot.lane.b32.xlu1 %v9504_v40, %s11456_s0 }
 0x36c   :  { %v303_v63 = vpop.xlane.xlu0 %302 }
 0x36d   :  { %9225 = vrcp.f32 %v303_v63 }
 0x374   :  { %v306_v2 = vpop.xlane.xlu1 %305 }
 0x375   :  { %9227 = vrcp.f32 %v306_v2 }
 0x377   :  { %v9226_v3 = vpop.eup %9225 }
 0x378   :  { %v309_v4 = vmul.f32 %v9226_v3, %v9222_v58  ;;  %v408_v13 = vpop.permute.xlu1 %407 }
 0x37a   :  { %v311_v5 = vpack.c.bf16 %v309_v4, %v309_v4 }
 0x37c   :  { %8615 = vmatmul.mubr.msk.bf16.vlgmr.msra.gmra.mrb[0].mxu0 %vm288_vm4, %v311_v5  ;;  %v459_v18 = vpop.permute.xlu1 %458 }
 0x37d   :  { %8625 = vmatpush3.bf16.xpose.msra.mxu0 %v415_v6  ;;  %8626 = vmatprep.mubr.msk.bf16.mxu0 %vm9303_vm1, %v9302_v12 }
 0x37e   :  { %8636 = vmatprep.subr.bf16.mxu0 %v9302_v12 }
 0x37f   :  { %v9228_v7 = vpop.eup %9227 }
 0x380   :  { %v310_v8 = vmul.f32 %v9228_v7, %v9224_v60 }
 0x382   :  { %v312_v11 = vpack.c.bf16 %v310_v8, %v310_v8 }
 0x384   :  { %8621 = vmatmul.mubr.msk.bf16.vlgmr.msra.gmra.mrb[12].mxu1 %vm288_vm4, %v312_v11  ;;  %8627 = vmatmul.mubr.msk.bf16.vlgmr.msra.gmra.mrb[4].mxu0 %vm192_vm3, %v408_v13 }
 0x385   :  { %8631 = vmatpush3.bf16.xpose.msra.mxu1 %v466_v16  ;;  %8632 = vmatprep.mubr.msk.bf16.mxu1 %vm9303_vm1, %v9302_v12 }
 0x386   :  { %8642 = vmatprep.subr.bf16.mxu1 %v9302_v12  ;;  %8638 = vmatprep.mubr.msk.bf16.mxu0 %vm9303_vm1, %v9302_v12 }
 0x38c   :  { %8633 = vmatmul.mubr.msk.bf16.vlgmr.msra.gmra.mrb[16].mxu1 %vm192_vm3, %v459_v18 }
 0x38d   :  { %8644 = vmatprep.mubr.msk.bf16.mxu1 %vm9303_vm1, %v9302_v12 }
 0x44f   :  { %v9541_v19 = vpop.f32.mrb[0].mxu0 }
 0x450   :  { %v8616_v20 = vpop.f32.mrb[1].mxu0 }
 0x451   :  { %v357_v21 = vpop.f32.mrb[2].mxu0 }
 0x452   :  { %v8617_v22 = vpop.f32.mrb[3].mxu0 }
 0x457   :  { %v9543_v23 = vpop.f32.mrb[12].mxu1  ;;  %v451_v24 = vpop.f32.mrb[4].mxu0 }
 0x458   :  { %v8622_v26 = vpop.f32.mrb[13].mxu1  ;;  %v8628_v27 = vpop.f32.mrb[5].mxu0  ;;  %v508_v29 = vsel %vm288_vm4, %v451_v24, -inf }
 0x459   :  { %509 = vmax.xlane.f32.xlu0 %v508_v29  ;;  %v403_v30 = vpop.f32.mrb[14].mxu1  ;;  %v454_v32 = vpop.f32.mrb[6].mxu0 }
 0x45a   :  { %v8623_v33 = vpop.f32.mrb[15].mxu1  ;;  %v8629_v34 = vpop.f32.mrb[7].mxu0 }
 0x45f   :  { %v502_v35 = vpop.f32.mrb[16].mxu1 }
 0x460   :  { %v8634_v37 = vpop.f32.mrb[17].mxu1  ;;  %v511_v38 = vsel %vm288_vm4, %v502_v35, -inf }
 0x461   :  { %512 = vmax.xlane.f32.xlu1 %v511_v38  ;;  %v505_v41 = vpop.f32.mrb[18].mxu1 }
 0x462   :  { %v8635_v42 = vpop.f32.mrb[19].mxu1 }
 0x46f   :  { %533 = vrot.lane.b32.xlu0 %v9481_v28, %s11456_s0 }
 0x472   :  { %682 = vrot.lane.b32.xlu1 %v9487_v31, %s11454_s24 }
 0x473   :  { %582 = vrot.lane.b32.xlu0 %v9502_v39, %s11456_s0  ;;  %s11476_s0 = smov 112  }
 0x4e6   :  { %v510_v43 = vpop.xlane.xlu0 %509 }
 0x4e7   :  { %v514_v44 = vsub.f32 %v451_v24, %v510_v43 }
 0x4e9   :  { %v516_v45 = vmul.f32 1.442695, %v514_v44 }
 0x4ea   :  { %v534_v46 = vpop.permute.xlu0 %533 }
 0x4eb   :  { %9229 = vpow2.f32 %v516_v45  ;;  %v539_v47 = vsel %vm316_vm2, %v534_v46, 0 }
 0x4ec   :  { %8637 = vmatpush3.bf16.msra.mxu0 %v539_v47 }
 0x4ed   :  { %8648 = vmatprep.subr.bf16.mxu0 %v9302_v12 }
 0x4ee   :  { %v583_v48 = vpop.permute.xlu0 %582  ;;  %v513_v49 = vpop.xlane.xlu1 %512 }
 0x4ef   :  { %v588_v50 = vsel %vm316_vm2, %v583_v48, 0  ;;  %v515_v51 = vsub.f32 %v502_v35, %v513_v49 }
 0x4f0   :  { %8643 = vmatpush3.bf16.msra.mxu1 %v588_v50 }
 0x4f1   :  { %v518_v52 = vmul.f32 1.442695, %v515_v51  ;;  %8654 = vmatprep.subr.bf16.mxu1 %v9302_v12 }
 0x4f2   :  { %v683_v3 = vpop.permute.xlu1 %682 }
 0x4f3   :  { %9231 = vpow2.f32 %v518_v52  ;;  %v688_v6 = vsel %vm192_vm3, %v683_v3, 0 }
 0x4f5   :  { %v9230_v53 = vpop.eup %9229 }
 0x4f6   :  { %v520_v54 = vsel %vm288_vm4, %v9230_v53, 0.0 }
 0x4f7   :  { %521 = vadd.xlane.f32.xlu0 %v520_v54 }
 0x4fd   :  { %v9232_v55 = vpop.eup %9231 }
 0x4fe   :  { %v523_v56 = vsel %vm288_vm4, %v9232_v55, 0.0 }
 0x4ff   :  { %524 = vadd.xlane.f32.xlu0 %v523_v56 }
 0x515   :  { %632 = vrot.lane.b32.xlu0 %v9479_v25, %s11454_s24 }
 0x519   :  { %630 = vrot.lane.b32.xlu0 %v9494_v36, %s11452_s4 }
 0x51d   :  { %680 = vrot.lane.b32.xlu0 %v9504_v40, %s11452_s4 }
 0x584   :  { %v522_v57 = vpop.xlane.xlu0 %521 }
 0x585   :  { %9233 = vrcp.f32 %v522_v57 }
 0x58c   :  { %v525_v58 = vpop.xlane.xlu0 %524 }
 0x58d   :  { %9235 = vrcp.f32 %v525_v58 }
 0x58f   :  { %v9234_v59 = vpop.eup %9233 }
 0x590   :  { %v528_v60 = vmul.f32 %v9234_v59, %v9230_v53  ;;  %v633_v61 = vpop.permute.xlu0 %632 }
 0x591   :  { %v638_v63 = vsel %vm192_vm3, %v633_v61, 0 }
 0x592   :  { %v530_v62 = vpack.c.bf16 %v528_v60, %v528_v60 }
 0x594   :  { %8639 = vmatmul.mubr.msk.bf16.vlgmr.msra.gmra.mrb[8].mxu0 %vm288_vm4, %v530_v62  ;;  %v631_v5 = vpop.permute.xlu0 %630 }
 0x595   :  { %8649 = vmatpush3.bf16.xpose.msra.mxu0 %v638_v63  ;;  %8650 = vmatprep.mubr.msk.bf16.mxu0 %vm9303_vm1, %v9302_v12 }
 0x596   :  { %8660 = vmatprep.subr.bf16.mxu0 %v9302_v12 }
 0x597   :  { %v9236_v0 = vpop.eup %9235 }
 0x598   :  { %v529_v2 = vmul.f32 %v9236_v0, %v9232_v55  ;;  %v681_v7 = vpop.permute.xlu0 %680 }
 0x59a   :  { %v531_v4 = vpack.c.bf16 %v529_v2, %v529_v2 }
 0x59c   :  { %8645 = vmatmul.mubr.msk.bf16.vlgmr.msra.gmra.mrb[20].mxu1 %vm288_vm4, %v531_v4  ;;  %8651 = vmatmul.mubr.msk.bf16.vlgmr.msra.gmra.mrb[12].mxu0 %vm192_vm3, %v631_v5 }
 0x59d   :  { %8655 = vmatpush3.bf16.xpose.msra.mxu1 %v688_v6  ;;  %8656 = vmatprep.mubr.msk.bf16.mxu1 %vm9303_vm1, %v9302_v12 }
 0x59e   :  { %8666 = vmatprep.subr.bf16.mxu1 %v9302_v12  ;;  %8662 = vmatprep.mubr.msk.bf16.mxu0 %vm9303_vm1, %v9302_v12 }
 0x5a4   :  { %8657 = vmatmul.mubr.msk.bf16.vlgmr.msra.gmra.mrb[24].mxu1 %vm192_vm3, %v681_v7 }
 0x5a5   :  { %8668 = vmatprep.mubr.msk.bf16.mxu1 %vm9303_vm1, %v9302_v12 }
 0x667   :  { %v9581_v8 = vpop.f32.mrb[8].mxu0 }
 0x668   :  { %v8640_v11 = vpop.f32.mrb[9].mxu0 }
 0x669   :  { %v578_v13 = vpop.f32.mrb[10].mxu0 }
 0x66a   :  { %v8641_v16 = vpop.f32.mrb[11].mxu0 }
 0x66f   :  { %v9583_v18 = vpop.f32.mrb[20].mxu1  ;;  %v674_v20 = vpop.f32.mrb[12].mxu0 }
 0x670   :  { %v8882_v21 = vpack.i.bf16 %v9583_v18, %v9581_v8  ;;  %v8646_v22 = vpop.f32.mrb[21].mxu1  ;;  %v8652_v24 = vpop.f32.mrb[13].mxu0  ;;  %v730_v26 = vsel %vm288_vm4, %v674_v20, -inf }
 0x671   :  { %731 = vmax.xlane.f32.xlu0 %v730_v26  ;;  %v627_v27 = vpop.f32.mrb[22].mxu1  ;;  %v677_v29 = vpop.f32.mrb[14].mxu0 }
 0x672   :  { %v8647_v30 = vpop.f32.mrb[23].mxu1  ;;  %v8653_v32 = vpop.f32.mrb[15].mxu0 }
 0x677   :  { %v724_v33 = vpop.f32.mrb[24].mxu1 }
 0x678   :  { %v8658_v34 = vpop.f32.mrb[25].mxu1  ;;  %v733_v35 = vsel %vm288_vm4, %v724_v33, -inf }
 0x679   :  { %734 = vmax.xlane.f32.xlu1 %v733_v35  ;;  %v727_v37 = vpop.f32.mrb[26].mxu1 }
 0x67a   :  { %v8659_v38 = vpop.f32.mrb[27].mxu1 }
 0x687   :  { %754 = vrot.lane.b32.xlu0 %v9481_v28, %s11452_s4 }
 0x68a   :  { %802 = vrot.lane.b32.xlu1 %v9502_v39, %s11452_s4 }
 0x68e   :  { %852 = vrot.lane.b32.xlu1 %v9479_v25, %s11450_s25 }
 0x692   :  { %850 = vrot.lane.b32.xlu1 %v9494_v36, %s11448_s27 }
 0x6fe   :  { %v732_v41 = vpop.xlane.xlu0 %731 }
 0x6ff   :  { %v736_v42 = vsub.f32 %v674_v20, %v732_v41 }
 0x701   :  { %v738_v43 = vmul.f32 1.442695, %v736_v42 }
 0x702   :  { %v755_v44 = vpop.permute.xlu0 %754 }
 0x703   :  { %9237 = vpow2.f32 %v738_v43  ;;  %v760_v45 = vsel %vm316_vm2, %v755_v44, 0 }
 0x704   :  { %8661 = vmatpush3.bf16.msra.mxu0 %v760_v45 }
 0x705   :  { %8672 = vmatprep.subr.bf16.mxu0 %v9302_v12 }
 0x706   :  { %v735_v46 = vpop.xlane.xlu1 %734 }
 0x707   :  { %v737_v47 = vsub.f32 %v724_v33, %v735_v46 }
 0x709   :  { %v740_v48 = vmul.f32 1.442695, %v737_v47 }
 0x70a   :  { %v803_v49 = vpop.permute.xlu1 %802 }
 0x70b   :  { %9239 = vpow2.f32 %v740_v48  ;;  %v808_v25 = vsel %vm316_vm2, %v803_v49, 0 }
 0x70c   :  { %8667 = vmatpush3.bf16.msra.mxu1 %v808_v25 }
 0x70d   :  { %v9238_v50 = vpop.eup %9237  ;;  %8678 = vmatprep.subr.bf16.mxu1 %v9302_v12 }
 0x70e   :  { %v742_v36 = vsel %vm288_vm4, %v9238_v50, 0.0  ;;  %v853_v57 = vpop.permute.xlu1 %852 }
 0x70f   :  { %743 = vadd.xlane.f32.xlu0 %v742_v36  ;;  %v858_v59 = vsel %vm192_vm3, %v853_v57, 0 }
 0x712   :  { %v851_v62 = vpop.permute.xlu1 %850 }
 0x715   :  { %v9240_v51 = vpop.eup %9239 }
 0x716   :  { %v745_v52 = vsel %vm288_vm4, %v9240_v51, 0.0 }
 0x717   :  { %746 = vadd.xlane.f32.xlu0 %v745_v52 }
 0x72d   :  { %902 = vrot.lane.b32.xlu0 %v9487_v31, %s11450_s25 }
 0x731   :  { %900 = vrot.lane.b32.xlu0 %v9504_v40, %s11448_s27 }
 0x79c   :  { %v744_v53 = vpop.xlane.xlu0 %743 }
 0x79d   :  { %9241 = vrcp.f32 %v744_v53  ;;  %v8925_v53 = vld [vmem:[%s11471_s29] sm:$0xff]  }
 0x7a4   :  { %v747_v54 = vpop.xlane.xlu0 %746 }
 0x7a5   :  { %9243 = vrcp.f32 %v747_v54  ;;  %v8926_v54 = vld [vmem:[%s11471_s29 + $0x8] sm:$0xff]  }
 0x7a7   :  { %v9242_v55 = vpop.eup %9241 }
 0x7a8   :  { %v750_v56 = vmul.f32 %v9242_v55, %v9238_v50  ;;  %v903_v60 = vpop.permute.xlu0 %902  ;;  %v8927_v55 = vld [vmem:[%s11471_s29 + $0x10] sm:$0xff]  }
 0x7a9   :  { %v908_v63 = vsel %vm192_vm3, %v903_v60, 0 }
 0x7aa   :  { %v752_v58 = vpack.c.bf16 %v750_v56, %v750_v56  ;;  %v8928_v56 = vld [vmem:[%s11471_s29 + $0x18] sm:$0xff]  }
 0x7ac   :  { %8663 = vmatmul.mubr.msk.bf16.vlgmr.msra.gmra.mrb[16].mxu0 %vm288_vm4, %v752_v58  ;;  %v901_v0 = vpop.permute.xlu0 %900 }
 0x7ad   :  { %8673 = vmatpush3.bf16.xpose.msra.mxu0 %v858_v59  ;;  %8674 = vmatprep.mubr.msk.bf16.mxu0 %vm9303_vm1, %v9302_v12 }
 0x7ae   :  { %8684 = vmatprep.subr.bf16.mxu0 %v9302_v12 }
 0x7af   :  { %v9244_v31 = vpop.eup %9243 }
 0x7b0   :  { %v751_v40 = vmul.f32 %v9244_v31, %v9240_v51 }
 0x7b2   :  { %v753_v61 = vpack.c.bf16 %v751_v40, %v751_v40 }
 0x7b4   :  { %8669 = vmatmul.mubr.msk.bf16.vlgmr.msra.gmra.mrb[28].mxu1 %vm288_vm4, %v753_v61  ;;  %8675 = vmatmul.mubr.msk.bf16.vlgmr.msra.gmra.mrb[20].mxu0 %vm192_vm3, %v851_v62 }
 0x7b5   :  { %8679 = vmatpush3.bf16.xpose.msra.mxu1 %v908_v63  ;;  %8680 = vmatprep.mubr.msk.bf16.mxu1 %vm9303_vm1, %v9302_v12 }
 0x7b6   :  { %8690 = vmatprep.subr.bf16.mxu1 %v9302_v12  ;;  %8686 = vmatprep.mubr.msk.bf16.mxu0 %vm9303_vm1, %v9302_v12 }
 0x7bc   :  { %8681 = vmatmul.mubr.msk.bf16.vlgmr.msra.gmra.mrb[32].mxu1 %vm192_vm3, %v901_v0 }
 0x7bd   :  { %8692 = vmatprep.mubr.msk.bf16.mxu1 %vm9303_vm1, %v9302_v12 }
 0x87f   :  { %v796_v2 = vpop.f32.mrb[16].mxu0 }
 0x880   :  { %v8664_v3 = vpop.f32.mrb[17].mxu0 }
 0x881   :  { %v799_v4 = vpop.f32.mrb[18].mxu0 }
 0x882   :  { %v8665_v5 = vpop.f32.mrb[19].mxu0 }
 0x887   :  { %v844_v6 = vpop.f32.mrb[28].mxu1  ;;  %v894_v7 = vpop.f32.mrb[20].mxu0 }
 0x888   :  { %v8887_v11 = vpack.i.bf16 %v844_v6, %v796_v2  ;;  %v8670_v13 = vpop.f32.mrb[29].mxu1  ;;  %v8676_v16 = vpop.f32.mrb[21].mxu0  ;;  %v950_v20 = vsel %vm288_vm4, %v894_v7, -inf }
 0x889   :  { %951 = vmax.xlane.f32.xlu1 %v950_v20  ;;  %v847_v22 = vpop.f32.mrb[30].mxu1  ;;  %v897_v24 = vpop.f32.mrb[22].mxu0 }
 0x88a   :  { %v8671_v26 = vpop.f32.mrb[31].mxu1  ;;  %v8677_v27 = vpop.f32.mrb[23].mxu0 }
 0x88f   :  { %v944_v29 = vpop.f32.mrb[32].mxu1 }
 0x890   :  { %v8682_v30 = vpop.f32.mrb[33].mxu1  ;;  %v953_v32 = vsel %vm288_vm4, %v944_v29, -inf }
 0x891   :  { %954 = vmax.xlane.f32.xlu0 %v953_v32  ;;  %v947_v33 = vpop.f32.mrb[34].mxu1 }
 0x892   :  { %v8683_v34 = vpop.f32.mrb[35].mxu1 }
 0x916   :  { %v952_v35 = vpop.xlane.xlu1 %951 }
 0x917   :  { %v956_v37 = vsub.f32 %v894_v7, %v952_v35 }
 0x919   :  { %v958_v38 = vmul.f32 1.442695, %v956_v37 }
 0x91b   :  { %9245 = vpow2.f32 %v958_v38 }
 0x91e   :  { %v955_v41 = vpop.xlane.xlu0 %954 }
 0x91f   :  { %v957_v42 = vsub.f32 %v944_v29, %v955_v41 }
 0x921   :  { %v960_v43 = vmul.f32 1.442695, %v957_v42 }
 0x923   :  { %9247 = vpow2.f32 %v960_v43 }
 0x925   :  { %v9246_v44 = vpop.eup %9245 }
 0x926   :  { %v962_v45 = vsel %vm288_vm4, %v9246_v44, 0.0 }
 0x927   :  { %963 = vadd.xlane.f32.xlu0 %v962_v45 }
 0x92d   :  { %v9248_v46 = vpop.eup %9247 }
 0x92e   :  { %v965_v47 = vsel %vm288_vm4, %v9248_v46, 0.0 }
 0x92f   :  { %966 = vadd.xlane.f32.xlu1 %v965_v47 }
 0x93d   :  { %974 = vrot.lane.b32.xlu0 %v9481_v28, %s11448_s27 }
 0x940   :  { %1022 = vrot.lane.b32.xlu1 %v9502_v39, %s11448_s27  ;;  %s11474_s27 = smov 64  }
 0x941   :  { %8888 = vrot.lane.b32.xlu0 %v8887_v11, %s11454_s24  ;;  %s11477_s24 = smov 32  }
 0x944   :  { %8883 = vrot.lane.b32.xlu1 %v8882_v21, %s11450_s25 }
 0x9b4   :  { %v964_v48 = vpop.xlane.xlu0 %963 }
 0x9b5   :  { %9249 = vrcp.f32 %v964_v48 }
 0x9b8   :  { %v975_v49 = vpop.permute.xlu0 %974 }
 0x9b9   :  { %v980_v25 = vsel %vm316_vm2, %v975_v49, 0 }
 0x9ba   :  { %8685 = vmatpush3.bf16.msra.mxu0 %v980_v25 }
 0x9bb   :  { %8696 = vmatprep.subr.bf16.mxu0 %v9302_v12 }
 0x9bc   :  { %v967_v50 = vpop.xlane.xlu1 %966  ;;  %v8889_v4 = vpop.permute.xlu0 %8888 }
 0x9bd   :  { %9251 = vrcp.f32 %v967_v50  ;;  %v8891_v7 = vunpack.i.h.bf16 %v8889_v4  ;;  %v8890_v11 = vunpack.i.l.bf16 %v8889_v4  ;;  %v1234_v50 = vld [vmem:[%s11473_s30] sm:$0xff] }
 0x9be   :  { %v1290_v4 = vld [vmem:[%s11473_s30 + $0x1c0] sm:$0xff] }
 0x9bf   :  { %v9250_v28 = vpop.eup %9249 }
 0x9c0   :  { %v970_v36 = vmul.f32 %v9250_v28, %v9246_v44  ;;  %v1023_v39 = vpop.permute.xlu1 %1022  ;;  %v1242_v28 = vld [vmem:[%s11473_s30 + $0x40] sm:$0xff] }
 0x9c1   :  { %v1028_v51 = vsel %vm316_vm2, %v1023_v39, 0  ;;  %v7342_v39 = vcombine.high %v1234_v50, %v1242_v28 }
 0x9c2   :  { %8691 = vmatpush3.bf16.msra.mxu1 %v1028_v51  ;;  %v972_v52 = vpack.c.bf16 %v970_v36, %v970_v36  ;;  %v1235_v36 = vld [vmem:[%s11473_s30 + $0x8] sm:$0xff] }
 0x9c3   :  { %v1243_v51 = vld [vmem:[%s11473_s30 + $0x48] sm:$0xff]  ;;  %1705 = vmatprep.subr.bf16.mxu1 %v7342_v39  ;;  %v1269_v39 = vld [vmem:[%s11473_s30 + $0x118] sm:$0xff] }
 0x9c4   :  { %8687 = vmatmul.mubr.msk.bf16.vlgmr.msra.gmra.mrb[24].mxu0 %vm288_vm4, %v972_v52  ;;  %v8884_v0 = vpop.permute.xlu1 %8883  ;;  %v7341_v52 = vcombine.low %v1234_v50, %v1242_v28  ;;  %v1268_v28 = vld [vmem:[%s11473_s30 + $0x110] sm:$0xff] }
 0x9c5   :  { %8704 = vmatprep.mubr.msk.bf16.mxu0 %vm9303_vm1, %v9302_v12  ;;  %8697 = vmatpush3.bf16.msra.mxu0 %v8925_v53  ;;  %v8886_v2 = vunpack.i.h.bf16 %v8884_v0  ;;  %v8885_v3 = vunpack.i.l.bf16 %v8884_v0  ;;  %v1258_v53 = vld [vmem:[%s11473_s30 + $0xc0] sm:$0xff] }
 0x9c6   :  { %8698 = vmatprep.subr.bf16.mxu0 %v9302_v12 }
 0x9c7   :  { %v9252_v8 = vpop.eup %9251  ;;  %v1095_v5 = vsel %vm192_vm3, %v9543_v23, %v8886_v2  ;;  %v1094_v6 = vsel %vm192_vm3, %v9541_v19, %v8885_v3  ;;  %v7333_v19 = vld [vmem:[%s11472_s28] ss:$0 sm:$0xff] }
 0x9c8   :  { %v971_v18 = vmul.f32 %v9252_v8, %v9248_v46  ;;  %v1097_v22 = vsel %vm1096_vm5, %v1094_v6, %v8890_v11  ;;  %v1098_v24 = vsel %vm1096_vm5, %v1095_v5, %v8891_v7  ;;  %v7343_v8 = vcombine.low %v1235_v36, %v1243_v51  ;;  %v1282_v3 = vld [vmem:[%s11473_s30 + $0x180] sm:$0xff]  ;;  %v1283_v5 = vld [vmem:[%s11473_s30 + $0x188] sm:$0xff] }
 0x9c9   :  { %8699 = vmatpush3.bf16.msra.mxu0 %v8926_v54  ;;  %v1251_v54 = vld [vmem:[%s11473_s30 + $0x88] sm:$0xff]  ;;  %v7390_v6 = vcombine.high %v1282_v3, %v1290_v4  ;;  %v7389_v11 = vcombine.low %v1282_v3, %v1290_v4 }
 0x9ca   :  { %v973_v21 = vpack.c.bf16 %v971_v18, %v971_v18  ;;  %8700 = vmatprep.subr.bf16.mxu0 %v9302_v12  ;;  %v7344_v18 = vcombine.high %v1235_v36, %v1243_v51  ;;  %v1291_v7 = vld [vmem:[%s11473_s30 + $0x1c8] sm:$0xff]  ;;  %v1276_v36 = vld [vmem:[%s11473_s30 + $0x150] sm:$0xff]  ;;  %v1277_v51 = vld [vmem:[%s11473_s30 + $0x158] sm:$0xff] }
 0x9cc   :  { %8693 = vmatmul.mubr.msk.bf16.vlgmr.msra.gmra.mrb[36].mxu1 %vm288_vm4, %v973_v21  ;;  %v1250_v21 = vld [vmem:[%s11473_s30 + $0x80] sm:$0xff] }
 0x9cd   :  { %1737 = vmatprep.mubr.bf16.mxu1 %v9301_v1  ;;  %8701 = vmatpush3.bf16.msra.mxu0 %v8927_v55  ;;  %v7358_v55 = vcombine.high %v1250_v21, %v1258_v53 }
 0x9ce   :  { %8702 = vmatprep.subr.bf16.mxu0 %v9302_v12  ;;  %1706 = vmatpush1.bf16.msra.mxu1 %v7341_v52 }
 0x9cf   :  { %1707 = vmatprep.subr.bf16.mxu1 %v7358_v55  ;;  %v1292_v55 = vld [vmem:[%s11473_s30 + $0x1d0] sm:$0xff] }
 0x9d1   :  { %8703 = vmatpush3.bf16.msra.mxu0 %v8928_v56  ;;  %v1259_v56 = vld [vmem:[%s11473_s30 + $0xc8] sm:$0xff] }
 0x9d2   :  { %1748 = vmatprep.subr.bf16.mxu0 %v7344_v18 }
 0xa97   :  { %v1016_v57 = vpop.f32.mrb[24].mxu0 }
 0xa98   :  { %v8688_v58 = vpop.f32.mrb[25].mxu0 }
 0xa99   :  { %v1019_v59 = vpop.f32.mrb[26].mxu0  ;;  %v7359_v58 = vcombine.low %v1251_v54, %v1259_v56 }
 0xa9a   :  { %v8689_v31 = vpop.f32.mrb[27].mxu0  ;;  %v7360_v59 = vcombine.high %v1251_v54, %v1259_v56  ;;  %v1284_v54 = vld [vmem:[%s11473_s30 + $0x190] sm:$0xff]  ;;  %v1285_v56 = vld [vmem:[%s11473_s30 + $0x198] sm:$0xff] }
 0xa9b   :  { %v1266_v31 = vld [vmem:[%s11473_s30 + $0x100] sm:$0xff]  ;;  %v7393_v3 = vcombine.low %v1284_v54, %v1292_v55 }
 0xa9f   :  { %v1064_v40 = vpop.f32.mrb[36].mxu1 }
 0xaa0   :  { %v8892_v60 = vpack.i.bf16 %v1064_v40, %v1016_v57  ;;  %v8694_v61 = vpop.f32.mrb[37].mxu1  ;;  %v7357_v57 = vcombine.low %v1250_v21, %v1258_v53  ;;  %v1274_v40 = vld [vmem:[%s11473_s30 + $0x140] sm:$0xff] }
 0xaa1   :  { %v1067_v62 = vpop.f32.mrb[38].mxu1  ;;  %v7374_v61 = vcombine.high %v1266_v31, %v1274_v40 }
 0xaa2   :  { %8893 = vrot.lane.b32.xlu1 %v8892_v60, %s11458_s23  ;;  %v8695_v63 = vpop.f32.mrb[39].mxu1  ;;  %1708 = vmatpush1.bf16.msra.mxu1 %v7357_v57  ;;  %v1267_v60 = vld [vmem:[%s11473_s30 + $0x108] sm:$0xff]  ;;  %v1293_v57 = vld [vmem:[%s11473_s30 + $0x1d8] sm:$0xff]  ;;  %s11480_s23 = smov 80  }
 0xaa3   :  { %v1275_v62 = vld [vmem:[%s11473_s30 + $0x148] sm:$0xff]  ;;  %v7373_v63 = vcombine.low %v1266_v31, %v1274_v40  ;;  %1709 = vmatprep.subr.bf16.mxu1 %v7374_v61  ;;  %v7377_v31 = vcombine.low %v1268_v28, %v1276_v36  ;;  %v7379_v40 = vcombine.low %v1269_v39, %v1277_v51  ;;  %v1246_v61 = vld [vmem:[%s11473_s30 + $0x60] sm:$0xff]  ;;  %v7395_v4 = vcombine.low %v1285_v56, %v1293_v57 }
 0xaa4   :  { %v7375_v0 = vcombine.low %v1267_v60, %v1275_v62  ;;  %v7376_v2 = vcombine.high %v1267_v60, %v1275_v62  ;;  %v1238_v60 = vld [vmem:[%s11473_s30 + $0x20] sm:$0xff]  ;;  %v1239_v62 = vld [vmem:[%s11473_s30 + $0x28] sm:$0xff] }
 0xaa6   :  { %1710 = vmatpush1.bf16.msra.mxu1 %v7373_v63  ;;  %v1247_v63 = vld [vmem:[%s11473_s30 + $0x68] sm:$0xff] }
 0xaa7   :  { %1711 = vmatprep.subr.bf16.mxu1 %v7390_v6  ;;  %v1262_v6 = vld [vmem:[%s11473_s30 + $0xe0] sm:$0xff] }
 0xaaa   :  { %1712 = vmatpush1.bf16.msra.mxu1 %v7389_v11  ;;  %v1263_v11 = vld [vmem:[%s11473_s30 + $0xe8] sm:$0xff] }
 0xb14   :  { %v8894_v13 = vpop.permute.xlu1 %8893 }
 0xb15   :  { %v8896_v16 = vunpack.i.h.bf16 %v8894_v13  ;;  %v8895_v20 = vunpack.i.l.bf16 %v8894_v13  ;;  %v7391_v13 = vcombine.low %v1283_v5, %v1291_v7 }
 0xb17   :  { %v1101_v26 = vsel %vm1099_vm6, %v1098_v24, %v8896_v16  ;;  %v1100_v27 = vsel %vm1099_vm6, %v1097_v22, %v8895_v20  ;;  %v7392_v16 = vcombine.high %v1283_v5, %v1291_v7  ;;  %v1236_v20 = vld [vmem:[%s11473_s30 + $0x10] sm:$0xff]  ;;  %v1237_v24 = vld [vmem:[%s11473_s30 + $0x18] sm:$0xff]  ;;  %v1254_v5 = vld [vmem:[%s11473_s30 + $0xa0] sm:$0xff] }
 0xb18   :  { %v1102_v29 = vpack.c.bf16 %v1101_v26, %v1100_v27  ;;  %v1244_v22 = vld [vmem:[%s11473_s30 + $0x50] sm:$0xff]  ;;  %v1255_v7 = vld [vmem:[%s11473_s30 + $0xa8] sm:$0xff] }
 0xb19   :  { %v7345_v26 = vcombine.low %v1236_v20, %v1244_v22  ;;  %v7346_v27 = vcombine.high %v1236_v20, %v1244_v22  ;;  %v7349_v20 = vcombine.low %v1238_v60, %v1246_v61  ;;  %v7351_v22 = vcombine.low %v1239_v62, %v1247_v63 }
 0xb1a   :  { %8705 = vmatmul.mubr.msk.bf16.vlgmr.msra.gmra.mrb[28].mxu0 %vm134_vm0, %v1102_v29  ;;  %v1245_v29 = vld [vmem:[%s11473_s30 + $0x58] sm:$0xff] }
 0xb1b   :  { %1780 = vmatprep.mubr.bf16.mxu0 %v9301_v1  ;;  %1749 = vmatpush1.bf16.msra.mxu0 %v7343_v8 }
 0xb1c   :  { %1750 = vmatprep.subr.bf16.mxu0 %v7360_v59  ;;  %1791 = vmatprep.subr.bf16.mxu1 %v7346_v27  ;;  %v7380_v59 = vcombine.high %v1269_v39, %v1277_v51  ;;  %v1271_v27 = vld [vmem:[%s11473_s30 + $0x128] sm:$0xff]  ;;  %v1257_v39 = vld [vmem:[%s11473_s30 + $0xb8] sm:$0xff] }
 0xb1d   :  { %v1265_v51 = vld [vmem:[%s11473_s30 + $0xf8] sm:$0xff] }
 0xb1f   :  { %1751 = vmatpush1.bf16.msra.mxu0 %v7359_v58  ;;  %v7378_v58 = vcombine.high %v1268_v28, %v1276_v36  ;;  %v1256_v28 = vld [vmem:[%s11473_s30 + $0xb0] sm:$0xff] }
 0xb20   :  { %1752 = vmatprep.subr.bf16.mxu0 %v7376_v2  ;;  %v7396_v2 = vcombine.high %v1285_v56, %v1293_v57  ;;  %v1264_v36 = vld [vmem:[%s11473_s30 + $0xf0] sm:$0xff]  ;;  %v1273_v56 = vld [vmem:[%s11473_s30 + $0x138] sm:$0xff] }
 0xb21   :  { %v1281_v57 = vld [vmem:[%s11473_s30 + $0x178] sm:$0xff] }
 0xb23   :  { %1753 = vmatpush1.bf16.msra.mxu0 %v7375_v0  ;;  %v7394_v0 = vcombine.high %v1284_v54, %v1292_v55  ;;  %v1272_v54 = vld [vmem:[%s11473_s30 + $0x130] sm:$0xff] }
 0xb24   :  { %1754 = vmatprep.subr.bf16.mxu0 %v7392_v16  ;;  %v7352_v16 = vcombine.high %v1239_v62, %v1247_v63  ;;  %v1280_v55 = vld [vmem:[%s11473_s30 + $0x170] sm:$0xff]  ;;  %v1289_v62 = vld [vmem:[%s11473_s30 + $0x1b8] sm:$0xff] }
 0xb25   :  { %v1297_v63 = vld [vmem:[%s11473_s30 + $0x1f8] sm:$0xff] }
 0xb27   :  { %1755 = vmatpush1.bf16.msra.mxu0 %v7391_v13  ;;  %v7350_v13 = vcombine.high %v1238_v60, %v1246_v61  ;;  %v1288_v60 = vld [vmem:[%s11473_s30 + $0x1b0] sm:$0xff] }
 0xb28   :  { %v1296_v61 = vld [vmem:[%s11473_s30 + $0x1f0] sm:$0xff] }
 0xbed   :  { %v1179_v23 = vpop.f32.mrb[28].mxu0 }
 0xbee   :  { %v1180_v30 = vadd.f32 %v7333_v19, %v1179_v23  ;;  %v8706_v32 = vpop.f32.mrb[29].mxu0  ;;  %v7348_v23 = vcombine.high %v1237_v24, %v1245_v29 }
 0xbef   :  { %v1182_v33 = vpop.f32.mrb[30].mxu0 }
 0xbf0   :  { %v1183_v34 = vadd.f32 %v7333_v19, %v1182_v33  ;;  %v8707_v35 = vpop.f32.mrb[31].mxu0  ;;  %v1186_v37 = vadd.f32 %v1180_v30, %v9450_v9  ;;  %v7347_v19 = vcombine.low %v1237_v24, %v1245_v29  ;;  %1834 = vmatprep.subr.bf16.mxu0 %v7348_v23  ;;  %v1270_v24 = vld [vmem:[%s11473_s30 + $0x120] sm:$0xff]  ;;  %v1279_v29 = vld [vmem:[%s11473_s30 + $0x168] sm:$0xff]  ;;  %v7368_v23 = vcombine.high %v1255_v7, %v1263_v11 }
 0xbf2   :  { %v1190_v38 = vsel %vm134_vm0, %v1186_v37, 0.0  ;;  %v1187_v41 = vadd.f32 %v1183_v34, %v9455_v10 }
 0xbf3   :  { %1191 = vadd.xlane.f32.xlu0 %v1190_v38 }
 0xbf4   :  { %v1193_v42 = vsel %vm134_vm0, %v1187_v41, 0.0 }
 0xbf5   :  { %1194 = vadd.xlane.f32.xlu1 %v1193_v42 }
 0xc80   :  { %v1192_v43 = vpop.xlane.xlu0 %1191 }
 0xc81   :  { %v1197_v44 = vmul.f32 0.015625, %v1192_v43 }
 0xc82   :  { %v1195_v45 = vpop.xlane.xlu1 %1194 }
 0xc83   :  { %v9677_v46 = vsub.f32 %v1186_v37, %v1197_v44  ;;  %v1198_v47 = vmul.f32 0.015625, %v1195_v45  ;;  %v7340_v44 = vld [vmem:[%s11428_s8] ss:$0 sm:$0xff] }
 0xc85   :  { %v9679_v48 = vsub.f32 %v1187_v41, %v1198_v47  ;;  %v1201_v49 = vmul.f32 %v9677_v46, %v9677_v46  ;;  %v7339_v41 = vld [vmem:[%s11427_s7] ss:$0 sm:$0xff] }
 0xc87   :  { %v1203_v9 = vsel %vm134_vm0, %v1201_v49, 0.0  ;;  %v1202_v10 = vmul.f32 %v9679_v48, %v9679_v48  ;;  %v1252_v49 = vld [vmem:[%s11473_s30 + $0x90] sm:$0xff] }
 0xc88   :  { %1204 = vadd.xlane.f32.xlu0 %v1203_v9  ;;  %v1260_v9 = vld [vmem:[%s11473_s30 + $0xd0] sm:$0xff] }
 0xc89   :  { %v1206_v25 = vsel %vm134_vm0, %v1202_v10, 0.0  ;;  %v1261_v10 = vld [vmem:[%s11473_s30 + $0xd8] sm:$0xff]  ;;  %v7362_v8 = vcombine.high %v1252_v49, %v1260_v9  ;;  %v7361_v21 = vcombine.low %v1252_v49, %v1260_v9 }
 0xc8a   :  { %v1249_v49 = vld [vmem:[%s11473_s30 + $0x78] sm:$0xff] }
 0xc8c   :  { %1207 = vadd.xlane.f32.xlu0 %v1206_v25 }
 0xd15   :  { %v1205_v30 = vpop.xlane.xlu0 %1204 }
 0xd16   :  { %v1209_v32 = vmul.f32 0.015625, %v1205_v30  ;;  %v7365_v30 = vcombine.low %v1254_v5, %v1262_v6 }
 0xd18   :  { %v1211_v33 = vadd.f32 1e-05, %v1209_v32  ;;  %v7367_v32 = vcombine.low %v1255_v7, %v1263_v11  ;;  %v8929_v7 = vld [vmem:[%s11426_s11 + $0x40] sm:$0xff]  }
 0xd19   :  { %v1208_v34 = vpop.xlane.xlu0 %1207  ;;  %v8930_v11 = vld [vmem:[%s11426_s11 + $0xc0] sm:$0xff]  }
 0xd1a   :  { %9253 = vrsqrt.f32 %v1211_v33  ;;  %v1210_v35 = vmul.f32 0.015625, %v1208_v34  ;;  %v1286_v33 = vld [vmem:[%s11473_s30 + $0x1a0] sm:$0xff] }
 0xd1b   :  { %v1294_v34 = vld [vmem:[%s11473_s30 + $0x1e0] sm:$0xff] }
 0xd1c   :  { %v1212_v37 = vadd.f32 1e-05, %v1210_v35  ;;  %v1287_v35 = vld [vmem:[%s11473_s30 + $0x1a8] sm:$0xff]  ;;  %v7398_v9 = vcombine.high %v1286_v33, %v1294_v34 }
 0xd1e   :  { %9255 = vrsqrt.f32 %v1212_v37  ;;  %v1295_v37 = vld [vmem:[%s11473_s30 + $0x1e8] sm:$0xff] }
 0xd24   :  { %v9254_v38 = vpop.eup %9253 }
 0xd25   :  { %v1215_v42 = vmul.f32 %v9254_v38, %v9677_v46  ;;  %v1253_v46 = vld [vmem:[%s11473_s30 + $0x98] sm:$0xff] }
 0xd26   :  { %v7364_v18 = vcombine.high %v1253_v46, %v1261_v10  ;;  %v7363_v53 = vcombine.low %v1253_v46, %v1261_v10  ;;  %v7400_v46 = vcombine.high %v1287_v35, %v1295_v37  ;;  %v7397_v10 = vcombine.low %v1286_v33, %v1294_v34  ;;  %v8942_v33 = vld [vmem:[%s11426_s11 + $0xd8] sm:$0xff]  }
 0xd27   :  { %v1223_v45 = vmul.f32 %v7339_v41, %v1215_v42  ;;  %v8943_v34 = vld [vmem:[%s11426_s11 + $0x18] sm:$0xff]  }
 0xd28   :  { %v9256_v43 = vpop.eup %9255 }
 0xd29   :  { %v1216_v47 = vmul.f32 %v9256_v43, %v9679_v48  ;;  %v9767_v50 = vadd.f32 %v7340_v44, %v1223_v45  ;;  %v7383_v43 = vcombine.low %v1271_v27, %v1279_v29  ;;  %v1248_v45 = vld [vmem:[%s11473_s30 + $0x70] sm:$0xff] }
 0xd2b   :  { %v1224_v25 = vmul.f32 %v7339_v41, %v1216_v47  ;;  %v7384_v41 = vcombine.high %v1271_v27, %v1279_v29  ;;  %v1241_v47 = vld [vmem:[%s11473_s30 + $0x38] sm:$0xff]  ;;  %v8935_v27 = vld [vmem:[%s11426_s11 + $0x8] sm:$0xff]  }
 0xd2c   :  { %v8936_v29 = vld [vmem:[%s11426_s11 + $0x88] sm:$0xff]  }
 0xd2d   :  { %v9769_v48 = vadd.f32 %v7340_v44, %v1224_v25  ;;  %v1240_v44 = vld [vmem:[%s11473_s30 + $0x30] sm:$0xff]  ;;  %v7399_v25 = vcombine.low %v1287_v35, %v1295_v37  ;;  %v8944_v35 = vld [vmem:[%s11426_s11 + $0x98] sm:$0xff]   ;;  %v8945_v37 = vld [vmem:[%s11426_s11 + $0x60] sm:$0xff]  }
 0xd2f   :  { %v9785_v52 = vpack.c.bf16 %v9769_v48, %v9767_v50 }
 0xd31   :  { %7405 = vmatmul.mubr.msk.bf16.vlgmr.msra.gmra.mrb[40].mxu1 %vm134_vm0, %v9785_v52  ;;  %7406 = vmatmul.mubr.msk.bf16.vlgmr.msra.gmra.mrb[32].mxu0 %vm134_vm0, %v9785_v52 }
 0xd32   :  { %1792 = vmatpush1.bf16.msra.mxu1 %v7345_v26  ;;  %1835 = vmatpush1.bf16.msra.mxu0 %v7347_v19  ;;  %v1278_v26 = vld [vmem:[%s11473_s30 + $0x160] sm:$0xff]  ;;  %v7366_v19 = vcombine.high %v1254_v5, %v1262_v6  ;;  %v7402_v5 = vcombine.high %v1288_v60, %v1296_v61  ;;  %v7404_v6 = vcombine.high %v1289_v62, %v1297_v63 }
 0xd33   :  { %1793 = vmatprep.subr.bf16.mxu1 %v7362_v8  ;;  %1836 = vmatprep.subr.bf16.mxu0 %v7364_v18  ;;  %v7382_v38 = vcombine.high %v1270_v24, %v1278_v26  ;;  %v7381_v42 = vcombine.low %v1270_v24, %v1278_v26  ;;  %v7354_v8 = vcombine.high %v1240_v44, %v1248_v45  ;;  %v8933_v24 = vld [vmem:[%s11426_s11 + $0x48] sm:$0xff]  }
 0xd34   :  { %1823 = vmatprep.mubr.bf16.mxu1 %v9301_v1  ;;  %1866 = vmatprep.mubr.bf16.mxu0 %v9301_v1  ;;  %v7356_v18 = vcombine.high %v1241_v47, %v1249_v49  ;;  %v8934_v26 = vld [vmem:[%s11426_s11 + $0xc8] sm:$0xff]  }
 0xd36   :  { %1794 = vmatpush1.bf16.msra.mxu1 %v7361_v21  ;;  %1837 = vmatpush1.bf16.msra.mxu0 %v7363_v53  ;;  %v7353_v21 = vcombine.low %v1240_v44, %v1248_v45  ;;  %v7355_v53 = vcombine.low %v1241_v47, %v1249_v49  ;;  %v8950_v44 = vld [vmem:[%s11426_s11 + $0xe8] sm:$0xff]   ;;  %v8953_v49 = vld [vmem:[%s11426_s11 + $0x70] sm:$0xff]  }
 0xd37   :  { %1795 = vmatprep.subr.bf16.mxu1 %v7378_v58  ;;  %1838 = vmatprep.subr.bf16.mxu0 %v7380_v59  ;;  %v7370_v58 = vcombine.high %v1256_v28, %v1264_v36  ;;  %v7372_v59 = vcombine.high %v1257_v39, %v1265_v51  ;;  %v8951_v45 = vld [vmem:[%s11426_s11 + $0x28] sm:$0xff]  }
 0xd38   :  { %v8952_v47 = vld [vmem:[%s11426_s11 + $0xa8] sm:$0xff]  }
 0xd3a   :  { %1796 = vmatpush1.bf16.msra.mxu1 %v7377_v31  ;;  %1839 = vmatpush1.bf16.msra.mxu0 %v7379_v40  ;;  %v7369_v31 = vcombine.low %v1256_v28, %v1264_v36  ;;  %v7371_v40 = vcombine.low %v1257_v39, %v1265_v51  ;;  %v8958_v28 = vld [vmem:[%s11426_s11 + $0xf8] sm:$0xff]   ;;  %v8961_v51 = vld [vmem:[%s11426_s11 + $0x140] sm:$0xff]  }
 0xd3b   :  { %1797 = vmatprep.subr.bf16.mxu1 %v7394_v0  ;;  %1840 = vmatprep.subr.bf16.mxu0 %v7396_v2  ;;  %v7386_v0 = vcombine.high %v1272_v54, %v1280_v55  ;;  %v7388_v2 = vcombine.high %v1273_v56, %v1281_v57  ;;  %v8959_v36 = vld [vmem:[%s11426_s11 + $0x38] sm:$0xff]  }
 0xd3c   :  { %v8960_v39 = vld [vmem:[%s11426_s11 + $0xb8] sm:$0xff]  }
 0xd3e   :  { %1798 = vmatpush1.bf16.msra.mxu1 %v7393_v3  ;;  %1841 = vmatpush1.bf16.msra.mxu0 %v7395_v4  ;;  %v7385_v3 = vcombine.low %v1272_v54, %v1280_v55  ;;  %v7387_v4 = vcombine.low %v1273_v56, %v1281_v57 }
 0xd3f   :  { %1877 = vmatprep.subr.bf16.mxu1 %v7350_v13  ;;  %1920 = vmatprep.subr.bf16.mxu0 %v7352_v16  ;;  %v7401_v13 = vcombine.low %v1288_v60, %v1296_v61  ;;  %v7403_v16 = vcombine.low %v1289_v62, %v1297_v63 }
 0xd41   :  { %7407 = vmatmul.mubr.msk.bf16.vlgmr.msra.gmra.mrb[44].mxu1 %vm134_vm0, %v9785_v52  ;;  %7408 = vmatmul.mubr.msk.bf16.vlgmr.msra.gmra.mrb[36].mxu0 %vm134_vm0, %v9785_v52 }
 0xd42   :  { %1878 = vmatpush1.bf16.msra.mxu1 %v7349_v20  ;;  %1921 = vmatpush1.bf16.msra.mxu0 %v7351_v22  ;;  %v8931_v20 = vld [vmem:[%s11426_s11] sm:$0xff]  }
 0xd43   :  { %1879 = vmatprep.subr.bf16.mxu1 %v7366_v19  ;;  %1922 = vmatprep.subr.bf16.mxu0 %v7368_v23  ;;  %v8932_v22 = vld [vmem:[%s11426_s11 + $0x80] sm:$0xff]   ;;  %v8937_v19 = vld [vmem:[%s11426_s11 + $0x50] sm:$0xff]  }
 0xd44   :  { %1909 = vmatprep.mubr.bf16.mxu1 %v9301_v1  ;;  %1952 = vmatprep.mubr.bf16.mxu0 %v9301_v1  ;;  %v8938_v23 = vld [vmem:[%s11426_s11 + $0xd0] sm:$0xff]  }
 0xd46   :  { %1880 = vmatpush1.bf16.msra.mxu1 %v7365_v30  ;;  %1923 = vmatpush1.bf16.msra.mxu0 %v7367_v32  ;;  %v8939_v30 = vld [vmem:[%s11426_s11 + $0x10] sm:$0xff]   ;;  %v8941_v32 = vld [vmem:[%s11426_s11 + $0x58] sm:$0xff]  }
 0xd47   :  { %1881 = vmatprep.subr.bf16.mxu1 %v7382_v38  ;;  %1924 = vmatprep.subr.bf16.mxu0 %v7384_v41  ;;  %v8946_v38 = vld [vmem:[%s11426_s11 + $0xe0] sm:$0xff]  }
 0xd48   :  { %v8947_v41 = vld [vmem:[%s11426_s11 + $0x20] sm:$0xff]  }
 0xd4a   :  { %1882 = vmatpush1.bf16.msra.mxu1 %v7381_v42  ;;  %1925 = vmatpush1.bf16.msra.mxu0 %v7383_v43  ;;  %v8948_v42 = vld [vmem:[%s11426_s11 + $0xa0] sm:$0xff]   ;;  %v8949_v43 = vld [vmem:[%s11426_s11 + $0x68] sm:$0xff]  }
 0xd4b   :  { %1883 = vmatprep.subr.bf16.mxu1 %v7398_v9  ;;  %1926 = vmatprep.subr.bf16.mxu0 %v7400_v46  ;;  %v8954_v9 = vld [vmem:[%s11426_s11 + $0xf0] sm:$0xff]  }
 0xd4c   :  { %v8955_v46 = vld [vmem:[%s11426_s11 + $0x30] sm:$0xff]  }
 0xd4e   :  { %1884 = vmatpush1.bf16.msra.mxu1 %v7397_v10  ;;  %1927 = vmatpush1.bf16.msra.mxu0 %v7399_v25  ;;  %v8956_v10 = vld [vmem:[%s11426_s11 + $0xb0] sm:$0xff]   ;;  %v8957_v25 = vld [vmem:[%s11426_s11 + $0x78] sm:$0xff]  }
 0xd4f   :  { %1963 = vmatprep.subr.bf16.mxu1 %v7354_v8  ;;  %2006 = vmatprep.subr.bf16.mxu0 %v7356_v18  ;;  %v8962_v8 = vld [vmem:[%s11426_s11 + $0x1c0] sm:$0xff]   ;;  %v10020_v18 = vsub.s32 2, %v9462_v14 }
 0xd51   :  { %7409 = vmatmul.mubr.msk.bf16.vlgmr.msra.gmra.mrb[48].mxu1 %vm134_vm0, %v9785_v52  ;;  %7410 = vmatmul.mubr.msk.bf16.vlgmr.msra.gmra.mrb[40].mxu0 %vm134_vm0, %v9785_v52 }
 0xd52   :  { %1964 = vmatpush1.bf16.msra.mxu1 %v7353_v21  ;;  %2007 = vmatpush1.bf16.msra.mxu0 %v7355_v53  ;;  %v1298_v21 = vld [vmem:[%s11429_s10] sm:$0xff]  ;;  %v10026_v53 = vsub.s32 3, %v9462_v14 }
 0xd53   :  { %1965 = vmatprep.subr.bf16.mxu1 %v7370_v58  ;;  %2008 = vmatprep.subr.bf16.mxu0 %v7372_v59  ;;  %v1305_v54 = vrot.slane %v1298_v21, %v9465_v15  ;;  %v1313_v55 = vrot.slane %v1298_v21, %v10020_v18  ;;  %v1309_v56 = vrot.slane %v1298_v21, %v9471_v17 }
 0xd54   :  { %1995 = vmatprep.mubr.bf16.mxu1 %v9301_v1  ;;  %2038 = vmatprep.mubr.bf16.mxu0 %v9301_v1  ;;  %v1317_v57 = vrot.slane %v1298_v21, %v10026_v53 }
 0xd56   :  { %1966 = vmatpush1.bf16.msra.mxu1 %v7369_v31  ;;  %2009 = vmatpush1.bf16.msra.mxu0 %v7371_v40 }
 0xd57   :  { %1967 = vmatprep.subr.bf16.mxu1 %v7386_v0  ;;  %2010 = vmatprep.subr.bf16.mxu0 %v7388_v2 }
 0xd5a   :  { %1968 = vmatpush1.bf16.msra.mxu1 %v7385_v3  ;;  %2011 = vmatpush1.bf16.msra.mxu0 %v7387_v4 }
 0xd5b   :  { %1969 = vmatprep.subr.bf16.mxu1 %v7402_v5  ;;  %2012 = vmatprep.subr.bf16.mxu0 %v7404_v6 }
 0xd5e   :  { %1970 = vmatpush1.bf16.msra.mxu1 %v7401_v13  ;;  %2013 = vmatpush1.bf16.msra.mxu0 %v7403_v16 }
 0xd5f   :  { %8187 = vmatprep.subr.bf16.mxu1 %v8929_v7  ;;  %8209 = vmatprep.subr.bf16.mxu0 %v8930_v11 }
 0xd61   :  { %7411 = vmatmul.mubr.msk.bf16.vlgmr.msra.gmra.mrb[52].mxu1 %vm134_vm0, %v9785_v52  ;;  %7412 = vmatmul.mubr.msk.bf16.vlgmr.msra.gmra.mrb[44].mxu0 %vm134_vm0, %v9785_v52  ;;  %v8940_v52 = vld [vmem:[%s11426_s11 + $0x90] sm:$0xff]  }
 0xd62   :  { %8188 = vmatpush3.bf16.msra.mxu1 %v8931_v20  ;;  %8210 = vmatpush3.bf16.msra.mxu0 %v8932_v22 }
 0xd63   :  { %8189 = vmatprep.subr.bf16.mxu1 %v8933_v24  ;;  %8211 = vmatprep.subr.bf16.mxu0 %v8934_v26 }
 0xd66   :  { %8190 = vmatpush3.bf16.msra.mxu1 %v8935_v27  ;;  %8212 = vmatpush3.bf16.msra.mxu0 %v8936_v29 }
 0xd67   :  { %8191 = vmatprep.subr.bf16.mxu1 %v8937_v19  ;;  %8213 = vmatprep.subr.bf16.mxu0 %v8938_v23 }
 0xd6a   :  { %8192 = vmatpush3.bf16.msra.mxu1 %v8939_v30  ;;  %8214 = vmatpush3.bf16.msra.mxu0 %v8940_v52 }
 0xd6b   :  { %8193 = vmatprep.subr.bf16.mxu1 %v8941_v32  ;;  %8215 = vmatprep.subr.bf16.mxu0 %v8942_v33  ;;  %v8963_v32 = vld [vmem:[%s11426_s11 + $0x100] sm:$0xff]  }
 0xd6c   :  { %v8964_v33 = vld [vmem:[%s11426_s11 + $0x180] sm:$0xff]  }
 0xd6e   :  { %8194 = vmatpush3.bf16.msra.mxu1 %v8943_v34  ;;  %8216 = vmatpush3.bf16.msra.mxu0 %v8944_v35  ;;  %v8965_v34 = vld [vmem:[%s11426_s11 + $0x148] sm:$0xff]  }
 0xd6f   :  { %8195 = vmatprep.subr.bf16.mxu1 %v8945_v37  ;;  %8217 = vmatprep.subr.bf16.mxu0 %v8946_v38  ;;  %v8966_v35 = vld [vmem:[%s11426_s11 + $0x1c8] sm:$0xff]   ;;  %v10045_v37 = vsub.s32 4, %v9462_v14  ;;  %v10048_v38 = vsub.s32 6, %v9462_v14 }
 0xd72   :  { %8196 = vmatpush3.bf16.msra.mxu1 %v8947_v41  ;;  %8218 = vmatpush3.bf16.msra.mxu0 %v8948_v42  ;;  %v10051_v41 = vsub.s32 5, %v9462_v14  ;;  %v10054_v42 = vsub.s32 7, %v9462_v14  ;;  %v8969_v14 = vld [vmem:[%s11426_s11 + $0x150] sm:$0xff]  }
 0xd73   :  { %8197 = vmatprep.subr.bf16.mxu1 %v8949_v43  ;;  %8219 = vmatprep.subr.bf16.mxu0 %v8950_v44  ;;  %v8967_v43 = vld [vmem:[%s11426_s11 + $0x108] sm:$0xff]  }
 0xd74   :  { %v8968_v44 = vld [vmem:[%s11426_s11 + $0x188] sm:$0xff]  }
 0xd76   :  { %8198 = vmatpush3.bf16.msra.mxu1 %v8951_v45  ;;  %8220 = vmatpush3.bf16.msra.mxu0 %v8952_v47  ;;  %v1321_v45 = vrot.slane %v1298_v21, %v10045_v37  ;;  %v1329_v47 = vrot.slane %v1298_v21, %v10048_v38 }
 0xd77   :  { %8199 = vmatprep.subr.bf16.mxu1 %v8953_v49  ;;  %8221 = vmatprep.subr.bf16.mxu0 %v8954_v9  ;;  %v8970_v49 = vld [vmem:[%s11426_s11 + $0x1d0] sm:$0xff]   ;;  %v1325_v9 = vrot.slane %v1298_v21, %v10051_v41 }
 0xd7a   :  { %8200 = vmatpush3.bf16.msra.mxu1 %v8955_v46  ;;  %8222 = vmatpush3.bf16.msra.mxu0 %v8956_v10  ;;  %v1333_v46 = vrot.slane %v1298_v21, %v10054_v42  ;;  %v8973_v21 = vld [vmem:[%s11426_s11 + $0x158] sm:$0xff]  }
 0xd7b   :  { %8201 = vmatprep.subr.bf16.mxu1 %v8957_v25  ;;  %8223 = vmatprep.subr.bf16.mxu0 %v8958_v28  ;;  %v8971_v28 = vld [vmem:[%s11426_s11 + $0x110] sm:$0xff]  }
 0xd7e   :  { %8202 = vmatpush3.bf16.msra.mxu1 %v8959_v36  ;;  %8224 = vmatpush3.bf16.msra.mxu0 %v8960_v39  ;;  %v8972_v36 = vld [vmem:[%s11426_s11 + $0x190] sm:$0xff]  }
 0xd7f   :  { %8231 = vmatprep.subr.bf16.mxu1 %v8961_v51  ;;  %8253 = vmatprep.subr.bf16.mxu0 %v8962_v8 }
 0xe04   :  { %v1739_v58 = vpop.f32.mrb[40].mxu1  ;;  %v1782_v59 = vpop.f32.mrb[32].mxu0 }
 0xe05   :  { %v1740_v31 = vadd.f32 %v1739_v58, %v1305_v54  ;;  %v1783_v40 = vadd.f32 %v1782_v59, %v1313_v55  ;;  %v1741_v60 = vpop.f32.mrb[41].mxu1  ;;  %v1784_v61 = vpop.f32.mrb[33].mxu0 }
 0xe06   :  { %v1742_v62 = vadd.f32 %v1741_v60, %v1309_v56  ;;  %v1785_v63 = vadd.f32 %v1784_v61, %v1317_v57  ;;  %v1743_v0 = vpop.f32.mrb[42].mxu1  ;;  %v1786_v2 = vpop.f32.mrb[34].mxu0 }
 0xe07   :  { %v1744_v3 = vadd.f32 %v1743_v0, %v1305_v54  ;;  %v1787_v4 = vadd.f32 %v1786_v2, %v1313_v55  ;;  %v1745_v5 = vpop.f32.mrb[43].mxu1  ;;  %v1788_v6 = vpop.f32.mrb[35].mxu0  ;;  %v2049_v13 = vmax.f32 %v1740_v31, 0.0  ;;  %v2051_v16 = vmax.f32 %v1783_v40, 0.0  ;;  %v8974_v55 = vld [vmem:[%s11426_s11 + $0x1d8] sm:$0xff]  }
 0xe08   :  { %v1746_v7 = vadd.f32 %v1745_v5, %v1309_v56  ;;  %v1789_v11 = vadd.f32 %v1788_v6, %v1317_v57  ;;  %v2050_v24 = vmax.f32 %v1742_v62, 0.0  ;;  %v2052_v26 = vmax.f32 %v1785_v63, 0.0  ;;  %v8975_v0 = vld [vmem:[%s11426_s11 + $0x118] sm:$0xff]  }
 0xe09   :  { %v2065_v20 = vmax.f32 %v1744_v3, 0.0  ;;  %v2067_v22 = vmax.f32 %v1787_v4, 0.0  ;;  %v8976_v2 = vld [vmem:[%s11426_s11 + $0x198] sm:$0xff]  }
 0xe0a   :  { %v2066_v27 = vmax.f32 %v1746_v7, 0.0  ;;  %v2068_v29 = vmax.f32 %v1789_v11, 0.0  ;;  %v8977_v7 = vld [vmem:[%s11426_s11 + $0x160] sm:$0xff]  }
 0xe0b   :  { %v2081_v19 = vpack.c.bf16 %v2065_v20, %v2049_v13  ;;  %v2083_v23 = vpack.c.bf16 %v2067_v22, %v2051_v16  ;;  %v8978_v11 = vld [vmem:[%s11426_s11 + $0x1e0] sm:$0xff]  }
 0xe0c   :  { %v2082_v30 = vpack.c.bf16 %v2066_v27, %v2050_v24  ;;  %v2084_v52 = vpack.c.bf16 %v2068_v29, %v2052_v26 }
 0xe0e   :  { %3160 = vmatprep.mubr.bf16.mxu1 %v2082_v30  ;;  %3201 = vmatprep.mubr.bf16.mxu0 %v2084_v52  ;;  %v8981_v30 = vld [vmem:[%s11426_s11 + $0x168] sm:$0xff]  }
 0xe0f   :  { %3161 = vmatmul.mubr.bf16.vlgmr.msra.gmra.mrb[56].mxu1 %v2081_v19  ;;  %3202 = vmatmul.mubr.bf16.vlgmr.msra.gmra.mrb[48].mxu0 %v2083_v23  ;;  %v8979_v19 = vld [vmem:[%s11426_s11 + $0x120] sm:$0xff]   ;;  %v8982_v52 = vld [vmem:[%s11426_s11 + $0x1e8] sm:$0xff]  }
 0xe10   :  { %8232 = vmatpush3.bf16.msra.mxu1 %v8963_v32  ;;  %8254 = vmatpush3.bf16.msra.mxu0 %v8964_v33  ;;  %v8980_v23 = vld [vmem:[%s11426_s11 + $0x1a0] sm:$0xff]   ;;  %v10115_v32 = vld [vmem:[%s11429_s10 + $0x8] sm:$0xff] }
 0xe11   :  { %8233 = vmatprep.subr.bf16.mxu1 %v8965_v34  ;;  %8255 = vmatprep.subr.bf16.mxu0 %v8966_v35  ;;  %v8983_v33 = vld [vmem:[%s11426_s11 + $0x128] sm:$0xff]   ;;  %v1337_v35 = vrot.slane %v10115_v32, %v9465_v15 }
 0xe12   :  { %v8984_v34 = vld [vmem:[%s11426_s11 + $0x1a8] sm:$0xff]  }
 0xe14   :  { %v1825_v10 = vpop.f32.mrb[44].mxu1  ;;  %v1868_v25 = vpop.f32.mrb[36].mxu0  ;;  %8234 = vmatpush3.bf16.msra.mxu1 %v8967_v43  ;;  %8256 = vmatpush3.bf16.msra.mxu0 %v8968_v44  ;;  %v1345_v43 = vrot.slane %v10115_v32, %v10020_v18  ;;  %v8985_v44 = vld [vmem:[%s11426_s11 + $0x170] sm:$0xff]  }
 0xe15   :  { %v1826_v39 = vadd.f32 %v1825_v10, %v1321_v45  ;;  %v1869_v51 = vadd.f32 %v1868_v25, %v1329_v47  ;;  %v1827_v8 = vpop.f32.mrb[45].mxu1  ;;  %v1870_v54 = vpop.f32.mrb[37].mxu0  ;;  %8235 = vmatprep.subr.bf16.mxu1 %v8969_v14  ;;  %8257 = vmatprep.subr.bf16.mxu0 %v8970_v49  ;;  %v1349_v14 = vrot.slane %v10115_v32, %v10026_v53  ;;  %v8988_v10 = vld [vmem:[%s11426_s11 + $0x1b0] sm:$0xff]  }
 0xe16   :  { %v1828_v56 = vadd.f32 %v1827_v8, %v1325_v9  ;;  %v1871_v57 = vadd.f32 %v1870_v54, %v1333_v46  ;;  %v1829_v58 = vpop.f32.mrb[46].mxu1  ;;  %v1872_v59 = vpop.f32.mrb[38].mxu0  ;;  %v8990_v8 = vld [vmem:[%s11426_s11 + $0x1f8] sm:$0xff]  }
 0xe17   :  { %v1830_v31 = vadd.f32 %v1829_v58, %v1321_v45  ;;  %v1873_v40 = vadd.f32 %v1872_v59, %v1329_v47  ;;  %v1831_v60 = vpop.f32.mrb[47].mxu1  ;;  %v1874_v61 = vpop.f32.mrb[39].mxu0  ;;  %v2053_v3 = vmax.f32 %v1826_v39, 0.0  ;;  %v2055_v4 = vmax.f32 %v1869_v51, 0.0  ;;  %v8986_v45 = vld [vmem:[%s11426_s11 + $0x1f0] sm:$0xff]   ;;  %v8989_v51 = vld [vmem:[%s11426_s11 + $0x178] sm:$0xff]  }
 0xe18   :  { %v1832_v62 = vadd.f32 %v1831_v60, %v1325_v9  ;;  %v1875_v63 = vadd.f32 %v1874_v61, %v1333_v46  ;;  %8236 = vmatpush3.bf16.msra.mxu1 %v8971_v28  ;;  %8258 = vmatpush3.bf16.msra.mxu0 %v8972_v36  ;;  %v2054_v13 = vmax.f32 %v1828_v56, 0.0  ;;  %v2056_v16 = vmax.f32 %v1871_v57, 0.0  ;;  %v8987_v46 = vld [vmem:[%s11426_s11 + $0x130] sm:$0xff]   ;;  %v8991_v61 = vld [vmem:[%s11426_s11 + $0x138] sm:$0xff]  }
 0xe19   :  { %v2069_v5 = vmax.f32 %v1830_v31, 0.0  ;;  %v2071_v6 = vmax.f32 %v1873_v40, 0.0  ;;  %8237 = vmatprep.subr.bf16.mxu1 %v8973_v21  ;;  %8259 = vmatprep.subr.bf16.mxu0 %v8974_v55  ;;  %v1341_v47 = vrot.slane %v10115_v32, %v9471_v17 }
 0xe1a   :  { %v2070_v20 = vmax.f32 %v1832_v62, 0.0  ;;  %v2072_v22 = vmax.f32 %v1875_v63, 0.0  ;;  %v8992_v62 = vld [vmem:[%s11426_s11 + $0x1b8] sm:$0xff]  }
 0xe1b   :  { %v10096_v24 = vpack.c.bf16 %v2069_v5, %v2053_v3  ;;  %v10098_v26 = vpack.c.bf16 %v2071_v6, %v2055_v4  ;;  %v8993_v4 = vld [vmem:[%s11426_s11 + $0x240] sm:$0xff]  }
 0xe1c   :  { %v2086_v27 = vpack.c.bf16 %v2070_v20, %v2054_v13  ;;  %v2088_v29 = vpack.c.bf16 %v2072_v22, %v2056_v16  ;;  %8238 = vmatpush3.bf16.msra.mxu1 %v8975_v0  ;;  %8260 = vmatpush3.bf16.msra.mxu0 %v8976_v2  ;;  %v8994_v5 = vld [vmem:[%s11426_s11 + $0x2c0] sm:$0xff]  }
 0xe1d   :  { %8239 = vmatprep.subr.bf16.mxu1 %v8977_v7  ;;  %8261 = vmatprep.subr.bf16.mxu0 %v8978_v11 }
 0xe1e   :  { %3242 = vmatprep.mubr.bf16.mxu1 %v2086_v27  ;;  %3283 = vmatprep.mubr.bf16.mxu0 %v2088_v29  ;;  %v8995_v29 = vld [vmem:[%s11426_s11 + $0x200] sm:$0xff]  }
 0xe20   :  { %8240 = vmatpush3.bf16.msra.mxu1 %v8979_v19  ;;  %8262 = vmatpush3.bf16.msra.mxu0 %v8980_v23  ;;  %v8996_v19 = vld [vmem:[%s11426_s11 + $0x280] sm:$0xff]   ;;  %v8997_v23 = vld [vmem:[%s11426_s11 + $0x248] sm:$0xff]  }
 0xe21   :  { %8241 = vmatprep.subr.bf16.mxu1 %v8981_v30  ;;  %8263 = vmatprep.subr.bf16.mxu0 %v8982_v52  ;;  %v8998_v30 = vld [vmem:[%s11426_s11 + $0x2c8] sm:$0xff]  }
 0xe22   :  { %v8999_v52 = vld [vmem:[%s11426_s11 + $0x208] sm:$0xff]  }
 0xe24   :  { %v1911_v49 = vpop.f32.mrb[48].mxu1  ;;  %v1954_v9 = vpop.f32.mrb[40].mxu0  ;;  %8242 = vmatpush3.bf16.msra.mxu1 %v8983_v33  ;;  %8264 = vmatpush3.bf16.msra.mxu0 %v8984_v34  ;;  %v1353_v33 = vrot.slane %v10115_v32, %v10045_v37  ;;  %v1361_v34 = vrot.slane %v10115_v32, %v10048_v38 }
 0xe25   :  { %v1912_v25 = vadd.f32 %v1911_v49, %v1337_v35  ;;  %v1955_v28 = vadd.f32 %v1954_v9, %v1345_v43  ;;  %v1913_v36 = vpop.f32.mrb[49].mxu1  ;;  %v1956_v39 = vpop.f32.mrb[41].mxu0  ;;  %8243 = vmatprep.subr.bf16.mxu1 %v8985_v44  ;;  %8265 = vmatprep.subr.bf16.mxu0 %v8986_v45  ;;  %v9002_v44 = vld [vmem:[%s11426_s11 + $0x2d0] sm:$0xff]  }
 0xe26   :  { %v1914_v54 = vadd.f32 %v1913_v36, %v1341_v47  ;;  %v1957_v21 = vadd.f32 %v1956_v39, %v1349_v14  ;;  %v1915_v55 = vpop.f32.mrb[50].mxu1  ;;  %v1958_v56 = vpop.f32.mrb[42].mxu0 }
 0xe27   :  { %v1916_v57 = vadd.f32 %v1915_v55, %v1337_v35  ;;  %v1959_v58 = vadd.f32 %v1958_v56, %v1345_v43  ;;  %v1917_v59 = vpop.f32.mrb[51].mxu1  ;;  %v1960_v31 = vpop.f32.mrb[43].mxu0  ;;  %v2057_v63 = vmax.f32 %v1912_v25, 0.0  ;;  %v2059_v0 = vmax.f32 %v1955_v28, 0.0  ;;  %v9005_v25 = vld [vmem:[%s11426_s11 + $0x258] sm:$0xff]  }
 0xe28   :  { %v1918_v40 = vadd.f32 %v1917_v59, %v1341_v47  ;;  %v1961_v60 = vadd.f32 %v1960_v31, %v1349_v14  ;;  %8244 = vmatpush3.bf16.msra.mxu1 %v8987_v46  ;;  %8266 = vmatpush3.bf16.msra.mxu0 %v8988_v10  ;;  %v2058_v6 = vmax.f32 %v1914_v54, 0.0  ;;  %v2060_v7 = vmax.f32 %v1957_v21, 0.0  ;;  %v9003_v14 = vld [vmem:[%s11426_s11 + $0x210] sm:$0xff]   ;;  %v9007_v59 = vld [vmem:[%s11426_s11 + $0x218] sm:$0xff]  }
 0xe29   :  { %v2073_v2 = vmax.f32 %v1916_v57, 0.0  ;;  %v2075_v3 = vmax.f32 %v1959_v58, 0.0  ;;  %8245 = vmatprep.subr.bf16.mxu1 %v8989_v51  ;;  %8267 = vmatprep.subr.bf16.mxu0 %v8990_v8  ;;  %v1357_v35 = vrot.slane %v10115_v32, %v10051_v41  ;;  %v1365_v43 = vrot.slane %v10115_v32, %v10054_v42  ;;  %v9004_v32 = vld [vmem:[%s11426_s11 + $0x290] sm:$0xff]   ;;  %v9006_v8 = vld [vmem:[%s11426_s11 + $0x2d8] sm:$0xff]  }
 0xe2a   :  { %v2074_v11 = vmax.f32 %v1918_v40, 0.0  ;;  %v2076_v13 = vmax.f32 %v1961_v60, 0.0 }
 0xe2b   :  { %v10161_v16 = vpack.c.bf16 %v2073_v2, %v2057_v63  ;;  %v10163_v20 = vpack.c.bf16 %v2075_v3, %v2059_v0  ;;  %v9009_v63 = vld [vmem:[%s11426_s11 + $0x260] sm:$0xff]  }
 0xe2c   :  { %v2090_v22 = vpack.c.bf16 %v2074_v11, %v2058_v6  ;;  %v2092_v27 = vpack.c.bf16 %v2076_v13, %v2060_v7  ;;  %8246 = vmatpush3.bf16.msra.mxu1 %v8991_v61  ;;  %8268 = vmatpush3.bf16.msra.mxu0 %v8992_v62  ;;  %v9008_v62 = vld [vmem:[%s11426_s11 + $0x298] sm:$0xff]  }
 0xe2d   :  { %8275 = vmatprep.subr.bf16.mxu1 %v8993_v4  ;;  %8297 = vmatprep.subr.bf16.mxu0 %v8994_v5  ;;  %v9010_v5 = vld [vmem:[%s11426_s11 + $0x2e0] sm:$0xff]  }
 0xe2f   :  { %3243 = vmatmul.mubr.bf16.vlgmr.msra.gmra.mrb[60].mxu1 %v10096_v24  ;;  %3284 = vmatmul.mubr.bf16.vlgmr.msra.gmra.mrb[52].mxu0 %v10098_v26  ;;  %v9000_v24 = vld [vmem:[%s11426_s11 + $0x288] sm:$0xff]   ;;  %v9001_v26 = vld [vmem:[%s11426_s11 + $0x250] sm:$0xff]  }
 0xe30   :  { %8276 = vmatpush3.bf16.msra.mxu1 %v8995_v29  ;;  %3324 = vmatprep.mubr.bf16.mxu1 %v2090_v22  ;;  %v9011_v22 = vld [vmem:[%s11426_s11 + $0x220] sm:$0xff]   ;;  %v9013_v29 = vld [vmem:[%s11426_s11 + $0x268] sm:$0xff]  }
 0xe31   :  { %8298 = vmatpush3.bf16.msra.mxu0 %v8996_v19  ;;  %3365 = vmatprep.mubr.bf16.mxu0 %v2092_v27  ;;  %v9012_v27 = vld [vmem:[%s11426_s11 + $0x2a0] sm:$0xff]   ;;  %v9014_v19 = vld [vmem:[%s11426_s11 + $0x2e8] sm:$0xff]  }
 0xe32   :  { %8277 = vmatprep.subr.bf16.mxu1 %v8997_v23  ;;  %8299 = vmatprep.subr.bf16.mxu0 %v8998_v30  ;;  %v9015_v23 = vld [vmem:[%s11426_s11 + $0x228] sm:$0xff]  }
 0xe33   :  { %v9016_v30 = vld [vmem:[%s11426_s11 + $0x2a8] sm:$0xff]  }
 0xe34   :  { %v1997_v45 = vpop.f32.mrb[52].mxu1  ;;  %v2040_v47 = vpop.f32.mrb[44].mxu0  ;;  %8278 = vmatpush3.bf16.msra.mxu1 %v8999_v52  ;;  %v9017_v52 = vld [vmem:[%s11426_s11 + $0x270] sm:$0xff]  }
 0xe35   :  { %v1998_v49 = vadd.f32 %v1997_v45, %v1353_v33  ;;  %v2041_v9 = vadd.f32 %v2040_v47, %v1361_v34  ;;  %8300 = vmatpush3.bf16.msra.mxu0 %v9000_v24  ;;  %v1999_v46 = vpop.f32.mrb[53].mxu1  ;;  %v2042_v10 = vpop.f32.mrb[45].mxu0  ;;  %8279 = vmatprep.subr.bf16.mxu1 %v9001_v26  ;;  %v9020_v24 = vld [vmem:[%s11426_s11 + $0x2b0] sm:$0xff]   ;;  %v9021_v26 = vld [vmem:[%s11426_s11 + $0x278] sm:$0xff]   ;;  %v9025_v45 = vld [vmem:[%s11426_s11 + $0x340] sm:$0xff]  }
 0xe36   :  { %v2000_v28 = vadd.f32 %v1999_v46, %v1357_v35  ;;  %v2043_v36 = vadd.f32 %v2042_v10, %v1365_v43  ;;  %v2001_v39 = vpop.f32.mrb[54].mxu1  ;;  %v2044_v51 = vpop.f32.mrb[46].mxu0  ;;  %8301 = vmatprep.subr.bf16.mxu0 %v9002_v44  ;;  %v9024_v44 = vld [vmem:[%s11426_s11 + $0x2b8] sm:$0xff]   ;;  %v9026_v47 = vld [vmem:[%s11426_s11 + $0x3c0] sm:$0xff]   ;;  %v9030_v46 = vld [vmem:[%s11426_s11 + $0x3c8] sm:$0xff]  }
 0xe37   :  { %v2002_v54 = vadd.f32 %v2001_v39, %v1353_v33  ;;  %v2045_v21 = vadd.f32 %v2044_v51, %v1361_v34  ;;  %v2003_v55 = vpop.f32.mrb[55].mxu1  ;;  %v2046_v56 = vpop.f32.mrb[47].mxu0  ;;  %v2061_v31 = vmax.f32 %v1998_v49, 0.0  ;;  %v2063_v40 = vmax.f32 %v2041_v9, 0.0  ;;  %v9018_v33 = vld [vmem:[%s11426_s11 + $0x2f0] sm:$0xff]   ;;  %v9028_v49 = vld [vmem:[%s11426_s11 + $0x380] sm:$0xff]  }
 0xe38   :  { %v2004_v57 = vadd.f32 %v2003_v55, %v1357_v35  ;;  %v2047_v58 = vadd.f32 %v2046_v56, %v1365_v43  ;;  %8280 = vmatpush3.bf16.msra.mxu1 %v9003_v14  ;;  %v2062_v0 = vmax.f32 %v2000_v28, 0.0  ;;  %v2064_v2 = vmax.f32 %v2043_v36, 0.0  ;;  %v9019_v34 = vld [vmem:[%s11426_s11 + $0x230] sm:$0xff]   ;;  %v9022_v35 = vld [vmem:[%s11426_s11 + $0x2f8] sm:$0xff]   ;;  %v9027_v14 = vld [vmem:[%s11426_s11 + $0x300] sm:$0xff]  }
 0xe39   :  { %v2077_v60 = vmax.f32 %v2002_v54, 0.0  ;;  %v2079_v61 = vmax.f32 %v2045_v21, 0.0  ;;  %8302 = vmatpush3.bf16.msra.mxu0 %v9004_v32  ;;  %8281 = vmatprep.subr.bf16.mxu1 %v9005_v25  ;;  %v9023_v43 = vld [vmem:[%s11426_s11 + $0x238] sm:$0xff]   ;;  %v9029_v9 = vld [vmem:[%s11426_s11 + $0x348] sm:$0xff]   ;;  %v9035_v25 = vld [vmem:[%s11426_s11 + $0x310] sm:$0xff]  }
 0xe3a   :  { %v2078_v3 = vmax.f32 %v2004_v57, 0.0  ;;  %v2080_v4 = vmax.f32 %v2047_v58, 0.0  ;;  %8303 = vmatprep.subr.bf16.mxu0 %v9006_v8  ;;  %v9031_v10 = vld [vmem:[%s11426_s11 + $0x308] sm:$0xff]   ;;  %v9036_v28 = vld [vmem:[%s11426_s11 + $0x390] sm:$0xff]   ;;  %v9037_v36 = vld [vmem:[%s11426_s11 + $0x358] sm:$0xff]  }
 0xe3b   :  { %v10223_v6 = vpack.c.bf16 %v2077_v60, %v2061_v31  ;;  %v10225_v7 = vpack.c.bf16 %v2079_v61, %v2063_v40  ;;  %v9032_v32 = vld [vmem:[%s11426_s11 + $0x388] sm:$0xff]   ;;  %v9038_v39 = vld [vmem:[%s11426_s11 + $0x3d8] sm:$0xff]   ;;  %v9041_v54 = vld [vmem:[%s11426_s11 + $0x360] sm:$0xff]  }
 0xe3c   :  { %v2094_v11 = vpack.c.bf16 %v2078_v3, %v2062_v0  ;;  %v2096_v13 = vpack.c.bf16 %v2080_v4, %v2064_v2  ;;  %8282 = vmatpush3.bf16.msra.mxu1 %v9007_v59  ;;  %v9039_v51 = vld [vmem:[%s11426_s11 + $0x318] sm:$0xff]   ;;  %v9042_v21 = vld [vmem:[%s11426_s11 + $0x3e0] sm:$0xff]   ;;  %v9045_v57 = vld [vmem:[%s11426_s11 + $0x368] sm:$0xff]  }
 0xe3d   :  { %8304 = vmatpush3.bf16.msra.mxu0 %v9008_v62  ;;  %8283 = vmatprep.subr.bf16.mxu1 %v9009_v63  ;;  %v9040_v8 = vld [vmem:[%s11426_s11 + $0x398] sm:$0xff]   ;;  %v9043_v55 = vld [vmem:[%s11426_s11 + $0x320] sm:$0xff]   ;;  %v9046_v58 = vld [vmem:[%s11426_s11 + $0x3e8] sm:$0xff]  }
 0xe3e   :  { %8305 = vmatprep.subr.bf16.mxu0 %v9010_v5  ;;  %v9044_v56 = vld [vmem:[%s11426_s11 + $0x3a0] sm:$0xff]   ;;  %v9047_v59 = vld [vmem:[%s11426_s11 + $0x328] sm:$0xff]   ;;  %v9049_v40 = vld [vmem:[%s11426_s11 + $0x370] sm:$0xff]  }
 0xe3f   :  { %v9048_v31 = vld [vmem:[%s11426_s11 + $0x3a8] sm:$0xff]   ;;  %v9050_v60 = vld [vmem:[%s11426_s11 + $0x3f0] sm:$0xff]   ;;  %v9053_v63 = vld [vmem:[%s11426_s11 + $0x378] sm:$0xff]  }
 0xe40   :  { %8284 = vmatpush3.bf16.msra.mxu1 %v9011_v22  ;;  %v9051_v61 = vld [vmem:[%s11426_s11 + $0x330] sm:$0xff]   ;;  %v9054_v0 = vld [vmem:[%s11426_s11 + $0x3f8] sm:$0xff]  }
 0xe41   :  { %8306 = vmatpush3.bf16.msra.mxu0 %v9012_v27  ;;  %8285 = vmatprep.subr.bf16.mxu1 %v9013_v29  ;;  %v9052_v62 = vld [vmem:[%s11426_s11 + $0x3b0] sm:$0xff]   ;;  %v9055_v2 = vld [vmem:[%s11426_s11 + $0x338] sm:$0xff]  }
 0xe42   :  { %8307 = vmatprep.subr.bf16.mxu0 %v9014_v19  ;;  %v9056_v3 = vld [vmem:[%s11426_s11 + $0x3b8] sm:$0xff]  }
 0xe44   :  { %8286 = vmatpush3.bf16.msra.mxu1 %v9015_v23 }
 0xe45   :  { %8308 = vmatpush3.bf16.msra.mxu0 %v9016_v30  ;;  %8287 = vmatprep.subr.bf16.mxu1 %v9017_v52 }
 0xe46   :  { %8309 = vmatprep.subr.bf16.mxu0 %v9018_v33 }
 0xe48   :  { %8288 = vmatpush3.bf16.msra.mxu1 %v9019_v34 }
 0xe49   :  { %8310 = vmatpush3.bf16.msra.mxu0 %v9020_v24  ;;  %8289 = vmatprep.subr.bf16.mxu1 %v9021_v26 }
 0xe4a   :  { %8311 = vmatprep.subr.bf16.mxu0 %v9022_v35 }
 0xe4c   :  { %8290 = vmatpush3.bf16.msra.mxu1 %v9023_v43 }
 0xe4d   :  { %8312 = vmatpush3.bf16.msra.mxu0 %v9024_v44  ;;  %8319 = vmatprep.subr.bf16.mxu1 %v9025_v45 }
 0xe4e   :  { %8341 = vmatprep.subr.bf16.mxu0 %v9026_v47 }
 0xe4f   :  { %3325 = vmatmul.mubr.bf16.vlgmr.msra.gmra.mrb[64].mxu1 %v10161_v16  ;;  %v9033_v16 = vld [vmem:[%s11426_s11 + $0x350] sm:$0xff]  }
 0xe50   :  { %3366 = vmatmul.mubr.bf16.vlgmr.msra.gmra.mrb[56].mxu0 %v10163_v20  ;;  %8320 = vmatpush3.bf16.msra.mxu1 %v9027_v14  ;;  %v9034_v20 = vld [vmem:[%s11426_s11 + $0x3d0] sm:$0xff]  }
 0xe51   :  { %3406 = vmatprep.mubr.bf16.mxu1 %v2094_v11  ;;  %8342 = vmatpush3.bf16.msra.mxu0 %v9028_v49  ;;  %v7413_v11 = vld [vmem:[%s11430_s12] ss:$0 sm:$0xff] }
 0xe52   :  { %3447 = vmatprep.mubr.bf16.mxu0 %v2096_v13  ;;  %8321 = vmatprep.subr.bf16.mxu1 %v9029_v9 }
 0xe53   :  { %8343 = vmatprep.subr.bf16.mxu0 %v9030_v46 }
 0xe54   :  { %8322 = vmatpush3.bf16.msra.mxu1 %v9031_v10 }
 0xe55   :  { %8344 = vmatpush3.bf16.msra.mxu0 %v9032_v32  ;;  %8323 = vmatprep.subr.bf16.mxu1 %v9033_v16 }
 0xe56   :  { %8345 = vmatprep.subr.bf16.mxu0 %v9034_v20 }
 0xe58   :  { %8324 = vmatpush3.bf16.msra.mxu1 %v9035_v25 }
 0xe59   :  { %8346 = vmatpush3.bf16.msra.mxu0 %v9036_v28  ;;  %8325 = vmatprep.subr.bf16.mxu1 %v9037_v36 }
 0xe5a   :  { %8347 = vmatprep.subr.bf16.mxu0 %v9038_v39 }
 0xe5c   :  { %8326 = vmatpush3.bf16.msra.mxu1 %v9039_v51 }
 0xe5d   :  { %8348 = vmatpush3.bf16.msra.mxu0 %v9040_v8  ;;  %8327 = vmatprep.subr.bf16.mxu1 %v9041_v54 }
 0xe5e   :  { %8349 = vmatprep.subr.bf16.mxu0 %v9042_v21 }
 0xe60   :  { %8328 = vmatpush3.bf16.msra.mxu1 %v9043_v55 }
 0xe61   :  { %8350 = vmatpush3.bf16.msra.mxu0 %v9044_v56  ;;  %8329 = vmatprep.subr.bf16.mxu1 %v9045_v57 }
 0xe62   :  { %8351 = vmatprep.subr.bf16.mxu0 %v9046_v58 }
 0xe64   :  { %8330 = vmatpush3.bf16.msra.mxu1 %v9047_v59 }
 0xe65   :  { %8352 = vmatpush3.bf16.msra.mxu0 %v9048_v31  ;;  %8331 = vmatprep.subr.bf16.mxu1 %v9049_v40 }
 0xe66   :  { %8353 = vmatprep.subr.bf16.mxu0 %v9050_v60 }
 0xe68   :  { %8332 = vmatpush3.bf16.msra.mxu1 %v9051_v61 }
 0xe69   :  { %8354 = vmatpush3.bf16.msra.mxu0 %v9052_v62  ;;  %8333 = vmatprep.subr.bf16.mxu1 %v9053_v63 }
 0xe6a   :  { %8355 = vmatprep.subr.bf16.mxu0 %v9054_v0 }
 0xe6c   :  { %8334 = vmatpush3.bf16.msra.mxu1 %v9055_v2 }
 0xe6d   :  { %8356 = vmatpush3.bf16.msra.mxu0 %v9056_v3 }
 0xe6e   :  { %8708 = vmatprep.subr.bf16.mxu0 %v9302_v12 }
 0xe6f   :  { %3407 = vmatmul.mubr.bf16.vlgmr.msra.gmra.mrb[68].mxu1 %v10223_v6 }
 0xe70   :  { %3448 = vmatmul.mubr.bf16.vlgmr.msra.gmra.mrb[60].mxu0 %v10225_v7  ;;  %3600 = vmatprep.mubr.bf16.mxu1 %v9301_v1 }
 0xe71   :  { %8710 = vmatprep.mubr.msk.bf16.mxu0 %vm9303_vm1, %v9302_v12 }
 0xee2   :  { %v8203_v4 = vpop.f32.mrb[56].mxu1  ;;  %v8225_v5 = vpop.f32.mrb[48].mxu0 }
 0xee3   :  { %v8204_v13 = vpop.f32.mrb[57].mxu1  ;;  %v8226_v22 = vpop.f32.mrb[49].mxu0 }
 0xee4   :  { %v8205_v27 = vadd.f32 %v8204_v13, %v8203_v4  ;;  %v8227_v29 = vadd.f32 %v8226_v22, %v8225_v5  ;;  %v8206_v19 = vpop.f32.mrb[58].mxu1  ;;  %v8228_v23 = vpop.f32.mrb[50].mxu0 }
 0xee5   :  { %v8207_v6 = vpop.f32.mrb[59].mxu1  ;;  %v8229_v30 = vpop.f32.mrb[51].mxu0 }
 0xee6   :  { %v3163_v7 = vadd.f32 %v8205_v27, %v7413_v11  ;;  %v8208_v52 = vadd.f32 %v8207_v6, %v8206_v19  ;;  %v8230_v33 = vadd.f32 %v8229_v30, %v8228_v23 }
 0xee8   :  { %v3204_v34 = vadd.f32 %v8227_v29, %v3163_v7  ;;  %v3166_v24 = vadd.f32 %v8208_v52, %v7413_v11 }
 0xeea   :  { %v3207_v26 = vadd.f32 %v8230_v33, %v3166_v24 }
 0xf02   :  { %v8247_v35 = vpop.f32.mrb[60].mxu1  ;;  %v8269_v43 = vpop.f32.mrb[52].mxu0 }
 0xf03   :  { %v8248_v44 = vpop.f32.mrb[61].mxu1  ;;  %v8270_v45 = vpop.f32.mrb[53].mxu0 }
 0xf04   :  { %v8249_v47 = vadd.f32 %v8248_v44, %v8247_v35  ;;  %v8271_v14 = vadd.f32 %v8270_v45, %v8269_v43  ;;  %v8250_v49 = vpop.f32.mrb[62].mxu1  ;;  %v8272_v9 = vpop.f32.mrb[54].mxu0 }
 0xf05   :  { %v8251_v46 = vpop.f32.mrb[63].mxu1  ;;  %v8273_v10 = vpop.f32.mrb[55].mxu0 }
 0xf06   :  { %v3245_v32 = vadd.f32 %v8249_v47, %v3204_v34  ;;  %v8252_v16 = vadd.f32 %v8251_v46, %v8250_v49  ;;  %v8274_v20 = vadd.f32 %v8273_v10, %v8272_v9  ;;  %v9057_v10 = vld [vmem:[%s11468_s26 + $0x40] ss:$8 sps:$4 sm:$0xff]  }
 0xf08   :  { %v3286_v25 = vadd.f32 %v8271_v14, %v3245_v32  ;;  %v3248_v28 = vadd.f32 %v8252_v16, %v3207_v26  ;;  %v9062_v32 = vld [vmem:[%s11468_s26 + $0x54] ss:$8 sps:$4 sm:$0xff]   ;;  %v9060_v16 = vld [vmem:[%s11468_s26 + $0x50] ss:$8 sps:$4 sm:$0xff]  }
 0xf0a   :  { %v3289_v36 = vadd.f32 %v8274_v20, %v3248_v28  ;;  %v9065_v20 = vld [vmem:[%s11468_s26 + $0x64] ss:$8 sps:$4 sm:$0xff]   ;;  %v9068_v28 = vld [vmem:[%s11468_s26 + $0x74] ss:$8 sps:$4 sm:$0xff]  }
 0xf22   :  { %v8291_v39 = vpop.f32.mrb[64].mxu1 }
 0xf23   :  { %v8313_v51 = vpop.f32.mrb[56].mxu0  ;;  %v8292_v8 = vpop.f32.mrb[65].mxu1 }
 0xf24   :  { %v8293_v54 = vadd.f32 %v8292_v8, %v8291_v39  ;;  %v8314_v21 = vpop.f32.mrb[57].mxu0  ;;  %v8294_v55 = vpop.f32.mrb[66].mxu1 }
 0xf25   :  { %v8315_v56 = vadd.f32 %v8314_v21, %v8313_v51  ;;  %v8316_v57 = vpop.f32.mrb[58].mxu0  ;;  %v8295_v58 = vpop.f32.mrb[67].mxu1 }
 0xf26   :  { %v3327_v59 = vadd.f32 %v8293_v54, %v3286_v25  ;;  %v8296_v31 = vadd.f32 %v8295_v58, %v8294_v55  ;;  %v8317_v40 = vpop.f32.mrb[59].mxu0  ;;  %v9063_v25 = vld [vmem:[%s11468_s26 + $0x60] ss:$8 sps:$4 sm:$0xff]  }
 0xf27   :  { %v8318_v60 = vadd.f32 %v8317_v40, %v8316_v57  ;;  %v7542_v57 = vld [vmem:[%s11431_s13] ss:$0 sm:$0xff] }
 0xf28   :  { %v3368_v61 = vadd.f32 %v8315_v56, %v3327_v59  ;;  %v3330_v62 = vadd.f32 %v8296_v31, %v3289_v36  ;;  %v9066_v36 = vld [vmem:[%s11468_s26 + $0x70] ss:$8 sps:$4 sm:$0xff]  }
 0xf2a   :  { %v3371_v63 = vadd.f32 %v8318_v60, %v3330_v62  ;;  %v7543_v60 = vld [vmem:[%s11432_s14] ss:$0 sm:$0xff] }
 0xf42   :  { %v8335_v0 = vpop.f32.mrb[68].mxu1 }
 0xf43   :  { %v8357_v2 = vpop.f32.mrb[60].mxu0  ;;  %v8336_v3 = vpop.f32.mrb[69].mxu1 }
 0xf44   :  { %v8337_v4 = vadd.f32 %v8336_v3, %v8335_v0  ;;  %v8358_v5 = vpop.f32.mrb[61].mxu0  ;;  %v8338_v11 = vpop.f32.mrb[70].mxu1 }
 0xf45   :  { %v8359_v13 = vadd.f32 %v8358_v5, %v8357_v2  ;;  %v8360_v22 = vpop.f32.mrb[62].mxu0  ;;  %v8339_v27 = vpop.f32.mrb[71].mxu1  ;;  %v7552_v2 = vld [vmem:[%s11470_s9 + $0x2] sm:$0x3]  ;;  %s11475_s9 = smov 48  }
 0xf46   :  { %v3409_v29 = vadd.f32 %v8337_v4, %v3368_v61  ;;  %v8340_v19 = vadd.f32 %v8339_v27, %v8338_v11  ;;  %v8361_v23 = vpop.f32.mrb[63].mxu0  ;;  %v3518_v3 = vrot.slane %v7552_v2, %v9465_v15 }
 0xf47   :  { %v8362_v6 = vadd.f32 %v8361_v23, %v8360_v22  ;;  %v3522_v23 = vrot.slane %v7552_v2, %v9471_v17 }
 0xf48   :  { %v3450_v30 = vadd.f32 %v8359_v13, %v3409_v29  ;;  %v3412_v7 = vadd.f32 %v8340_v19, %v3371_v63 }
 0xf4a   :  { %v3453_v52 = vadd.f32 %v8362_v6, %v3412_v7  ;;  %v3456_v33 = vadd.f32 %v3450_v30, %v9767_v50 }
 0xf4c   :  { %v3460_v34 = vsel %vm134_vm0, %v3456_v33, 0.0  ;;  %v3457_v24 = vadd.f32 %v3453_v52, %v9769_v48  ;;  %v9059_v48 = vld [vmem:[%s11468_s26 + $0x44] ss:$8 sps:$4 sm:$0xff]  }
 0xf4d   :  { %3461 = vadd.xlane.f32.xlu1 %v3460_v34  ;;  %3568 = vmatprep.subr.bf16.mxu1 %v9059_v48 }
 0xf4e   :  { %v3463_v26 = vsel %vm134_vm0, %v3457_v24, 0.0  ;;  %3569 = vmatpush1.bf16.msra.mxu1 %v9057_v10 }
 0xf4f   :  { %3464 = vadd.xlane.f32.xlu0 %v3463_v26  ;;  %3570 = vmatprep.subr.bf16.mxu1 %v9062_v32 }
 0xf52   :  { %3571 = vmatpush1.bf16.msra.mxu1 %v9060_v16 }
 0xf53   :  { %3572 = vmatprep.subr.bf16.mxu1 %v9065_v20 }
 0xf56   :  { %3573 = vmatpush1.bf16.msra.mxu1 %v9063_v25 }
 0xf57   :  { %3574 = vmatprep.subr.bf16.mxu1 %v9068_v28 }
 0xf5a   :  { %3575 = vmatpush1.bf16.msra.mxu1 %v9066_v36 }
 0xf5b   :  { %8714 = vmatprep.subr.bf16.mxu1 %v9302_v12 }
 0xfda   :  { %v3462_v35 = vpop.xlane.xlu1 %3461 }
 0xfdb   :  { %v3466_v43 = vmul.f32 0.015625, %v3462_v35 }
 0xfdc   :  { %v3465_v44 = vpop.xlane.xlu0 %3464 }
 0xfdd   :  { %v3468_v45 = vsub.f32 %v3456_v33, %v3466_v43  ;;  %v3467_v47 = vmul.f32 0.015625, %v3465_v44 }
 0xfdf   :  { %v3469_v14 = vsub.f32 %v3457_v24, %v3467_v47  ;;  %v3470_v49 = vmul.f32 %v3468_v45, %v3468_v45 }
 0xfe1   :  { %v3472_v9 = vsel %vm134_vm0, %v3470_v49, 0.0  ;;  %v3471_v46 = vmul.f32 %v3469_v14, %v3469_v14 }
 0xfe2   :  { %3473 = vadd.xlane.f32.xlu1 %v3472_v9 }
 0xfe3   :  { %v3475_v50 = vsel %vm134_vm0, %v3471_v46, 0.0 }
 0xfe4   :  { %3476 = vadd.xlane.f32.xlu0 %v3475_v50 }
0x106f   :  { %v3474_v39 = vpop.xlane.xlu1 %3473 }
0x1070   :  { %v3478_v51 = vmul.f32 0.015625, %v3474_v39 }
0x1071   :  { %v3477_v8 = vpop.xlane.xlu0 %3476 }
0x1072   :  { %v3480_v54 = vadd.f32 1e-05, %v3478_v51  ;;  %v3479_v21 = vmul.f32 0.015625, %v3477_v8 }
0x1074   :  { %9257 = vrsqrt.f32 %v3480_v54  ;;  %v3481_v55 = vadd.f32 1e-05, %v3479_v21 }
0x1076   :  { %9259 = vrsqrt.f32 %v3481_v55 }
0x107e   :  { %v9258_v56 = vpop.eup %9257 }
0x107f   :  { %v3484_v58 = vmul.f32 %v9258_v56, %v3468_v45 }
0x1080   :  { %v9260_v59 = vpop.eup %9259 }
0x1081   :  { %v3492_v31 = vmul.f32 %v7542_v57, %v3484_v58  ;;  %v3485_v40 = vmul.f32 %v9260_v59, %v3469_v14 }
0x1083   :  { %v3493_v61 = vmul.f32 %v7542_v57, %v3485_v40  ;;  %v10413_v62 = vadd.f32 %v7543_v60, %v3492_v31 }
0x1085   :  { %v10415_v63 = vadd.f32 %v7543_v60, %v3493_v61 }
0x1087   :  { %v3502_v0 = vpack.c.bf16 %v10415_v63, %v10413_v62 }
0x1089   :  { %7561 = vmatmul.mubr.msk.bf16.vlgmr.msra.gmra.mrb[72].mxu1 %vm134_vm0, %v3502_v0 }
0x108a   :  { %8716 = vmatprep.mubr.msk.bf16.mxu1 %vm9303_vm1, %v9302_v12 }
0x115c   :  { %v3602_v4 = vpop.f32.mrb[72].mxu1 }
0x115d   :  { %v3603_v5 = vadd.f32 %v3602_v4, %v3518_v3  ;;  %v3604_v11 = vpop.f32.mrb[73].mxu1 }
0x115e   :  { %v3606_v13 = vpop.f32.mrb[74].mxu1  ;;  %v3605_v30 = vadd.f32 %v3604_v11, %v3522_v23 }
0x115f   :  { %v10426_v22 = vpack.c.bf16 %v3603_v5, %v3603_v5  ;;  %v3607_v27 = vadd.f32 %v3606_v13, %v3518_v3  ;;  %v3608_v29 = vpop.f32.mrb[75].mxu1  ;;  %v3611_v33 = vmul.f32 0.25, %v3603_v5 }
0x1160   :  { %v3609_v34 = vadd.f32 %v3608_v29, %v3522_v23  ;;  %v10438_v26 = vpack.c.bf16 %v3605_v30, %v3605_v30 }
0x1161   :  { %v10428_v19 = vpack.c.bf16 %v3607_v27, %v3607_v27  ;;  %3620 = vrot.lane.b32.xlu1 %v10426_v22, %s11474_s27  ;;  %v3612_v35 = vmul.f32 0.25, %v3607_v27  ;;  %v10441_v43 = vpack.c.bf16 %v3611_v33, %v3611_v33 }
0x1162   :  { %v10443_v44 = vpack.c.bf16 %v3609_v34, %v3609_v34  ;;  %v3745_v47 = vsel %vm316_vm2, %v10438_v26, 0 }
0x1163   :  { %3669 = vrot.lane.b32.xlu0 %v10428_v19, %s11474_s27  ;;  %v10445_v45 = vpack.c.bf16 %v3612_v35, %v3612_v35 }
0x1164   :  { %v3791_v14 = vsel %vm316_vm2, %v10443_v44, 0 }
0x11d3   :  { %v3621_v6 = vpop.permute.xlu1 %3620 }
0x11d4   :  { %v3626_v7 = vsel %vm192_vm3, %v3621_v6, 0 }
0x11d5   :  { %v3670_v52 = vpop.permute.xlu0 %3669  ;;  %8709 = vmatpush3.bf16.xpose.msra.mxu0 %v3626_v7 }
0x11d6   :  { %v3675_v24 = vsel %vm192_vm3, %v3670_v52, 0  ;;  %8720 = vmatprep.subr.bf16.mxu0 %v9302_v12 }
0x11d7   :  { %8715 = vmatpush3.bf16.xpose.msra.mxu1 %v3675_v24 }
0x11d8   :  { %8726 = vmatprep.subr.bf16.mxu1 %v9302_v12 }
0x11dc   :  { %8711 = vmatmul.mubr.msk.bf16.vlgmr.msra.gmra.mrb[64].mxu0 %vm192_vm3, %v10441_v43 }
0x11dd   :  { %8721 = vmatpush3.bf16.msra.mxu0 %v3745_v47  ;;  %8722 = vmatprep.mubr.msk.bf16.mxu0 %vm9303_vm1, %v9302_v12 }
0x11de   :  { %8717 = vmatmul.mubr.msk.bf16.vlgmr.msra.gmra.mrb[76].mxu1 %vm192_vm3, %v10445_v45  ;;  %8732 = vmatprep.subr.bf16.mxu0 %v9302_v12 }
0x11df   :  { %8727 = vmatpush3.bf16.msra.mxu1 %v3791_v14  ;;  %8728 = vmatprep.mubr.msk.bf16.mxu1 %vm9303_vm1, %v9302_v12 }
0x11e0   :  { %8738 = vmatprep.subr.bf16.mxu1 %v9302_v12 }
0x12af   :  { %v3662_v49 = vpop.f32.mrb[64].mxu0 }
0x12b0   :  { %v8712_v9 = vpop.f32.mrb[65].mxu0  ;;  %v3717_v46 = vsel %vm288_vm4, %v3662_v49, -inf }
0x12b1   :  { %v3711_v50 = vpop.f32.mrb[76].mxu1  ;;  %3718 = vmax.xlane.f32.xlu1 %v3717_v46  ;;  %v3665_v48 = vpop.f32.mrb[66].mxu0 }
0x12b2   :  { %v8713_v10 = vpop.f32.mrb[67].mxu0  ;;  %v8718_v32 = vpop.f32.mrb[77].mxu1  ;;  %v3720_v16 = vsel %vm288_vm4, %v3711_v50, -inf }
0x12b3   :  { %3721 = vmax.xlane.f32.xlu0 %v3720_v16  ;;  %v3714_v20 = vpop.f32.mrb[78].mxu1 }
0x12b4   :  { %v8719_v25 = vpop.f32.mrb[79].mxu1 }
0x12c2   :  { %3836 = vrot.lane.b32.xlu1 %v10426_v22, %s11475_s9 }
0x133e   :  { %v3719_v28 = vpop.xlane.xlu1 %3718 }
0x133f   :  { %v3723_v36 = vsub.f32 %v3662_v49, %v3719_v28 }
0x1340   :  { %v3722_v39 = vpop.xlane.xlu0 %3721 }
0x1341   :  { %v3725_v51 = vmul.f32 1.442695, %v3723_v36  ;;  %v3724_v8 = vsub.f32 %v3711_v50, %v3722_v39 }
0x1342   :  { %v3837_v58 = vpop.permute.xlu1 %3836 }
0x1343   :  { %9261 = vpow2.f32 %v3725_v51  ;;  %v3727_v54 = vmul.f32 1.442695, %v3724_v8  ;;  %v3842_v4 = vsel %vm192_vm3, %v3837_v58, 0 }
0x1345   :  { %9263 = vpow2.f32 %v3727_v54 }
0x134d   :  { %v9262_v21 = vpop.eup %9261 }
0x134e   :  { %v3729_v55 = vsel %vm288_vm4, %v9262_v21, 0.0 }
0x134f   :  { %v9264_v56 = vpop.eup %9263  ;;  %3730 = vadd.xlane.f32.xlu1 %v3729_v55 }
0x1350   :  { %v3732_v57 = vsel %vm288_vm4, %v9264_v56, 0.0 }
0x1351   :  { %3733 = vadd.xlane.f32.xlu0 %v3732_v57 }
0x1360   :  { %3834 = vrot.lane.b32.xlu1 %v10441_v43, %s11476_s0 }
0x1364   :  { %3885 = vrot.lane.b32.xlu1 %v10445_v45, %s11476_s0 }
0x1367   :  { %3887 = vrot.lane.b32.xlu0 %v10428_v19, %s11475_s9 }
0x13dc   :  { %v3731_v59 = vpop.xlane.xlu1 %3730 }
0x13dd   :  { %9265 = vrcp.f32 %v3731_v59 }
0x13de   :  { %v3734_v31 = vpop.xlane.xlu0 %3733 }
0x13df   :  { %9267 = vrcp.f32 %v3734_v31 }
0x13e0   :  { %v3835_v13 = vpop.permute.xlu1 %3834 }
0x13e2   :  { %v3888_v3 = vpop.permute.xlu0 %3887 }
0x13e3   :  { %v3893_v11 = vsel %vm192_vm3, %v3888_v3, 0 }
0x13e4   :  { %v3886_v27 = vpop.permute.xlu1 %3885 }
0x13e7   :  { %v9266_v40 = vpop.eup %9265 }
0x13e8   :  { %v3737_v60 = vmul.f32 %v9266_v40, %v9262_v21 }
0x13e9   :  { %v9268_v61 = vpop.eup %9267 }
0x13ea   :  { %v3738_v0 = vmul.f32 %v9268_v61, %v9264_v56  ;;  %v3739_v2 = vpack.c.bf16 %v3737_v60, %v3737_v60 }
0x13ec   :  { %8723 = vmatmul.mubr.msk.bf16.vlgmr.msra.gmra.mrb[68].mxu0 %vm288_vm4, %v3739_v2  ;;  %v3740_v5 = vpack.c.bf16 %v3738_v0, %v3738_v0 }
0x13ed   :  { %8733 = vmatpush3.bf16.xpose.msra.mxu0 %v3842_v4  ;;  %8734 = vmatprep.mubr.msk.bf16.mxu0 %vm9303_vm1, %v9302_v12 }
0x13ee   :  { %8729 = vmatmul.mubr.msk.bf16.vlgmr.msra.gmra.mrb[80].mxu1 %vm288_vm4, %v3740_v5  ;;  %8744 = vmatprep.subr.bf16.mxu0 %v9302_v12 }
0x13ef   :  { %8739 = vmatpush3.bf16.xpose.msra.mxu1 %v3893_v11  ;;  %8740 = vmatprep.mubr.msk.bf16.mxu1 %vm9303_vm1, %v9302_v12 }
0x13f0   :  { %8750 = vmatprep.subr.bf16.mxu1 %v9302_v12 }
0x13f4   :  { %8735 = vmatmul.mubr.msk.bf16.vlgmr.msra.gmra.mrb[72].mxu0 %vm192_vm3, %v3835_v13 }
0x13f5   :  { %8746 = vmatprep.mubr.msk.bf16.mxu0 %vm9303_vm1, %v9302_v12 }
0x13f6   :  { %8741 = vmatmul.mubr.msk.bf16.vlgmr.msra.gmra.mrb[84].mxu1 %vm192_vm3, %v3886_v27 }
0x13f7   :  { %8752 = vmatprep.mubr.msk.bf16.mxu1 %vm9303_vm1, %v9302_v12 }
0x14bf   :  { %v10489_v29 = vpop.f32.mrb[68].mxu0 }
0x14c0   :  { %v8724_v23 = vpop.f32.mrb[69].mxu0 }
0x14c1   :  { %v3784_v6 = vpop.f32.mrb[70].mxu0  ;;  %v10491_v30 = vpop.f32.mrb[80].mxu1 }
0x14c2   :  { %v8725_v7 = vpop.f32.mrb[71].mxu0  ;;  %v8730_v52 = vpop.f32.mrb[81].mxu1 }
0x14c3   :  { %v3830_v33 = vpop.f32.mrb[82].mxu1 }
0x14c4   :  { %v8731_v34 = vpop.f32.mrb[83].mxu1 }
0x14c7   :  { %v3878_v24 = vpop.f32.mrb[72].mxu0 }
0x14c8   :  { %v8736_v35 = vpop.f32.mrb[73].mxu0  ;;  %v3935_v47 = vsel %vm288_vm4, %v3878_v24, -inf }
0x14c9   :  { %v3929_v14 = vpop.f32.mrb[84].mxu1  ;;  %3936 = vmax.xlane.f32.xlu0 %v3935_v47  ;;  %v3881_v49 = vpop.f32.mrb[74].mxu0 }
0x14ca   :  { %v8737_v9 = vpop.f32.mrb[75].mxu0  ;;  %v8742_v46 = vpop.f32.mrb[85].mxu1  ;;  %v3938_v50 = vsel %vm288_vm4, %v3929_v14, -inf }
0x14cb   :  { %3939 = vmax.xlane.f32.xlu1 %v3938_v50  ;;  %v3932_v48 = vpop.f32.mrb[86].mxu1 }
0x14cc   :  { %v8743_v10 = vpop.f32.mrb[87].mxu1 }
0x14dc   :  { %3960 = vrot.lane.b32.xlu1 %v10438_v26, %s11476_s0 }
0x14e0   :  { %4059 = vrot.lane.b32.xlu1 %v10426_v22, %s11477_s24 }
0x14e4   :  { %4109 = vrot.lane.b32.xlu1 %v10428_v19, %s11477_s24 }
0x14e8   :  { %4107 = vrot.lane.b32.xlu1 %v10445_v45, %s11478_s3 }
0x1556   :  { %v3937_v32 = vpop.xlane.xlu0 %3936 }
0x1557   :  { %v3941_v16 = vsub.f32 %v3878_v24, %v3937_v32 }
0x1558   :  { %v3940_v20 = vpop.xlane.xlu1 %3939 }
0x1559   :  { %v3943_v25 = vmul.f32 1.442695, %v3941_v16  ;;  %v3942_v28 = vsub.f32 %v3929_v14, %v3940_v20 }
0x155b   :  { %9269 = vpow2.f32 %v3943_v25  ;;  %v3945_v36 = vmul.f32 1.442695, %v3942_v28 }
0x155c   :  { %v3961_v39 = vpop.permute.xlu1 %3960 }
0x155d   :  { %9271 = vpow2.f32 %v3945_v36  ;;  %v3966_v51 = vsel %vm316_vm2, %v3961_v39, 0 }
0x155e   :  { %8745 = vmatpush3.bf16.msra.mxu0 %v3966_v51 }
0x155f   :  { %8756 = vmatprep.subr.bf16.mxu0 %v9302_v12 }
0x1560   :  { %v4060_v40 = vpop.permute.xlu1 %4059 }
0x1561   :  { %v4065_v2 = vsel %vm192_vm3, %v4060_v40, 0 }
0x1564   :  { %v4110_v4 = vpop.permute.xlu1 %4109 }
0x1565   :  { %v9270_v8 = vpop.eup %9269  ;;  %v4115_v11 = vsel %vm192_vm3, %v4110_v4, 0 }
0x1566   :  { %v3947_v54 = vsel %vm288_vm4, %v9270_v8, 0.0 }
0x1567   :  { %v9272_v21 = vpop.eup %9271  ;;  %3948 = vadd.xlane.f32.xlu0 %v3947_v54 }
0x1568   :  { %v3950_v55 = vsel %vm288_vm4, %v9272_v21, 0.0  ;;  %v4108_v27 = vpop.permute.xlu1 %4107 }
0x156b   :  { %3951 = vadd.xlane.f32.xlu0 %v3950_v55 }
0x1581   :  { %4009 = vrot.lane.b32.xlu0 %v10443_v44, %s11476_s0 }
0x1585   :  { %4057 = vrot.lane.b32.xlu0 %v10441_v43, %s11478_s3 }
0x15f4   :  { %v3949_v56 = vpop.xlane.xlu0 %3948 }
0x15f5   :  { %9273 = vrcp.f32 %v3949_v56 }
0x15f8   :  { %v3952_v57 = vpop.xlane.xlu0 %3951 }
0x15f9   :  { %9275 = vrcp.f32 %v3952_v57 }
0x15fc   :  { %v4010_v58 = vpop.permute.xlu0 %4009 }
0x15fd   :  { %v4015_v59 = vsel %vm316_vm2, %v4010_v58, 0 }
0x15fe   :  { %8751 = vmatpush3.bf16.msra.mxu1 %v4015_v59 }
0x15ff   :  { %v9274_v31 = vpop.eup %9273  ;;  %8762 = vmatprep.subr.bf16.mxu1 %v9302_v12 }
0x1600   :  { %v3955_v60 = vmul.f32 %v9274_v31, %v9270_v8  ;;  %v4058_v13 = vpop.permute.xlu0 %4057 }
0x1602   :  { %v3957_v61 = vpack.c.bf16 %v3955_v60, %v3955_v60 }
0x1603   :  { %v9276_v0 = vpop.eup %9275 }
0x1604   :  { %v3956_v3 = vmul.f32 %v9276_v0, %v9272_v21  ;;  %8747 = vmatmul.mubr.msk.bf16.vlgmr.msra.gmra.mrb[76].mxu0 %vm288_vm4, %v3957_v61 }
0x1605   :  { %8757 = vmatpush3.bf16.xpose.msra.mxu0 %v4065_v2  ;;  %8758 = vmatprep.mubr.msk.bf16.mxu0 %vm9303_vm1, %v9302_v12 }
0x1606   :  { %v3958_v5 = vpack.c.bf16 %v3956_v3, %v3956_v3  ;;  %8768 = vmatprep.subr.bf16.mxu0 %v9302_v12 }
0x1608   :  { %8753 = vmatmul.mubr.msk.bf16.vlgmr.msra.gmra.mrb[88].mxu1 %vm288_vm4, %v3958_v5 }
0x1609   :  { %8763 = vmatpush3.bf16.xpose.msra.mxu1 %v4115_v11  ;;  %8764 = vmatprep.mubr.msk.bf16.mxu1 %vm9303_vm1, %v9302_v12 }
0x160a   :  { %8774 = vmatprep.subr.bf16.mxu1 %v9302_v12 }
0x160c   :  { %8759 = vmatmul.mubr.msk.bf16.vlgmr.msra.gmra.mrb[80].mxu0 %vm192_vm3, %v4058_v13 }
0x160d   :  { %8770 = vmatprep.mubr.msk.bf16.mxu0 %vm9303_vm1, %v9302_v12 }
0x1610   :  { %8765 = vmatmul.mubr.msk.bf16.vlgmr.msra.gmra.mrb[92].mxu1 %vm192_vm3, %v4108_v27 }
0x1611   :  { %8776 = vmatprep.mubr.msk.bf16.mxu1 %vm9303_vm1, %v9302_v12 }
0x16d7   :  { %v10529_v23 = vpop.f32.mrb[76].mxu0 }
0x16d8   :  { %v8748_v6 = vpop.f32.mrb[77].mxu0 }
0x16d9   :  { %v4005_v7 = vpop.f32.mrb[78].mxu0 }
0x16da   :  { %v8749_v52 = vpop.f32.mrb[79].mxu0 }
0x16db   :  { %v10531_v33 = vpop.f32.mrb[88].mxu1 }
0x16dc   :  { %v8897_v34 = vpack.i.bf16 %v10531_v33, %v10529_v23  ;;  %v8754_v24 = vpop.f32.mrb[89].mxu1 }
0x16dd   :  { %v4054_v35 = vpop.f32.mrb[90].mxu1 }
0x16de   :  { %v8755_v47 = vpop.f32.mrb[91].mxu1 }
0x16df   :  { %v4101_v14 = vpop.f32.mrb[80].mxu0 }
0x16e0   :  { %v8760_v49 = vpop.f32.mrb[81].mxu0  ;;  %v4157_v9 = vsel %vm288_vm4, %v4101_v14, -inf }
0x16e1   :  { %4158 = vmax.xlane.f32.xlu0 %v4157_v9  ;;  %v4104_v46 = vpop.f32.mrb[82].mxu0 }
0x16e2   :  { %v8761_v50 = vpop.f32.mrb[83].mxu0 }
0x16e3   :  { %v4151_v48 = vpop.f32.mrb[92].mxu1 }
0x16e4   :  { %v8766_v10 = vpop.f32.mrb[93].mxu1  ;;  %v4160_v32 = vsel %vm288_vm4, %v4151_v48, -inf }
0x16e5   :  { %4161 = vmax.xlane.f32.xlu1 %v4160_v32  ;;  %v4154_v16 = vpop.f32.mrb[94].mxu1 }
0x16e6   :  { %v8767_v20 = vpop.f32.mrb[95].mxu1 }
0x16f6   :  { %4181 = vrot.lane.b32.xlu1 %v10438_v26, %s11478_s3 }
0x16fa   :  { %4279 = vrot.lane.b32.xlu1 %v10426_v22, %s11479_s22 }
0x16fe   :  { %4329 = vrot.lane.b32.xlu1 %v10428_v19, %s11479_s22 }
0x1702   :  { %4327 = vrot.lane.b32.xlu1 %v10445_v45, %s11480_s23 }
0x176e   :  { %v4159_v25 = vpop.xlane.xlu0 %4158 }
0x176f   :  { %v4163_v28 = vsub.f32 %v4101_v14, %v4159_v25 }
0x1771   :  { %v4165_v36 = vmul.f32 1.442695, %v4163_v28 }
0x1772   :  { %v4162_v39 = vpop.xlane.xlu1 %4161 }
0x1773   :  { %9277 = vpow2.f32 %v4165_v36  ;;  %v4164_v51 = vsub.f32 %v4151_v48, %v4162_v39 }
0x1775   :  { %v4167_v8 = vmul.f32 1.442695, %v4164_v51 }
0x1776   :  { %v4182_v54 = vpop.permute.xlu1 %4181 }
0x1777   :  { %9279 = vpow2.f32 %v4167_v8  ;;  %v4187_v21 = vsel %vm316_vm2, %v4182_v54, 0 }
0x1778   :  { %8769 = vmatpush3.bf16.msra.mxu0 %v4187_v21 }
0x1779   :  { %8780 = vmatprep.subr.bf16.mxu0 %v9302_v12 }
0x177a   :  { %v4280_v40 = vpop.permute.xlu1 %4279 }
0x177b   :  { %v4285_v2 = vsel %vm192_vm3, %v4280_v40, 0 }
0x177d   :  { %v9278_v22 = vpop.eup %9277 }
0x177e   :  { %v4169_v19 = vsel %vm288_vm4, %v9278_v22, 0.0 }
0x177f   :  { %4170 = vadd.xlane.f32.xlu0 %v4169_v19 }
0x1781   :  { %v9280_v55 = vpop.eup %9279 }
0x1782   :  { %v4172_v45 = vsel %vm288_vm4, %v9280_v55, 0.0 }
0x1783   :  { %4173 = vadd.xlane.f32.xlu0 %v4172_v45 }
0x1799   :  { %4229 = vrot.lane.b32.xlu0 %v10443_v44, %s11478_s3 }
0x179d   :  { %4277 = vrot.lane.b32.xlu0 %v10441_v43, %s11480_s23  ;;  %v4330_v43 = vpop.permute.xlu1 %4329 }
0x179e   :  { %v4335_v5 = vsel %vm192_vm3, %v4330_v43, 0 }
0x17a1   :  { %v4328_v13 = vpop.permute.xlu1 %4327 }
0x180c   :  { %v4171_v56 = vpop.xlane.xlu0 %4170 }
0x180d   :  { %9281 = vrcp.f32 %v4171_v56 }
0x1810   :  { %v4174_v57 = vpop.xlane.xlu0 %4173 }
0x1811   :  { %9283 = vrcp.f32 %v4174_v57 }
0x1814   :  { %v4230_v58 = vpop.permute.xlu0 %4229 }
0x1815   :  { %v4235_v59 = vsel %vm316_vm2, %v4230_v58, 0 }
0x1816   :  { %8775 = vmatpush3.bf16.msra.mxu1 %v4235_v59 }
0x1817   :  { %v9282_v31 = vpop.eup %9281  ;;  %8786 = vmatprep.subr.bf16.mxu1 %v9302_v12 }
0x1818   :  { %v4177_v60 = vmul.f32 %v9282_v31, %v9278_v22  ;;  %v4278_v11 = vpop.permute.xlu0 %4277 }
0x181a   :  { %v4179_v61 = vpack.c.bf16 %v4177_v60, %v4177_v60 }
0x181b   :  { %v9284_v0 = vpop.eup %9283 }
0x181c   :  { %v4178_v3 = vmul.f32 %v9284_v0, %v9280_v55  ;;  %8771 = vmatmul.mubr.msk.bf16.vlgmr.msra.gmra.mrb[84].mxu0 %vm288_vm4, %v4179_v61  ;;  %v9070_v0 = vld [vmem:[%s11471_s29 + $0x28] sm:$0xff]  }
0x181d   :  { %8781 = vmatpush3.bf16.xpose.msra.mxu0 %v4285_v2  ;;  %8782 = vmatprep.mubr.msk.bf16.mxu0 %vm9303_vm1, %v9302_v12  ;;  %v9071_v2 = vld [vmem:[%s11471_s29 + $0x30] sm:$0xff]  }
0x181e   :  { %v4180_v4 = vpack.c.bf16 %v4178_v3, %v4178_v3  ;;  %8792 = vmatprep.subr.bf16.mxu0 %v9302_v12  ;;  %v9072_v3 = vld [vmem:[%s11471_s29 + $0x38] sm:$0xff]  }
0x1820   :  { %8777 = vmatmul.mubr.msk.bf16.vlgmr.msra.gmra.mrb[96].mxu1 %vm288_vm4, %v4180_v4 }
0x1821   :  { %8787 = vmatpush3.bf16.xpose.msra.mxu1 %v4335_v5  ;;  %8788 = vmatprep.mubr.msk.bf16.mxu1 %vm9303_vm1, %v9302_v12 }
0x1822   :  { %8798 = vmatprep.subr.bf16.mxu1 %v9302_v12 }
0x1824   :  { %8783 = vmatmul.mubr.msk.bf16.vlgmr.msra.gmra.mrb[88].mxu0 %vm192_vm3, %v4278_v11 }
0x1825   :  { %8794 = vmatprep.mubr.msk.bf16.mxu0 %vm9303_vm1, %v9302_v12 }
0x1828   :  { %8789 = vmatmul.mubr.msk.bf16.vlgmr.msra.gmra.mrb[100].mxu1 %vm192_vm3, %v4328_v13 }
0x1829   :  { %8800 = vmatprep.mubr.msk.bf16.mxu1 %vm9303_vm1, %v9302_v12 }
0x18ef   :  { %v4223_v27 = vpop.f32.mrb[84].mxu0 }
0x18f0   :  { %v8772_v6 = vpop.f32.mrb[85].mxu0 }
0x18f1   :  { %v4226_v7 = vpop.f32.mrb[86].mxu0 }
0x18f2   :  { %v8773_v52 = vpop.f32.mrb[87].mxu0 }
0x18f3   :  { %v4271_v24 = vpop.f32.mrb[96].mxu1 }
0x18f4   :  { %v8902_v35 = vpack.i.bf16 %v4271_v24, %v4223_v27  ;;  %v8778_v47 = vpop.f32.mrb[97].mxu1 }
0x18f5   :  { %v4274_v14 = vpop.f32.mrb[98].mxu1 }
0x18f6   :  { %v8779_v49 = vpop.f32.mrb[99].mxu1 }
0x18f7   :  { %v4321_v9 = vpop.f32.mrb[88].mxu0 }
0x18f8   :  { %v8784_v46 = vpop.f32.mrb[89].mxu0  ;;  %v4377_v50 = vsel %vm288_vm4, %v4321_v9, -inf }
0x18f9   :  { %4378 = vmax.xlane.f32.xlu0 %v4377_v50  ;;  %v4324_v48 = vpop.f32.mrb[90].mxu0 }
0x18fa   :  { %v8785_v10 = vpop.f32.mrb[91].mxu0 }
0x18fb   :  { %v4371_v32 = vpop.f32.mrb[100].mxu1 }
0x18fc   :  { %v8790_v16 = vpop.f32.mrb[101].mxu1  ;;  %v4380_v20 = vsel %vm288_vm4, %v4371_v32, -inf }
0x18fd   :  { %4381 = vmax.xlane.f32.xlu1 %v4380_v20  ;;  %v4374_v25 = vpop.f32.mrb[102].mxu1 }
0x18fe   :  { %v8791_v28 = vpop.f32.mrb[103].mxu1 }
0x190e   :  { %4401 = vrot.lane.b32.xlu1 %v10438_v26, %s11480_s23 }
0x1912   :  { %8898 = vrot.lane.b32.xlu1 %v8897_v34, %s11479_s22 }
0x1916   :  { %8903 = vrot.lane.b32.xlu1 %v8902_v35, %s11477_s24 }
0x1986   :  { %v4379_v36 = vpop.xlane.xlu0 %4378 }
0x1987   :  { %v4383_v39 = vsub.f32 %v4321_v9, %v4379_v36 }
0x1989   :  { %v4385_v51 = vmul.f32 1.442695, %v4383_v39 }
0x198a   :  { %v4382_v8 = vpop.xlane.xlu1 %4381 }
0x198b   :  { %9285 = vpow2.f32 %v4385_v51  ;;  %v4384_v54 = vsub.f32 %v4371_v32, %v4382_v8 }
0x198d   :  { %v4387_v21 = vmul.f32 1.442695, %v4384_v54 }
0x198e   :  { %v4402_v22 = vpop.permute.xlu1 %4401 }
0x198f   :  { %9287 = vpow2.f32 %v4387_v21  ;;  %v4407_v19 = vsel %vm316_vm2, %v4402_v22, 0 }
0x1990   :  { %8793 = vmatpush3.bf16.msra.mxu0 %v4407_v19 }
0x1991   :  { %8804 = vmatprep.subr.bf16.mxu0 %v9302_v12 }
0x1992   :  { %v8899_v24 = vpop.permute.xlu1 %8898 }
0x1993   :  { %v8901_v47 = vunpack.i.h.bf16 %v8899_v24  ;;  %v8900_v14 = vunpack.i.l.bf16 %v8899_v24  ;;  %v7637_v24 = vld [vmem:[%s11473_s30 + $0x340] sm:$0xff] }
0x1995   :  { %v9286_v26 = vpop.eup %9285  ;;  %v4522_v50 = vsel %vm192_vm3, %v10491_v30, %v8901_v47  ;;  %v4521_v48 = vsel %vm192_vm3, %v10489_v29, %v8900_v14  ;;  %v7587_v30 = vld [vmem:[%s11472_s28 + $0x1] ss:$0 sm:$0xff]  ;;  %v7638_v14 = vld [vmem:[%s11473_s30 + $0x348] sm:$0xff] }
0x1996   :  { %v4389_v23 = vsel %vm288_vm4, %v9286_v26, 0.0  ;;  %v8904_v35 = vpop.permute.xlu1 %8903 }
0x1997   :  { %4390 = vadd.xlane.f32.xlu0 %v4389_v23  ;;  %v8906_v49 = vunpack.i.h.bf16 %v8904_v35  ;;  %v8905_v9 = vunpack.i.l.bf16 %v8904_v35  ;;  %v7630_v35 = vld [vmem:[%s11473_s30 + $0x308] sm:$0xff] }
0x1999   :  { %v9288_v33 = vpop.eup %9287  ;;  %v4524_v16 = vsel %vm1096_vm5, %v4522_v50, %v8906_v49  ;;  %v4523_v20 = vsel %vm1096_vm5, %v4521_v48, %v8905_v9  ;;  %v7697_v9 = vcombine.low %v7630_v35, %v7638_v14  ;;  %v7645_v50 = vld [vmem:[%s11473_s30 + $0x380] sm:$0xff] }
0x199a   :  { %v4392_v34 = vsel %vm288_vm4, %v9288_v33, 0.0  ;;  %v7653_v48 = vld [vmem:[%s11473_s30 + $0x3c0] sm:$0xff] }
0x199b   :  { %4393 = vadd.xlane.f32.xlu0 %v4392_v34 }
0x19b1   :  { %4449 = vrot.lane.b32.xlu0 %v10443_v44, %s11480_s23  ;;  %v9069_v44 = vld [vmem:[%s11471_s29 + $0x20] sm:$0xff]  }
0x1a24   :  { %v4391_v55 = vpop.xlane.xlu0 %4390 }
0x1a25   :  { %9289 = vrcp.f32 %v4391_v55 }
0x1a28   :  { %v4394_v45 = vpop.xlane.xlu0 %4393 }
0x1a29   :  { %9291 = vrcp.f32 %v4394_v45 }
0x1a2c   :  { %v4450_v56 = vpop.permute.xlu0 %4449 }
0x1a2d   :  { %v4455_v57 = vsel %vm316_vm2, %v4450_v56, 0 }
0x1a2e   :  { %8799 = vmatpush3.bf16.msra.mxu1 %v4455_v57 }
0x1a2f   :  { %v9290_v58 = vpop.eup %9289 }
0x1a30   :  { %v4397_v59 = vmul.f32 %v9290_v58, %v9286_v26 }
0x1a32   :  { %v4399_v31 = vpack.c.bf16 %v4397_v59, %v4397_v59 }
0x1a33   :  { %v9292_v40 = vpop.eup %9291 }
0x1a34   :  { %v4398_v60 = vmul.f32 %v9292_v40, %v9288_v33  ;;  %8795 = vmatmul.mubr.msk.bf16.vlgmr.msra.gmra.mrb[92].mxu0 %vm288_vm4, %v4399_v31  ;;  %v7597_v31 = vld [vmem:[%s11473_s30 + $0x200] sm:$0xff] }
0x1a35   :  { %8812 = vmatprep.mubr.msk.bf16.mxu0 %vm9303_vm1, %v9302_v12  ;;  %8805 = vmatpush3.bf16.msra.mxu0 %v9069_v44  ;;  %v7605_v40 = vld [vmem:[%s11473_s30 + $0x240] sm:$0xff]  ;;  %v7606_v44 = vld [vmem:[%s11473_s30 + $0x248] sm:$0xff] }
0x1a36   :  { %v4400_v61 = vpack.c.bf16 %v4398_v60, %v4398_v60  ;;  %8806 = vmatprep.subr.bf16.mxu0 %v9302_v12  ;;  %v7598_v60 = vld [vmem:[%s11473_s30 + $0x208] sm:$0xff] }
0x1a38   :  { %8801 = vmatmul.mubr.msk.bf16.vlgmr.msra.gmra.mrb[104].mxu1 %vm288_vm4, %v4400_v61  ;;  %v7664_v61 = vcombine.high %v7597_v31, %v7605_v40 }
0x1a39   :  { %5167 = vmatprep.mubr.bf16.mxu1 %v9301_v1  ;;  %8807 = vmatpush3.bf16.msra.mxu0 %v9070_v0  ;;  %v7663_v0 = vcombine.low %v7597_v31, %v7605_v40  ;;  %v7596_v31 = vld [vmem:[%s11428_s8 + $0x1] ss:$0 sm:$0xff] }
0x1a3a   :  { %8808 = vmatprep.subr.bf16.mxu0 %v9302_v12  ;;  %5135 = vmatprep.subr.bf16.mxu1 %v7664_v61  ;;  %v7623_v61 = vld [vmem:[%s11473_s30 + $0x2d0] sm:$0xff] }
0x1a3b   :  { %5136 = vmatpush1.bf16.msra.mxu1 %v7663_v0 }
0x1a3d   :  { %8809 = vmatpush3.bf16.msra.mxu0 %v9071_v2  ;;  %v7665_v2 = vcombine.low %v7598_v60, %v7606_v44 }
0x1a3e   :  { %8810 = vmatprep.subr.bf16.mxu0 %v9302_v12 }
0x1a41   :  { %8811 = vmatpush3.bf16.msra.mxu0 %v9072_v3  ;;  %v7666_v3 = vcombine.high %v7598_v60, %v7606_v44  ;;  %v7615_v60 = vld [vmem:[%s11473_s30 + $0x290] sm:$0xff] }
0x1a43   :  { %5178 = vmatprep.subr.bf16.mxu0 %v7666_v3  ;;  %v7684_v3 = vcombine.high %v7615_v60, %v7623_v61 }
0x1b07   :  { %v4443_v43 = vpop.f32.mrb[92].mxu0 }
0x1b08   :  { %v8796_v4 = vpop.f32.mrb[93].mxu0 }
0x1b09   :  { %v4446_v5 = vpop.f32.mrb[94].mxu0  ;;  %v7621_v4 = vld [vmem:[%s11473_s30 + $0x2c0] sm:$0xff] }
0x1b0a   :  { %v8797_v11 = vpop.f32.mrb[95].mxu0  ;;  %v7614_v5 = vld [vmem:[%s11473_s30 + $0x288] sm:$0xff] }
0x1b0b   :  { %v4491_v13 = vpop.f32.mrb[104].mxu1 }
0x1b0c   :  { %v8907_v27 = vpack.i.bf16 %v4491_v13, %v4443_v43  ;;  %v8802_v6 = vpop.f32.mrb[105].mxu1  ;;  %v7613_v43 = vld [vmem:[%s11473_s30 + $0x280] sm:$0xff]  ;;  %v7622_v13 = vld [vmem:[%s11473_s30 + $0x2c8] sm:$0xff] }
0x1b0d   :  { %v4494_v7 = vpop.f32.mrb[106].mxu1  ;;  %v7680_v11 = vcombine.high %v7613_v43, %v7621_v4  ;;  %v7681_v6 = vcombine.low %v7614_v5, %v7622_v13 }
0x1b0e   :  { %v8803_v52 = vpop.f32.mrb[107].mxu1  ;;  %8908 = vrot.lane.b32.xlu0 %v8907_v27, %s11475_s9  ;;  %v7679_v27 = vcombine.low %v7613_v43, %v7621_v4  ;;  %v7682_v7 = vcombine.high %v7614_v5, %v7622_v13  ;;  %v7631_v4 = vld [vmem:[%s11473_s30 + $0x310] sm:$0xff]  ;;  %v7640_v13 = vld [vmem:[%s11473_s30 + $0x358] sm:$0xff] }
0x1b0f   :  { %5137 = vmatprep.subr.bf16.mxu1 %v7680_v11  ;;  %v7629_v52 = vld [vmem:[%s11473_s30 + $0x300] sm:$0xff]  ;;  %v7639_v5 = vld [vmem:[%s11473_s30 + $0x350] sm:$0xff]  ;;  %v7632_v11 = vld [vmem:[%s11473_s30 + $0x318] sm:$0xff] }
0x1b10   :  { %5138 = vmatpush1.bf16.msra.mxu1 %v7679_v27  ;;  %v7696_v47 = vcombine.high %v7629_v52, %v7637_v24  ;;  %v7695_v49 = vcombine.low %v7629_v52, %v7637_v24  ;;  %v7683_v27 = vcombine.low %v7615_v60, %v7623_v61  ;;  %v7702_v52 = vcombine.high %v7632_v11, %v7640_v13  ;;  %v7647_v24 = vld [vmem:[%s11473_s30 + $0x390] sm:$0xff] }
0x1b12   :  { %5139 = vmatprep.subr.bf16.mxu1 %v7696_v47  ;;  %v7648_v47 = vld [vmem:[%s11473_s30 + $0x398] sm:$0xff] }
0x1b14   :  { %5140 = vmatpush1.bf16.msra.mxu1 %v7695_v49  ;;  %v7699_v49 = vcombine.low %v7631_v4, %v7639_v5 }
0x1b80   :  { %v8909_v46 = vpop.permute.xlu0 %8908 }
0x1b81   :  { %v8911_v10 = vunpack.i.h.bf16 %v8909_v46  ;;  %v8910_v32 = vunpack.i.l.bf16 %v8909_v46  ;;  %v7698_v46 = vcombine.high %v7630_v35, %v7638_v14  ;;  %v7655_v35 = vld [vmem:[%s11473_s30 + $0x3d0] sm:$0xff]  ;;  %v7656_v14 = vld [vmem:[%s11473_s30 + $0x3d8] sm:$0xff] }
0x1b83   :  { %v4526_v25 = vsel %vm1099_vm6, %v4524_v16, %v8911_v10  ;;  %v4525_v28 = vsel %vm1099_vm6, %v4523_v20, %v8910_v32  ;;  %v7646_v10 = vld [vmem:[%s11473_s30 + $0x388] sm:$0xff]  ;;  %v7712_v32 = vcombine.high %v7645_v50, %v7653_v48  ;;  %v7711_v20 = vcombine.low %v7645_v50, %v7653_v48  ;;  %v7601_v48 = vld [vmem:[%s11473_s30 + $0x220] sm:$0xff] }
0x1b84   :  { %v4527_v36 = vpack.c.bf16 %v4526_v25, %v4525_v28  ;;  %v7654_v16 = vld [vmem:[%s11473_s30 + $0x3c8] sm:$0xff]  ;;  %v7718_v50 = vcombine.high %v7648_v47, %v7656_v14 }
0x1b85   :  { %v7713_v25 = vcombine.low %v7646_v10, %v7654_v16  ;;  %v7714_v28 = vcombine.high %v7646_v10, %v7654_v16  ;;  %5141 = vmatprep.subr.bf16.mxu1 %v7712_v32  ;;  %v7609_v10 = vld [vmem:[%s11473_s30 + $0x260] sm:$0xff]  ;;  %v7602_v32 = vld [vmem:[%s11473_s30 + $0x228] sm:$0xff] }
0x1b86   :  { %8813 = vmatmul.mubr.msk.bf16.vlgmr.msra.gmra.mrb[96].mxu0 %vm134_vm0, %v4527_v36  ;;  %5142 = vmatpush1.bf16.msra.mxu1 %v7711_v20  ;;  %v7599_v36 = vld [vmem:[%s11473_s30 + $0x210] sm:$0xff]  ;;  %v7610_v16 = vld [vmem:[%s11473_s30 + $0x268] sm:$0xff]  ;;  %v7715_v20 = vcombine.low %v7647_v24, %v7655_v35 }
0x1b87   :  { %5210 = vmatprep.mubr.bf16.mxu0 %v9301_v1  ;;  %5179 = vmatpush1.bf16.msra.mxu0 %v7665_v2 }
0x1b88   :  { %5180 = vmatprep.subr.bf16.mxu0 %v7682_v7  ;;  %v7700_v7 = vcombine.high %v7631_v4, %v7639_v5  ;;  %v7612_v4 = vld [vmem:[%s11473_s30 + $0x278] sm:$0xff] }
0x1b8b   :  { %5181 = vmatpush1.bf16.msra.mxu0 %v7681_v6 }
0x1b8c   :  { %5182 = vmatprep.subr.bf16.mxu0 %v7698_v46  ;;  %v7716_v46 = vcombine.high %v7647_v24, %v7655_v35  ;;  %v7628_v24 = vld [vmem:[%s11473_s30 + $0x2f8] sm:$0xff] }
0x1b8f   :  { %5183 = vmatpush1.bf16.msra.mxu0 %v7697_v9  ;;  %v7701_v9 = vcombine.low %v7632_v11, %v7640_v13 }
0x1b90   :  { %5184 = vmatprep.subr.bf16.mxu0 %v7714_v28  ;;  %v7672_v28 = vcombine.high %v7601_v48, %v7609_v10 }
0x1b93   :  { %5185 = vmatpush1.bf16.msra.mxu0 %v7713_v25  ;;  %v7717_v25 = vcombine.low %v7648_v47, %v7656_v14 }
0x1c59   :  { %v4606_v29 = vpop.f32.mrb[96].mxu0 }
0x1c5a   :  { %v4607_v39 = vadd.f32 %v7587_v30, %v4606_v29  ;;  %v8814_v51 = vpop.f32.mrb[97].mxu0  ;;  %v7600_v29 = vld [vmem:[%s11473_s30 + $0x218] sm:$0xff] }
0x1c5b   :  { %v4609_v8 = vpop.f32.mrb[98].mxu0 }
0x1c5c   :  { %v4610_v54 = vadd.f32 %v7587_v30, %v4609_v8  ;;  %v8815_v21 = vpop.f32.mrb[99].mxu0  ;;  %v4613_v22 = vadd.f32 %v4607_v39, %v10413_v62  ;;  %v7607_v30 = vld [vmem:[%s11473_s30 + $0x250] sm:$0xff]  ;;  %v7608_v8 = vld [vmem:[%s11473_s30 + $0x258] sm:$0xff] }
0x1c5d   :  { %v7667_v39 = vcombine.low %v7599_v36, %v7607_v30  ;;  %v7668_v51 = vcombine.high %v7599_v36, %v7607_v30  ;;  %v7670_v21 = vcombine.high %v7600_v29, %v7608_v8  ;;  %v7674_v36 = vcombine.high %v7602_v32, %v7610_v16  ;;  %v7617_v30 = vld [vmem:[%s11473_s30 + $0x2a0] sm:$0xff] }
0x1c5e   :  { %v4619_v19 = vsel %vm134_vm0, %v4613_v22, 0.0  ;;  %v4614_v26 = vadd.f32 %v4610_v54, %v10415_v63  ;;  %v7669_v54 = vcombine.low %v7600_v29, %v7608_v8  ;;  %v7625_v29 = vld [vmem:[%s11473_s30 + $0x2e0] sm:$0xff]  ;;  %v7671_v8 = vcombine.low %v7601_v48, %v7609_v10  ;;  %v7644_v48 = vld [vmem:[%s11473_s30 + $0x378] sm:$0xff] }
0x1c5f   :  { %4620 = vadd.xlane.f32.xlu1 %v4619_v19  ;;  %5221 = vmatprep.subr.bf16.mxu1 %v7668_v51  ;;  %v7626_v51 = vld [vmem:[%s11473_s30 + $0x2e8] sm:$0xff] }
0x1c60   :  { %v4622_v23 = vsel %vm134_vm0, %v4614_v26, 0.0  ;;  %5264 = vmatprep.subr.bf16.mxu0 %v7670_v21  ;;  %v7688_v21 = vcombine.high %v7617_v30, %v7625_v29 }
0x1c61   :  { %4623 = vadd.xlane.f32.xlu0 %v4622_v23 }
0x1cec   :  { %v4621_v33 = vpop.xlane.xlu1 %4620 }
0x1ced   :  { %v4625_v34 = vmul.f32 0.015625, %v4621_v33 }
0x1cee   :  { %v4624_v55 = vpop.xlane.xlu0 %4623 }
0x1cef   :  { %v10625_v45 = vsub.f32 %v4613_v22, %v4625_v34  ;;  %v4626_v56 = vmul.f32 0.015625, %v4624_v55 }
0x1cf1   :  { %v10627_v57 = vsub.f32 %v4614_v26, %v4626_v56  ;;  %v4629_v58 = vmul.f32 %v10625_v45, %v10625_v45  ;;  %v7595_v56 = vld [vmem:[%s11427_s7 + $0x1] ss:$0 sm:$0xff] }
0x1cf3   :  { %v4631_v62 = vsel %vm134_vm0, %v4629_v58, 0.0  ;;  %v4630_v63 = vmul.f32 %v10627_v57, %v10627_v57 }
0x1cf4   :  { %4632 = vadd.xlane.f32.xlu0 %v4631_v62 }
0x1cf5   :  { %v4634_v59 = vsel %vm134_vm0, %v4630_v63, 0.0 }
0x1cf6   :  { %4635 = vadd.xlane.f32.xlu1 %v4634_v59 }
0x1d81   :  { %v4633_v22 = vpop.xlane.xlu0 %4632 }
0x1d82   :  { %v4637_v19 = vmul.f32 0.015625, %v4633_v22 }
0x1d83   :  { %v4636_v26 = vpop.xlane.xlu1 %4635 }
0x1d84   :  { %v4639_v23 = vadd.f32 1e-05, %v4637_v19  ;;  %v4638_v33 = vmul.f32 0.015625, %v4636_v26  ;;  %v7633_v19 = vld [vmem:[%s11473_s30 + $0x320] sm:$0xff] }
0x1d85   :  { %v7641_v26 = vld [vmem:[%s11473_s30 + $0x360] sm:$0xff] }
0x1d86   :  { %9293 = vrsqrt.f32 %v4639_v23  ;;  %v4640_v34 = vadd.f32 1e-05, %v4638_v33  ;;  %v7634_v23 = vld [vmem:[%s11473_s30 + $0x328] sm:$0xff] }
0x1d87   :  { %v7642_v33 = vld [vmem:[%s11473_s30 + $0x368] sm:$0xff] }
0x1d88   :  { %9295 = vrsqrt.f32 %v4640_v34  ;;  %v7687_v34 = vcombine.low %v7617_v30, %v7625_v29  ;;  %v7705_v60 = vcombine.low %v7634_v23, %v7642_v33  ;;  %v7660_v30 = vld [vmem:[%s11473_s30 + $0x3f8] sm:$0xff] }
0x1d90   :  { %v9294_v55 = vpop.eup %9293 }
0x1d91   :  { %v4643_v58 = vmul.f32 %v9294_v55, %v10625_v45  ;;  %v7616_v45 = vld [vmem:[%s11473_s30 + $0x298] sm:$0xff] }
0x1d92   :  { %v9296_v62 = vpop.eup %9295 }
0x1d93   :  { %v4651_v63 = vmul.f32 %v7595_v56, %v4643_v58  ;;  %v4644_v59 = vmul.f32 %v9296_v62, %v10627_v57  ;;  %v7624_v57 = vld [vmem:[%s11473_s30 + $0x2d8] sm:$0xff]  ;;  %v7706_v58 = vcombine.high %v7634_v23, %v7642_v33  ;;  %v7649_v62 = vld [vmem:[%s11473_s30 + $0x3a0] sm:$0xff]  ;;  %v9077_v23 = vld [vmem:[%s11426_s11 + $0x448] sm:$0xff]  }
0x1d94   :  { %v7686_v43 = vcombine.high %v7616_v45, %v7624_v57  ;;  %v7685_v6 = vcombine.low %v7616_v45, %v7624_v57  ;;  %v7603_v57 = vld [vmem:[%s11473_s30 + $0x230] sm:$0xff]  ;;  %v9078_v33 = vld [vmem:[%s11426_s11 + $0x4c8] sm:$0xff]  }
0x1d95   :  { %v4652_v40 = vmul.f32 %v7595_v56, %v4644_v59  ;;  %v10715_v44 = vadd.f32 %v7596_v31, %v4651_v63  ;;  %v7704_v56 = vcombine.high %v7633_v19, %v7641_v26  ;;  %v7657_v63 = vld [vmem:[%s11473_s30 + $0x3e0] sm:$0xff]  ;;  %v7650_v59 = vld [vmem:[%s11473_s30 + $0x3a8] sm:$0xff] }
0x1d96   :  { %v7720_v61 = vcombine.high %v7649_v62, %v7657_v63  ;;  %v7719_v5 = vcombine.low %v7649_v62, %v7657_v63  ;;  %v9084_v62 = vld [vmem:[%s11426_s11 + $0x490] sm:$0xff]   ;;  %v9085_v63 = vld [vmem:[%s11426_s11 + $0x458] sm:$0xff]  }
0x1d97   :  { %v10717_v0 = vadd.f32 %v7596_v31, %v4652_v40  ;;  %v7658_v31 = vld [vmem:[%s11473_s30 + $0x3e8] sm:$0xff]  ;;  %v7703_v40 = vcombine.low %v7633_v19, %v7641_v26  ;;  %v9075_v19 = vld [vmem:[%s11426_s11 + $0x400] sm:$0xff]  }
0x1d98   :  { %v7722_v45 = vcombine.high %v7650_v59, %v7658_v31  ;;  %v7721_v11 = vcombine.low %v7650_v59, %v7658_v31  ;;  %v9076_v26 = vld [vmem:[%s11426_s11 + $0x480] sm:$0xff]   ;;  %v9086_v59 = vld [vmem:[%s11426_s11 + $0x4d8] sm:$0xff]  }
0x1d99   :  { %v10721_v2 = vpack.c.bf16 %v10717_v0, %v10715_v44  ;;  %v9087_v31 = vld [vmem:[%s11426_s11 + $0x418] sm:$0xff]  }
0x1d9b   :  { %7727 = vmatmul.mubr.msk.bf16.vlgmr.msra.gmra.mrb[108].mxu1 %vm134_vm0, %v10721_v2  ;;  %7728 = vmatmul.mubr.msk.bf16.vlgmr.msra.gmra.mrb[100].mxu0 %vm134_vm0, %v10721_v2 }
0x1d9c   :  { %5222 = vmatpush1.bf16.msra.mxu1 %v7667_v39  ;;  %5265 = vmatpush1.bf16.msra.mxu0 %v7669_v54  ;;  %v7618_v39 = vld [vmem:[%s11473_s30 + $0x2a8] sm:$0xff]  ;;  %v7673_v54 = vcombine.low %v7602_v32, %v7610_v16 }
0x1d9d   :  { %5223 = vmatprep.subr.bf16.mxu1 %v7684_v3  ;;  %5266 = vmatprep.subr.bf16.mxu0 %v7686_v43  ;;  %v7690_v22 = vcombine.high %v7618_v39, %v7626_v51  ;;  %v7689_v55 = vcombine.low %v7618_v39, %v7626_v51  ;;  %v7611_v3 = vld [vmem:[%s11473_s30 + $0x270] sm:$0xff]  ;;  %v7604_v43 = vld [vmem:[%s11473_s30 + $0x238] sm:$0xff] }
0x1d9e   :  { %5253 = vmatprep.mubr.bf16.mxu1 %v9301_v1  ;;  %5296 = vmatprep.mubr.bf16.mxu0 %v9301_v1  ;;  %v7676_v13 = vcombine.high %v7603_v57, %v7611_v3  ;;  %v7675_v35 = vcombine.low %v7603_v57, %v7611_v3  ;;  %v7677_v47 = vcombine.low %v7604_v43, %v7612_v4  ;;  %v9092_v57 = vld [vmem:[%s11426_s11 + $0x4a0] sm:$0xff]   ;;  %v9093_v3 = vld [vmem:[%s11426_s11 + $0x468] sm:$0xff]  }
0x1da0   :  { %5224 = vmatpush1.bf16.msra.mxu1 %v7683_v27  ;;  %5267 = vmatpush1.bf16.msra.mxu0 %v7685_v6  ;;  %v7678_v27 = vcombine.high %v7604_v43, %v7612_v4  ;;  %v7619_v6 = vld [vmem:[%s11473_s30 + $0x2b0] sm:$0xff]  ;;  %v9094_v43 = vld [vmem:[%s11426_s11 + $0x4e8] sm:$0xff]  }
0x1da1   :  { %5225 = vmatprep.subr.bf16.mxu1 %v7700_v7  ;;  %5268 = vmatprep.subr.bf16.mxu0 %v7702_v52  ;;  %v7627_v7 = vld [vmem:[%s11473_s30 + $0x2f0] sm:$0xff]  ;;  %v7620_v52 = vld [vmem:[%s11473_s30 + $0x2b8] sm:$0xff]  ;;  %v9095_v4 = vld [vmem:[%s11426_s11 + $0x428] sm:$0xff]  }
0x1da2   :  { %v7692_v14 = vcombine.high %v7619_v6, %v7627_v7  ;;  %v7691_v10 = vcombine.low %v7619_v6, %v7627_v7  ;;  %v7693_v32 = vcombine.low %v7620_v52, %v7628_v24  ;;  %v9100_v6 = vld [vmem:[%s11426_s11 + $0x4b0] sm:$0xff]   ;;  %v9101_v7 = vld [vmem:[%s11426_s11 + $0x478] sm:$0xff]  }
0x1da4   :  { %5226 = vmatpush1.bf16.msra.mxu1 %v7699_v49  ;;  %5269 = vmatpush1.bf16.msra.mxu0 %v7701_v9  ;;  %v7694_v49 = vcombine.high %v7620_v52, %v7628_v24  ;;  %v7635_v9 = vld [vmem:[%s11473_s30 + $0x330] sm:$0xff]  ;;  %v9102_v52 = vld [vmem:[%s11426_s11 + $0x4f8] sm:$0xff]  }
0x1da5   :  { %5227 = vmatprep.subr.bf16.mxu1 %v7716_v46  ;;  %5270 = vmatprep.subr.bf16.mxu0 %v7718_v50  ;;  %v7643_v46 = vld [vmem:[%s11473_s30 + $0x370] sm:$0xff]  ;;  %v7636_v50 = vld [vmem:[%s11473_s30 + $0x338] sm:$0xff] }
0x1da6   :  { %v7708_v16 = vcombine.high %v7635_v9, %v7643_v46  ;;  %v7707_v29 = vcombine.low %v7635_v9, %v7643_v46  ;;  %v7709_v39 = vcombine.low %v7636_v50, %v7644_v48  ;;  %v9103_v24 = vld [vmem:[%s11426_s11 + $0x438] sm:$0xff]  }
0x1da8   :  { %5228 = vmatpush1.bf16.msra.mxu1 %v7715_v20  ;;  %5271 = vmatpush1.bf16.msra.mxu0 %v7717_v25  ;;  %v7710_v20 = vcombine.high %v7636_v50, %v7644_v48  ;;  %v7651_v25 = vld [vmem:[%s11473_s30 + $0x3b0] sm:$0xff] }
0x1da9   :  { %5307 = vmatprep.subr.bf16.mxu1 %v7672_v28  ;;  %5350 = vmatprep.subr.bf16.mxu0 %v7674_v36  ;;  %v7659_v28 = vld [vmem:[%s11473_s30 + $0x3f0] sm:$0xff]  ;;  %v7652_v36 = vld [vmem:[%s11473_s30 + $0x3b8] sm:$0xff] }
0x1daa   :  { %v7724_v51 = vcombine.high %v7651_v25, %v7659_v28 }
0x1dab   :  { %7729 = vmatmul.mubr.msk.bf16.vlgmr.msra.gmra.mrb[112].mxu1 %vm134_vm0, %v10721_v2  ;;  %7730 = vmatmul.mubr.msk.bf16.vlgmr.msra.gmra.mrb[104].mxu0 %vm134_vm0, %v10721_v2 }
0x1dac   :  { %5308 = vmatpush1.bf16.msra.mxu1 %v7671_v8  ;;  %5351 = vmatpush1.bf16.msra.mxu0 %v7673_v54  ;;  %v7726_v8 = vcombine.high %v7652_v36, %v7660_v30  ;;  %v7723_v54 = vcombine.low %v7651_v25, %v7659_v28 }
0x1dad   :  { %5309 = vmatprep.subr.bf16.mxu1 %v7688_v21  ;;  %5352 = vmatprep.subr.bf16.mxu0 %v7690_v22  ;;  %v7725_v21 = vcombine.low %v7652_v36, %v7660_v30  ;;  %v9073_v22 = vld [vmem:[%s11426_s11 + $0x440] sm:$0xff]  }
0x1dae   :  { %5339 = vmatprep.mubr.bf16.mxu1 %v9301_v1  ;;  %5382 = vmatprep.mubr.bf16.mxu0 %v9301_v1 }
0x1db0   :  { %5310 = vmatpush1.bf16.msra.mxu1 %v7687_v34  ;;  %5353 = vmatpush1.bf16.msra.mxu0 %v7689_v55  ;;  %v9079_v34 = vld [vmem:[%s11426_s11 + $0x408] sm:$0xff]  }
0x1db1   :  { %5311 = vmatprep.subr.bf16.mxu1 %v7704_v56  ;;  %5354 = vmatprep.subr.bf16.mxu0 %v7706_v58  ;;  %v9080_v55 = vld [vmem:[%s11426_s11 + $0x488] sm:$0xff]   ;;  %v9081_v56 = vld [vmem:[%s11426_s11 + $0x450] sm:$0xff]  }
0x1db2   :  { %v9083_v58 = vld [vmem:[%s11426_s11 + $0x410] sm:$0xff]  }
0x1db4   :  { %5312 = vmatpush1.bf16.msra.mxu1 %v7703_v40  ;;  %5355 = vmatpush1.bf16.msra.mxu0 %v7705_v60  ;;  %v9088_v40 = vld [vmem:[%s11426_s11 + $0x498] sm:$0xff]   ;;  %v9089_v60 = vld [vmem:[%s11426_s11 + $0x460] sm:$0xff]  }
0x1db5   :  { %5313 = vmatprep.subr.bf16.mxu1 %v7720_v61  ;;  %5356 = vmatprep.subr.bf16.mxu0 %v7722_v45  ;;  %v9090_v61 = vld [vmem:[%s11426_s11 + $0x4e0] sm:$0xff]  }
0x1db6   :  { %v9091_v45 = vld [vmem:[%s11426_s11 + $0x420] sm:$0xff]  }
0x1db8   :  { %5314 = vmatpush1.bf16.msra.mxu1 %v7719_v5  ;;  %5357 = vmatpush1.bf16.msra.mxu0 %v7721_v11  ;;  %v9096_v5 = vld [vmem:[%s11426_s11 + $0x4a8] sm:$0xff]   ;;  %v9097_v11 = vld [vmem:[%s11426_s11 + $0x470] sm:$0xff]  }
0x1db9   :  { %5393 = vmatprep.subr.bf16.mxu1 %v7676_v13  ;;  %5436 = vmatprep.subr.bf16.mxu0 %v7678_v27  ;;  %v9098_v13 = vld [vmem:[%s11426_s11 + $0x4f0] sm:$0xff]  }
0x1dba   :  { %v9099_v27 = vld [vmem:[%s11426_s11 + $0x430] sm:$0xff]  }
0x1dbb   :  { %7731 = vmatmul.mubr.msk.bf16.vlgmr.msra.gmra.mrb[116].mxu1 %vm134_vm0, %v10721_v2  ;;  %7732 = vmatmul.mubr.msk.bf16.vlgmr.msra.gmra.mrb[108].mxu0 %vm134_vm0, %v10721_v2 }
0x1dbc   :  { %5394 = vmatpush1.bf16.msra.mxu1 %v7675_v35  ;;  %5437 = vmatpush1.bf16.msra.mxu0 %v7677_v47  ;;  %v9104_v35 = vld [vmem:[%s11426_s11 + $0x4b8] sm:$0xff]   ;;  %v9105_v47 = vld [vmem:[%s11426_s11 + $0x540] sm:$0xff]  }
0x1dbd   :  { %5395 = vmatprep.subr.bf16.mxu1 %v7692_v14  ;;  %5438 = vmatprep.subr.bf16.mxu0 %v7694_v49  ;;  %v9106_v14 = vld [vmem:[%s11426_s11 + $0x5c0] sm:$0xff]   ;;  %v7661_v49 = vld [vmem:[%s11429_s10 + $0x10] sm:$0xff] }
0x1dbe   :  { %5425 = vmatprep.mubr.bf16.mxu1 %v9301_v1  ;;  %5468 = vmatprep.mubr.bf16.mxu0 %v9301_v1  ;;  %v9074_v1 = vld [vmem:[%s11426_s11 + $0x4c0] sm:$0xff]   ;;  %v4735_v9 = vrot.slane %v7661_v49, %v9465_v15  ;;  %v4743_v46 = vrot.slane %v7661_v49, %v10020_v18  ;;  %v4739_v50 = vrot.slane %v7661_v49, %v9471_v17 }
0x1dbf   :  { %v4747_v48 = vrot.slane %v7661_v49, %v10026_v53 }
0x1dc0   :  { %5396 = vmatpush1.bf16.msra.mxu1 %v7691_v10  ;;  %5439 = vmatpush1.bf16.msra.mxu0 %v7693_v32 }
0x1dc1   :  { %5397 = vmatprep.subr.bf16.mxu1 %v7708_v16  ;;  %5440 = vmatprep.subr.bf16.mxu0 %v7710_v20 }
0x1dc4   :  { %5398 = vmatpush1.bf16.msra.mxu1 %v7707_v29  ;;  %5441 = vmatpush1.bf16.msra.mxu0 %v7709_v39 }
0x1dc5   :  { %5399 = vmatprep.subr.bf16.mxu1 %v7724_v51  ;;  %5442 = vmatprep.subr.bf16.mxu0 %v7726_v8 }
0x1dc8   :  { %5400 = vmatpush1.bf16.msra.mxu1 %v7723_v54  ;;  %5443 = vmatpush1.bf16.msra.mxu0 %v7725_v21 }
0x1dc9   :  { %8400 = vmatprep.subr.bf16.mxu1 %v9073_v22  ;;  %8422 = vmatprep.subr.bf16.mxu0 %v9074_v1 }
0x1dcb   :  { %7733 = vmatmul.mubr.msk.bf16.vlgmr.msra.gmra.mrb[120].mxu1 %vm134_vm0, %v10721_v2  ;;  %7734 = vmatmul.mubr.msk.bf16.vlgmr.msra.gmra.mrb[112].mxu0 %vm134_vm0, %v10721_v2  ;;  %v9082_v2 = vld [vmem:[%s11426_s11 + $0x4d0] sm:$0xff]  }
0x1dcc   :  { %8401 = vmatpush3.bf16.msra.mxu1 %v9075_v19  ;;  %8423 = vmatpush3.bf16.msra.mxu0 %v9076_v26 }
0x1dcd   :  { %8402 = vmatprep.subr.bf16.mxu1 %v9077_v23  ;;  %8424 = vmatprep.subr.bf16.mxu0 %v9078_v33 }
0x1dd0   :  { %8403 = vmatpush3.bf16.msra.mxu1 %v9079_v34  ;;  %8425 = vmatpush3.bf16.msra.mxu0 %v9080_v55 }
0x1dd1   :  { %8404 = vmatprep.subr.bf16.mxu1 %v9081_v56  ;;  %8426 = vmatprep.subr.bf16.mxu0 %v9082_v2 }
0x1dd4   :  { %8405 = vmatpush3.bf16.msra.mxu1 %v9083_v58  ;;  %8427 = vmatpush3.bf16.msra.mxu0 %v9084_v62 }
0x1dd5   :  { %8406 = vmatprep.subr.bf16.mxu1 %v9085_v63  ;;  %8428 = vmatprep.subr.bf16.mxu0 %v9086_v59 }
0x1dd8   :  { %8407 = vmatpush3.bf16.msra.mxu1 %v9087_v31  ;;  %8429 = vmatpush3.bf16.msra.mxu0 %v9088_v40  ;;  %v9107_v31 = vld [vmem:[%s11426_s11 + $0x500] sm:$0xff]  }
0x1dd9   :  { %8408 = vmatprep.subr.bf16.mxu1 %v9089_v60  ;;  %8430 = vmatprep.subr.bf16.mxu0 %v9090_v61  ;;  %v9108_v40 = vld [vmem:[%s11426_s11 + $0x580] sm:$0xff]   ;;  %v9109_v60 = vld [vmem:[%s11426_s11 + $0x548] sm:$0xff]  }
0x1dda   :  { %v9110_v61 = vld [vmem:[%s11426_s11 + $0x5c8] sm:$0xff]  }
0x1ddc   :  { %8409 = vmatpush3.bf16.msra.mxu1 %v9091_v45  ;;  %8431 = vmatpush3.bf16.msra.mxu0 %v9092_v57  ;;  %v9111_v45 = vld [vmem:[%s11426_s11 + $0x508] sm:$0xff]  }
0x1ddd   :  { %8410 = vmatprep.subr.bf16.mxu1 %v9093_v3  ;;  %8432 = vmatprep.subr.bf16.mxu0 %v9094_v43  ;;  %v9112_v57 = vld [vmem:[%s11426_s11 + $0x588] sm:$0xff]   ;;  %v4751_v3 = vrot.slane %v7661_v49, %v10045_v37  ;;  %v4759_v43 = vrot.slane %v7661_v49, %v10048_v38 }
0x1de0   :  { %8411 = vmatpush3.bf16.msra.mxu1 %v9095_v4  ;;  %8433 = vmatpush3.bf16.msra.mxu0 %v9096_v5  ;;  %v9113_v4 = vld [vmem:[%s11426_s11 + $0x550] sm:$0xff]  }
0x1de1   :  { %8412 = vmatprep.subr.bf16.mxu1 %v9097_v11  ;;  %8434 = vmatprep.subr.bf16.mxu0 %v9098_v13  ;;  %v9114_v5 = vld [vmem:[%s11426_s11 + $0x5d0] sm:$0xff]   ;;  %v4755_v11 = vrot.slane %v7661_v49, %v10051_v41  ;;  %v4763_v13 = vrot.slane %v7661_v49, %v10054_v42  ;;  %v9117_v49 = vld [vmem:[%s11426_s11 + $0x558] sm:$0xff]  }
0x1de4   :  { %8413 = vmatpush3.bf16.msra.mxu1 %v9099_v27  ;;  %8435 = vmatpush3.bf16.msra.mxu0 %v9100_v6 }
0x1de5   :  { %8414 = vmatprep.subr.bf16.mxu1 %v9101_v7  ;;  %8436 = vmatprep.subr.bf16.mxu0 %v9102_v52  ;;  %v9115_v7 = vld [vmem:[%s11426_s11 + $0x510] sm:$0xff]  }
0x1de6   :  { %v9116_v52 = vld [vmem:[%s11426_s11 + $0x590] sm:$0xff]  }
0x1de8   :  { %8415 = vmatpush3.bf16.msra.mxu1 %v9103_v24  ;;  %8437 = vmatpush3.bf16.msra.mxu0 %v9104_v35 }
0x1de9   :  { %8444 = vmatprep.subr.bf16.mxu1 %v9105_v47  ;;  %8466 = vmatprep.subr.bf16.mxu0 %v9106_v14 }
0x1e6e   :  { %v5169_v10 = vpop.f32.mrb[108].mxu1  ;;  %v5212_v32 = vpop.f32.mrb[100].mxu0 }
0x1e6f   :  { %v5170_v16 = vadd.f32 %v5169_v10, %v4735_v9  ;;  %v5213_v20 = vadd.f32 %v5212_v32, %v4743_v46  ;;  %v5171_v25 = vpop.f32.mrb[109].mxu1  ;;  %v5214_v28 = vpop.f32.mrb[101].mxu0 }
0x1e70   :  { %v5172_v36 = vadd.f32 %v5171_v25, %v4739_v50  ;;  %v5215_v30 = vadd.f32 %v5214_v28, %v4747_v48  ;;  %v5173_v29 = vpop.f32.mrb[110].mxu1  ;;  %v5216_v39 = vpop.f32.mrb[102].mxu0 }
0x1e71   :  { %v5174_v51 = vadd.f32 %v5173_v29, %v4735_v9  ;;  %v5217_v8 = vadd.f32 %v5216_v39, %v4743_v46  ;;  %v5175_v54 = vpop.f32.mrb[111].mxu1  ;;  %v5218_v21 = vpop.f32.mrb[103].mxu0  ;;  %v5479_v19 = vmax.f32 %v5170_v16, 0.0  ;;  %v5481_v26 = vmax.f32 %v5213_v20, 0.0  ;;  %v9118_v9 = vld [vmem:[%s11426_s11 + $0x5d8] sm:$0xff]  }
0x1e72   :  { %v5176_v22 = vadd.f32 %v5175_v54, %v4739_v50  ;;  %v5219_v1 = vadd.f32 %v5218_v21, %v4747_v48  ;;  %v5480_v34 = vmax.f32 %v5172_v36, 0.0  ;;  %v5482_v55 = vmax.f32 %v5215_v30, 0.0  ;;  %v9119_v30 = vld [vmem:[%s11426_s11 + $0x518] sm:$0xff]   ;;  %v9121_v21 = vld [vmem:[%s11426_s11 + $0x560] sm:$0xff]  }
0x1e73   :  { %v5495_v23 = vmax.f32 %v5174_v51, 0.0  ;;  %v5497_v33 = vmax.f32 %v5217_v8, 0.0  ;;  %v9120_v29 = vld [vmem:[%s11426_s11 + $0x598] sm:$0xff]  }
0x1e74   :  { %v5496_v56 = vmax.f32 %v5176_v22, 0.0  ;;  %v5498_v2 = vmax.f32 %v5219_v1, 0.0  ;;  %v9122_v22 = vld [vmem:[%s11426_s11 + $0x5e0] sm:$0xff]  }
0x1e75   :  { %v5511_v58 = vpack.c.bf16 %v5495_v23, %v5479_v19  ;;  %v5513_v62 = vpack.c.bf16 %v5497_v33, %v5481_v26 }
0x1e76   :  { %v5512_v63 = vpack.c.bf16 %v5496_v56, %v5480_v34  ;;  %v5514_v59 = vpack.c.bf16 %v5498_v2, %v5482_v55  ;;  %v9123_v2 = vld [vmem:[%s11426_s11 + $0x520] sm:$0xff]  }
0x1e78   :  { %6592 = vmatprep.mubr.bf16.mxu1 %v5512_v63  ;;  %6633 = vmatprep.mubr.bf16.mxu0 %v5514_v59  ;;  %v9126_v63 = vld [vmem:[%s11426_s11 + $0x5e8] sm:$0xff]   ;;  %v11045_v59 = vld [vmem:[%s11429_s10 + $0x18] sm:$0xff] }
0x1e79   :  { %6593 = vmatmul.mubr.bf16.vlgmr.msra.gmra.mrb[124].mxu1 %v5511_v58  ;;  %6634 = vmatmul.mubr.bf16.vlgmr.msra.gmra.mrb[116].mxu0 %v5513_v62  ;;  %v9124_v58 = vld [vmem:[%s11426_s11 + $0x5a0] sm:$0xff]   ;;  %v9125_v62 = vld [vmem:[%s11426_s11 + $0x568] sm:$0xff]  }
0x1e7a   :  { %8445 = vmatpush3.bf16.msra.mxu1 %v9107_v31  ;;  %8467 = vmatpush3.bf16.msra.mxu0 %v9108_v40  ;;  %v9127_v31 = vld [vmem:[%s11426_s11 + $0x528] sm:$0xff]  }
0x1e7b   :  { %8446 = vmatprep.subr.bf16.mxu1 %v9109_v60  ;;  %8468 = vmatprep.subr.bf16.mxu0 %v9110_v61  ;;  %v9128_v40 = vld [vmem:[%s11426_s11 + $0x5a8] sm:$0xff]   ;;  %v4767_v60 = vrot.slane %v11045_v59, %v9465_v15  ;;  %v4775_v61 = vrot.slane %v11045_v59, %v10020_v18  ;;  %v9131_v15 = vld [vmem:[%s11426_s11 + $0x530] sm:$0xff]  }
0x1e7c   :  { %v9132_v18 = vld [vmem:[%s11426_s11 + $0x5b0] sm:$0xff]  }
0x1e7e   :  { %v5255_v27 = vpop.f32.mrb[112].mxu1  ;;  %v5298_v6 = vpop.f32.mrb[104].mxu0  ;;  %8447 = vmatpush3.bf16.msra.mxu1 %v9111_v45  ;;  %8469 = vmatpush3.bf16.msra.mxu0 %v9112_v57  ;;  %v9129_v45 = vld [vmem:[%s11426_s11 + $0x570] sm:$0xff]  }
0x1e7f   :  { %v5256_v24 = vadd.f32 %v5255_v27, %v4751_v3  ;;  %v5299_v35 = vadd.f32 %v5298_v6, %v4759_v43  ;;  %v5257_v47 = vpop.f32.mrb[113].mxu1  ;;  %v5300_v14 = vpop.f32.mrb[105].mxu0  ;;  %8448 = vmatprep.subr.bf16.mxu1 %v9113_v4  ;;  %8470 = vmatprep.subr.bf16.mxu0 %v9114_v5  ;;  %v9130_v57 = vld [vmem:[%s11426_s11 + $0x5f0] sm:$0xff]  }
0x1e80   :  { %v5258_v46 = vadd.f32 %v5257_v47, %v4755_v11  ;;  %v5301_v50 = vadd.f32 %v5300_v14, %v4763_v13  ;;  %v5259_v48 = vpop.f32.mrb[114].mxu1  ;;  %v5302_v10 = vpop.f32.mrb[106].mxu0 }
0x1e81   :  { %v5260_v32 = vadd.f32 %v5259_v48, %v4751_v3  ;;  %v5303_v16 = vadd.f32 %v5302_v10, %v4759_v43  ;;  %v5261_v20 = vpop.f32.mrb[115].mxu1  ;;  %v5304_v25 = vpop.f32.mrb[107].mxu0  ;;  %v5483_v39 = vmax.f32 %v5256_v24, 0.0  ;;  %v5485_v51 = vmax.f32 %v5299_v35, 0.0  ;;  %v9135_v48 = vld [vmem:[%s11426_s11 + $0x538] sm:$0xff]  }
0x1e82   :  { %v5262_v28 = vadd.f32 %v5261_v20, %v4755_v11  ;;  %v5305_v36 = vadd.f32 %v5304_v25, %v4763_v13  ;;  %8449 = vmatpush3.bf16.msra.mxu1 %v9115_v7  ;;  %8471 = vmatpush3.bf16.msra.mxu0 %v9116_v52  ;;  %v5484_v1 = vmax.f32 %v5258_v46, 0.0  ;;  %v5486_v19 = vmax.f32 %v5301_v50, 0.0  ;;  %v9136_v10 = vld [vmem:[%s11426_s11 + $0x5b8] sm:$0xff]  }
0x1e83   :  { %v5499_v8 = vmax.f32 %v5260_v32, 0.0  ;;  %v5501_v54 = vmax.f32 %v5303_v16, 0.0  ;;  %8450 = vmatprep.subr.bf16.mxu1 %v9117_v49  ;;  %8472 = vmatprep.subr.bf16.mxu0 %v9118_v9  ;;  %v4771_v3 = vrot.slane %v11045_v59, %v9471_v17  ;;  %v4779_v43 = vrot.slane %v11045_v59, %v10026_v53  ;;  %v9133_v17 = vld [vmem:[%s11426_s11 + $0x578] sm:$0xff]  }
0x1e84   :  { %v5500_v26 = vmax.f32 %v5262_v28, 0.0  ;;  %v5502_v23 = vmax.f32 %v5305_v36, 0.0  ;;  %v9134_v53 = vld [vmem:[%s11426_s11 + $0x5f8] sm:$0xff]   ;;  %v9137_v28 = vld [vmem:[%s11426_s11 + $0x640] sm:$0xff]  }
0x1e85   :  { %v11026_v33 = vpack.c.bf16 %v5499_v8, %v5483_v39  ;;  %v11028_v34 = vpack.c.bf16 %v5501_v54, %v5485_v51  ;;  %v9138_v36 = vld [vmem:[%s11426_s11 + $0x6c0] sm:$0xff]  }
0x1e86   :  { %v5516_v55 = vpack.c.bf16 %v5500_v26, %v5484_v1  ;;  %v5518_v56 = vpack.c.bf16 %v5502_v23, %v5486_v19  ;;  %8451 = vmatpush3.bf16.msra.mxu1 %v9119_v30  ;;  %8473 = vmatpush3.bf16.msra.mxu0 %v9120_v29  ;;  %v9139_v1 = vld [vmem:[%s11426_s11 + $0x600] sm:$0xff]   ;;  %v9141_v26 = vld [vmem:[%s11426_s11 + $0x648] sm:$0xff]  }
0x1e87   :  { %8452 = vmatprep.subr.bf16.mxu1 %v9121_v21  ;;  %8474 = vmatprep.subr.bf16.mxu0 %v9122_v22  ;;  %v9140_v19 = vld [vmem:[%s11426_s11 + $0x680] sm:$0xff]   ;;  %v9142_v23 = vld [vmem:[%s11426_s11 + $0x6c8] sm:$0xff]  }
0x1e88   :  { %6674 = vmatprep.mubr.bf16.mxu1 %v5516_v55  ;;  %6715 = vmatprep.mubr.bf16.mxu0 %v5518_v56  ;;  %v9143_v55 = vld [vmem:[%s11426_s11 + $0x608] sm:$0xff]   ;;  %v4783_v56 = vrot.slane %v11045_v59, %v10045_v37  ;;  %v9146_v37 = vld [vmem:[%s11426_s11 + $0x6d0] sm:$0xff]  }
0x1e8a   :  { %8453 = vmatpush3.bf16.msra.mxu1 %v9123_v2  ;;  %8475 = vmatpush3.bf16.msra.mxu0 %v9124_v58  ;;  %v4791_v2 = vrot.slane %v11045_v59, %v10048_v38  ;;  %v4787_v58 = vrot.slane %v11045_v59, %v10051_v41  ;;  %v9148_v41 = vld [vmem:[%s11426_s11 + $0x690] sm:$0xff]  }
0x1e8b   :  { %8454 = vmatprep.subr.bf16.mxu1 %v9125_v62  ;;  %8476 = vmatprep.subr.bf16.mxu0 %v9126_v63  ;;  %v4795_v62 = vrot.slane %v11045_v59, %v10054_v42  ;;  %v9149_v42 = vld [vmem:[%s11426_s11 + $0x658] sm:$0xff]  }
0x1e8e   :  { %v5341_v4 = vpop.f32.mrb[116].mxu1  ;;  %v5384_v5 = vpop.f32.mrb[108].mxu0  ;;  %8455 = vmatpush3.bf16.msra.mxu1 %v9127_v31  ;;  %8477 = vmatpush3.bf16.msra.mxu0 %v9128_v40  ;;  %v9147_v31 = vld [vmem:[%s11426_s11 + $0x610] sm:$0xff]  }
0x1e8f   :  { %v5342_v11 = vadd.f32 %v5341_v4, %v4767_v60  ;;  %v5385_v13 = vadd.f32 %v5384_v5, %v4775_v61  ;;  %v5343_v27 = vpop.f32.mrb[117].mxu1  ;;  %v5386_v6 = vpop.f32.mrb[109].mxu0  ;;  %8456 = vmatprep.subr.bf16.mxu1 %v9129_v45  ;;  %8478 = vmatprep.subr.bf16.mxu0 %v9130_v57  ;;  %v9150_v4 = vld [vmem:[%s11426_s11 + $0x6d8] sm:$0xff]  }
0x1e90   :  { %v5344_v7 = vadd.f32 %v5343_v27, %v4771_v3  ;;  %v5387_v52 = vadd.f32 %v5386_v6, %v4779_v43  ;;  %v5345_v24 = vpop.f32.mrb[118].mxu1  ;;  %v5388_v35 = vpop.f32.mrb[110].mxu0  ;;  %v9151_v6 = vld [vmem:[%s11426_s11 + $0x618] sm:$0xff]  }
0x1e91   :  { %v5346_v47 = vadd.f32 %v5345_v24, %v4767_v60  ;;  %v5389_v14 = vadd.f32 %v5388_v35, %v4775_v61  ;;  %v5347_v49 = vpop.f32.mrb[119].mxu1  ;;  %v5390_v9 = vpop.f32.mrb[111].mxu0  ;;  %v5487_v32 = vmax.f32 %v5342_v11, 0.0  ;;  %v5489_v16 = vmax.f32 %v5385_v13, 0.0  ;;  %v9152_v24 = vld [vmem:[%s11426_s11 + $0x698] sm:$0xff]   ;;  %v9153_v35 = vld [vmem:[%s11426_s11 + $0x660] sm:$0xff]  }
0x1e92   :  { %v5348_v46 = vadd.f32 %v5347_v49, %v4771_v3  ;;  %v5391_v50 = vadd.f32 %v5390_v9, %v4779_v43  ;;  %8457 = vmatpush3.bf16.msra.mxu1 %v9131_v15  ;;  %8479 = vmatpush3.bf16.msra.mxu0 %v9132_v18  ;;  %v5488_v30 = vmax.f32 %v5344_v7, 0.0  ;;  %v5490_v29 = vmax.f32 %v5387_v52, 0.0 }
0x1e93   :  { %v5503_v20 = vmax.f32 %v5346_v47, 0.0  ;;  %v5505_v25 = vmax.f32 %v5389_v14, 0.0  ;;  %8458 = vmatprep.subr.bf16.mxu1 %v9133_v17  ;;  %8480 = vmatprep.subr.bf16.mxu0 %v9134_v53 }
0x1e94   :  { %v5504_v39 = vmax.f32 %v5348_v46, 0.0  ;;  %v5506_v51 = vmax.f32 %v5391_v50, 0.0  ;;  %v9154_v46 = vld [vmem:[%s11426_s11 + $0x6e0] sm:$0xff]  }
0x1e95   :  { %v11091_v8 = vpack.c.bf16 %v5503_v20, %v5487_v32  ;;  %v11093_v54 = vpack.c.bf16 %v5505_v25, %v5489_v16  ;;  %v9155_v16 = vld [vmem:[%s11426_s11 + $0x620] sm:$0xff]   ;;  %v9157_v25 = vld [vmem:[%s11426_s11 + $0x668] sm:$0xff]  }
0x1e96   :  { %v5520_v21 = vpack.c.bf16 %v5504_v39, %v5488_v30  ;;  %v5522_v22 = vpack.c.bf16 %v5506_v51, %v5490_v29  ;;  %8459 = vmatpush3.bf16.msra.mxu1 %v9135_v48  ;;  %8481 = vmatpush3.bf16.msra.mxu0 %v9136_v10  ;;  %v9156_v20 = vld [vmem:[%s11426_s11 + $0x6a0] sm:$0xff]   ;;  %v9160_v30 = vld [vmem:[%s11426_s11 + $0x6a8] sm:$0xff]   ;;  %v9161_v29 = vld [vmem:[%s11426_s11 + $0x670] sm:$0xff]  }
0x1e97   :  { %8488 = vmatprep.subr.bf16.mxu1 %v9137_v28  ;;  %8510 = vmatprep.subr.bf16.mxu0 %v9138_v36  ;;  %v9158_v28 = vld [vmem:[%s11426_s11 + $0x6e8] sm:$0xff]   ;;  %v9162_v39 = vld [vmem:[%s11426_s11 + $0x6f0] sm:$0xff]  }
0x1e98   :  { %v9159_v36 = vld [vmem:[%s11426_s11 + $0x628] sm:$0xff]   ;;  %v9163_v51 = vld [vmem:[%s11426_s11 + $0x630] sm:$0xff]  }
0x1e99   :  { %6675 = vmatmul.mubr.bf16.vlgmr.msra.gmra.mrb[128].mxu1 %v11026_v33  ;;  %6716 = vmatmul.mubr.bf16.vlgmr.msra.gmra.mrb[120].mxu0 %v11028_v34  ;;  %v9144_v33 = vld [vmem:[%s11426_s11 + $0x688] sm:$0xff]   ;;  %v9145_v34 = vld [vmem:[%s11426_s11 + $0x650] sm:$0xff]  }
0x1e9a   :  { %8489 = vmatpush3.bf16.msra.mxu1 %v9139_v1  ;;  %6756 = vmatprep.mubr.bf16.mxu1 %v5520_v21  ;;  %v9164_v21 = vld [vmem:[%s11426_s11 + $0x6b0] sm:$0xff]   ;;  %v9166_v1 = vld [vmem:[%s11426_s11 + $0x6f8] sm:$0xff]  }
0x1e9b   :  { %8511 = vmatpush3.bf16.msra.mxu0 %v9140_v19  ;;  %6797 = vmatprep.mubr.bf16.mxu0 %v5522_v22  ;;  %v9165_v22 = vld [vmem:[%s11426_s11 + $0x678] sm:$0xff]  }
0x1e9c   :  { %8490 = vmatprep.subr.bf16.mxu1 %v9141_v26  ;;  %8512 = vmatprep.subr.bf16.mxu0 %v9142_v23  ;;  %v9167_v19 = vld [vmem:[%s11426_s11 + $0x638] sm:$0xff]   ;;  %v9169_v23 = vld [vmem:[%s11426_s11 + $0x740] sm:$0xff]  }
0x1e9d   :  { %v9168_v26 = vld [vmem:[%s11426_s11 + $0x6b8] sm:$0xff]  }
0x1e9e   :  { %v5427_v38 = vpop.f32.mrb[120].mxu1  ;;  %v5470_v63 = vpop.f32.mrb[112].mxu0  ;;  %8491 = vmatpush3.bf16.msra.mxu1 %v9143_v55  ;;  %v9170_v55 = vld [vmem:[%s11426_s11 + $0x7c0] sm:$0xff]  }
0x1e9f   :  { %v5428_v40 = vadd.f32 %v5427_v38, %v4783_v56  ;;  %v5471_v60 = vadd.f32 %v5470_v63, %v4791_v2  ;;  %8513 = vmatpush3.bf16.msra.mxu0 %v9144_v33  ;;  %v5429_v61 = vpop.f32.mrb[121].mxu1  ;;  %v5472_v45 = vpop.f32.mrb[113].mxu0  ;;  %8492 = vmatprep.subr.bf16.mxu1 %v9145_v34  ;;  %v9173_v33 = vld [vmem:[%s11426_s11 + $0x748] sm:$0xff]   ;;  %v9180_v38 = vld [vmem:[%s11426_s11 + $0x790] sm:$0xff]   ;;  %v9181_v63 = vld [vmem:[%s11426_s11 + $0x758] sm:$0xff]  }
0x1ea0   :  { %v5430_v59 = vadd.f32 %v5429_v61, %v4787_v58  ;;  %v5473_v57 = vadd.f32 %v5472_v45, %v4795_v62  ;;  %v5431_v3 = vpop.f32.mrb[122].mxu1  ;;  %v5474_v43 = vpop.f32.mrb[114].mxu0  ;;  %8514 = vmatprep.subr.bf16.mxu0 %v9146_v37  ;;  %v9174_v34 = vld [vmem:[%s11426_s11 + $0x7c8] sm:$0xff]   ;;  %v9179_v37 = vld [vmem:[%s11426_s11 + $0x710] sm:$0xff]   ;;  %v9185_v61 = vld [vmem:[%s11426_s11 + $0x760] sm:$0xff]  }
0x1ea1   :  { %v5432_v5 = vadd.f32 %v5431_v3, %v4783_v56  ;;  %v5475_v15 = vadd.f32 %v5474_v43, %v4791_v2  ;;  %v5433_v18 = vpop.f32.mrb[123].mxu1  ;;  %v5476_v11 = vpop.f32.mrb[115].mxu0  ;;  %v5491_v17 = vmax.f32 %v5428_v40, 0.0  ;;  %v5493_v53 = vmax.f32 %v5471_v60, 0.0  ;;  %v9171_v56 = vld [vmem:[%s11426_s11 + $0x700] sm:$0xff]   ;;  %v9183_v40 = vld [vmem:[%s11426_s11 + $0x718] sm:$0xff]  }
0x1ea2   :  { %v5434_v13 = vadd.f32 %v5433_v18, %v4787_v58  ;;  %v5477_v27 = vadd.f32 %v5476_v11, %v4795_v62  ;;  %8493 = vmatpush3.bf16.msra.mxu1 %v9147_v31  ;;  %v5492_v47 = vmax.f32 %v5430_v59, 0.0  ;;  %v5494_v14 = vmax.f32 %v5473_v57, 0.0  ;;  %v9172_v2 = vld [vmem:[%s11426_s11 + $0x780] sm:$0xff]   ;;  %v9175_v58 = vld [vmem:[%s11426_s11 + $0x708] sm:$0xff]   ;;  %v9182_v31 = vld [vmem:[%s11426_s11 + $0x7d8] sm:$0xff]  }
0x1ea3   :  { %v5507_v7 = vmax.f32 %v5432_v5, 0.0  ;;  %v5509_v52 = vmax.f32 %v5475_v15, 0.0  ;;  %8515 = vmatpush3.bf16.msra.mxu0 %v9148_v41  ;;  %8494 = vmatprep.subr.bf16.mxu1 %v9149_v42  ;;  %v9176_v62 = vld [vmem:[%s11426_s11 + $0x788] sm:$0xff]   ;;  %v9184_v60 = vld [vmem:[%s11426_s11 + $0x798] sm:$0xff]   ;;  %v9186_v45 = vld [vmem:[%s11426_s11 + $0x7e0] sm:$0xff]  }
0x1ea4   :  { %v5508_v49 = vmax.f32 %v5434_v13, 0.0  ;;  %v5510_v9 = vmax.f32 %v5477_v27, 0.0  ;;  %8516 = vmatprep.subr.bf16.mxu0 %v9150_v4  ;;  %v9187_v41 = vld [vmem:[%s11426_s11 + $0x720] sm:$0xff]   ;;  %v9189_v59 = vld [vmem:[%s11426_s11 + $0x768] sm:$0xff]   ;;  %v9193_v4 = vld [vmem:[%s11426_s11 + $0x770] sm:$0xff]  }
0x1ea5   :  { %v11153_v50 = vpack.c.bf16 %v5507_v7, %v5491_v17  ;;  %v11155_v48 = vpack.c.bf16 %v5509_v52, %v5493_v53  ;;  %v9188_v42 = vld [vmem:[%s11426_s11 + $0x7a0] sm:$0xff]   ;;  %v9190_v57 = vld [vmem:[%s11426_s11 + $0x7e8] sm:$0xff]   ;;  %v9194_v5 = vld [vmem:[%s11426_s11 + $0x7f0] sm:$0xff]  }
0x1ea6   :  { %v5524_v10 = vpack.c.bf16 %v5508_v49, %v5492_v47  ;;  %v5526_v32 = vpack.c.bf16 %v5510_v9, %v5494_v14  ;;  %8495 = vmatpush3.bf16.msra.mxu1 %v9151_v6  ;;  %v9191_v3 = vld [vmem:[%s11426_s11 + $0x728] sm:$0xff]   ;;  %v9195_v15 = vld [vmem:[%s11426_s11 + $0x730] sm:$0xff]   ;;  %v9197_v11 = vld [vmem:[%s11426_s11 + $0x778] sm:$0xff]  }
0x1ea7   :  { %8517 = vmatpush3.bf16.msra.mxu0 %v9152_v24  ;;  %8496 = vmatprep.subr.bf16.mxu1 %v9153_v35  ;;  %v9192_v43 = vld [vmem:[%s11426_s11 + $0x7a8] sm:$0xff]   ;;  %v9196_v18 = vld [vmem:[%s11426_s11 + $0x7b0] sm:$0xff]   ;;  %v9198_v13 = vld [vmem:[%s11426_s11 + $0x7f8] sm:$0xff]  }
0x1ea8   :  { %8518 = vmatprep.subr.bf16.mxu0 %v9154_v46  ;;  %v9199_v27 = vld [vmem:[%s11426_s11 + $0x738] sm:$0xff]   ;;  %v7992_v7 = vld [vmem:[%s11430_s12 + $0x1] ss:$0 sm:$0xff] }
0x1ea9   :  { %v9200_v6 = vld [vmem:[%s11426_s11 + $0x7b8] sm:$0xff]  }
0x1eaa   :  { %8497 = vmatpush3.bf16.msra.mxu1 %v9155_v16 }
0x1eab   :  { %8519 = vmatpush3.bf16.msra.mxu0 %v9156_v20  ;;  %8498 = vmatprep.subr.bf16.mxu1 %v9157_v25 }
0x1eac   :  { %8520 = vmatprep.subr.bf16.mxu0 %v9158_v28 }
0x1eae   :  { %8499 = vmatpush3.bf16.msra.mxu1 %v9159_v36 }
0x1eaf   :  { %8521 = vmatpush3.bf16.msra.mxu0 %v9160_v30  ;;  %8500 = vmatprep.subr.bf16.mxu1 %v9161_v29 }
0x1eb0   :  { %8522 = vmatprep.subr.bf16.mxu0 %v9162_v39 }
0x1eb2   :  { %8501 = vmatpush3.bf16.msra.mxu1 %v9163_v51 }
0x1eb3   :  { %8523 = vmatpush3.bf16.msra.mxu0 %v9164_v21  ;;  %8502 = vmatprep.subr.bf16.mxu1 %v9165_v22 }
0x1eb4   :  { %8524 = vmatprep.subr.bf16.mxu0 %v9166_v1 }
0x1eb6   :  { %8503 = vmatpush3.bf16.msra.mxu1 %v9167_v19 }
0x1eb7   :  { %8525 = vmatpush3.bf16.msra.mxu0 %v9168_v26  ;;  %8532 = vmatprep.subr.bf16.mxu1 %v9169_v23 }
0x1eb8   :  { %8554 = vmatprep.subr.bf16.mxu0 %v9170_v55 }
0x1eb9   :  { %6757 = vmatmul.mubr.bf16.vlgmr.msra.gmra.mrb[132].mxu1 %v11091_v8  ;;  %v9177_v8 = vld [vmem:[%s11426_s11 + $0x750] sm:$0xff]  }
0x1eba   :  { %6798 = vmatmul.mubr.bf16.vlgmr.msra.gmra.mrb[124].mxu0 %v11093_v54  ;;  %8533 = vmatpush3.bf16.msra.mxu1 %v9171_v56  ;;  %v9178_v54 = vld [vmem:[%s11426_s11 + $0x7d0] sm:$0xff]  }
0x1ebb   :  { %6838 = vmatprep.mubr.bf16.mxu1 %v5524_v10  ;;  %8555 = vmatpush3.bf16.msra.mxu0 %v9172_v2 }
0x1ebc   :  { %6879 = vmatprep.mubr.bf16.mxu0 %v5526_v32  ;;  %8534 = vmatprep.subr.bf16.mxu1 %v9173_v33 }
0x1ebd   :  { %8556 = vmatprep.subr.bf16.mxu0 %v9174_v34 }
0x1ebe   :  { %8535 = vmatpush3.bf16.msra.mxu1 %v9175_v58 }
0x1ebf   :  { %8557 = vmatpush3.bf16.msra.mxu0 %v9176_v62  ;;  %8536 = vmatprep.subr.bf16.mxu1 %v9177_v8 }
0x1ec0   :  { %8558 = vmatprep.subr.bf16.mxu0 %v9178_v54 }
0x1ec2   :  { %8537 = vmatpush3.bf16.msra.mxu1 %v9179_v37 }
0x1ec3   :  { %8559 = vmatpush3.bf16.msra.mxu0 %v9180_v38  ;;  %8538 = vmatprep.subr.bf16.mxu1 %v9181_v63 }
0x1ec4   :  { %8560 = vmatprep.subr.bf16.mxu0 %v9182_v31 }
0x1ec6   :  { %8539 = vmatpush3.bf16.msra.mxu1 %v9183_v40 }
0x1ec7   :  { %8561 = vmatpush3.bf16.msra.mxu0 %v9184_v60  ;;  %8540 = vmatprep.subr.bf16.mxu1 %v9185_v61 }
0x1ec8   :  { %8562 = vmatprep.subr.bf16.mxu0 %v9186_v45 }
0x1eca   :  { %8541 = vmatpush3.bf16.msra.mxu1 %v9187_v41 }
0x1ecb   :  { %8563 = vmatpush3.bf16.msra.mxu0 %v9188_v42  ;;  %8542 = vmatprep.subr.bf16.mxu1 %v9189_v59 }
0x1ecc   :  { %8564 = vmatprep.subr.bf16.mxu0 %v9190_v57 }
0x1ece   :  { %8543 = vmatpush3.bf16.msra.mxu1 %v9191_v3 }
0x1ecf   :  { %8565 = vmatpush3.bf16.msra.mxu0 %v9192_v43  ;;  %8544 = vmatprep.subr.bf16.mxu1 %v9193_v4 }
0x1ed0   :  { %8566 = vmatprep.subr.bf16.mxu0 %v9194_v5 }
0x1ed2   :  { %8545 = vmatpush3.bf16.msra.mxu1 %v9195_v15 }
0x1ed3   :  { %8567 = vmatpush3.bf16.msra.mxu0 %v9196_v18  ;;  %8546 = vmatprep.subr.bf16.mxu1 %v9197_v11 }
0x1ed4   :  { %8568 = vmatprep.subr.bf16.mxu0 %v9198_v13 }
0x1ed6   :  { %8547 = vmatpush3.bf16.msra.mxu1 %v9199_v27 }
0x1ed7   :  { %8569 = vmatpush3.bf16.msra.mxu0 %v9200_v6  ;;  %8816 = vmatprep.subr.bf16.mxu1 %v9302_v12 }
0x1ed8   :  { %8828 = vmatprep.subr.bf16.mxu0 %v9302_v12 }
0x1ed9   :  { %6839 = vmatmul.mubr.bf16.vlgmr.msra.gmra.mrb[136].mxu1 %v11153_v50 }
0x1eda   :  { %6880 = vmatmul.mubr.bf16.vlgmr.msra.gmra.mrb[128].mxu0 %v11155_v48  ;;  %8824 = vmatprep.mubr.msk.bf16.mxu1 %vm9303_vm1, %v9302_v12 }
0x1edb   :  { %8836 = vmatprep.mubr.msk.bf16.mxu0 %vm9303_vm1, %v9302_v12 }
0x1f4c   :  { %v8416_v17 = vpop.f32.mrb[124].mxu1  ;;  %v8438_v53 = vpop.f32.mrb[116].mxu0 }
0x1f4d   :  { %v8417_v52 = vpop.f32.mrb[125].mxu1  ;;  %v8439_v24 = vpop.f32.mrb[117].mxu0 }
0x1f4e   :  { %v8418_v35 = vadd.f32 %v8417_v52, %v8416_v17  ;;  %v8440_v47 = vadd.f32 %v8439_v24, %v8438_v53  ;;  %v8419_v14 = vpop.f32.mrb[126].mxu1  ;;  %v8441_v49 = vpop.f32.mrb[118].mxu0 }
0x1f4f   :  { %v8420_v9 = vpop.f32.mrb[127].mxu1  ;;  %v8442_v46 = vpop.f32.mrb[119].mxu0 }
0x1f50   :  { %v6595_v50 = vadd.f32 %v8418_v35, %v7992_v7  ;;  %v8421_v48 = vadd.f32 %v8420_v9, %v8419_v14  ;;  %v8443_v10 = vadd.f32 %v8442_v46, %v8441_v49 }
0x1f52   :  { %v6636_v32 = vadd.f32 %v8440_v47, %v6595_v50  ;;  %v6598_v16 = vadd.f32 %v8421_v48, %v7992_v7 }
0x1f54   :  { %v6639_v20 = vadd.f32 %v8443_v10, %v6598_v16 }
0x1f6c   :  { %v8460_v25 = vpop.f32.mrb[128].mxu1  ;;  %v8482_v28 = vpop.f32.mrb[120].mxu0 }
0x1f6d   :  { %v8461_v36 = vpop.f32.mrb[129].mxu1  ;;  %v8483_v30 = vpop.f32.mrb[121].mxu0 }
0x1f6e   :  { %v8462_v29 = vadd.f32 %v8461_v36, %v8460_v25  ;;  %v8484_v39 = vadd.f32 %v8483_v30, %v8482_v28  ;;  %v8463_v51 = vpop.f32.mrb[130].mxu1  ;;  %v8485_v21 = vpop.f32.mrb[122].mxu0  ;;  %v9202_v25 = vld [vmem:[%s11434_s15] sm:$0xff]   ;;  %v9203_v28 = vld [vmem:[%s11433_s16 + $0x8] sm:$0xff]   ;;  %v9205_v30 = vld [vmem:[%s11433_s16 + $0x10] sm:$0xff]  }
0x1f6f   :  { %v8464_v22 = vpop.f32.mrb[131].mxu1  ;;  %v8486_v1 = vpop.f32.mrb[123].mxu0  ;;  %8829 = vmatpush3.bf16.msra.mxu0 %v9202_v25  ;;  %v9204_v36 = vld [vmem:[%s11434_s15 + $0x8] sm:$0xff]  }
0x1f70   :  { %v6677_v19 = vadd.f32 %v8462_v29, %v6636_v32  ;;  %v8465_v26 = vadd.f32 %v8464_v22, %v8463_v51  ;;  %v8487_v23 = vadd.f32 %v8486_v1, %v8485_v21  ;;  %8830 = vmatprep.subr.bf16.mxu0 %v9302_v12  ;;  %v9206_v29 = vld [vmem:[%s11434_s15 + $0x10] sm:$0xff]   ;;  %v9208_v51 = vld [vmem:[%s11434_s15 + $0x18] sm:$0xff]   ;;  %v6936_v21 = vld [vmem:[%s11435_s1] sm:$0x3] }
0x1f71   :  { %v6937_v22 = vpack.c.bf16 %v6936_v21, %v6936_v21  ;;  %v9213_v1 = vld [vmem:[%s11437_s19] sm:$0xff]  }
0x1f72   :  { %v6718_v55 = vadd.f32 %v8484_v39, %v6677_v19  ;;  %v6680_v56 = vadd.f32 %v8465_v26, %v6639_v20  ;;  %v9207_v39 = vld [vmem:[%s11433_s16 + $0x18] sm:$0xff]   ;;  %v9214_v19 = vld [vmem:[%s11437_s19 + $0x8] sm:$0xff]  }
0x1f73   :  { %8831 = vmatpush3.bf16.msra.mxu0 %v9204_v36 }
0x1f74   :  { %v6721_v2 = vadd.f32 %v8487_v23, %v6680_v56  ;;  %8832 = vmatprep.subr.bf16.mxu0 %v9302_v12 }
0x1f77   :  { %8833 = vmatpush3.bf16.msra.mxu0 %v9206_v29 }
0x1f78   :  { %8834 = vmatprep.subr.bf16.mxu0 %v9302_v12 }
0x1f7b   :  { %8835 = vmatpush3.bf16.msra.mxu0 %v9208_v51 }
0x1f7c   :  { %8852 = vmatprep.subr.bf16.mxu0 %v9302_v12 }
0x1f7e   :  { %8837 = vmatmul.mubr.msk.bf16.vlgmr.msra.gmra.mrb[132].mxu0 %vm134_vm0, %v6937_v22 }
0x1f7f   :  { %8868 = vmatprep.mubr.msk.bf16.mxu0 %vm9303_vm1, %v9302_v12  ;;  %8853 = vmatpush3.bf16.msra.mxu0 %v9213_v1 }
0x1f80   :  { %8854 = vmatprep.subr.bf16.mxu0 %v9302_v12 }
0x1f83   :  { %8855 = vmatpush3.bf16.msra.mxu0 %v9214_v19 }
0x1f84   :  { %8856 = vmatprep.subr.bf16.mxu0 %v9302_v12 }
0x1f8c   :  { %v8504_v33 = vpop.f32.mrb[132].mxu1 }
0x1f8d   :  { %v8526_v34 = vpop.f32.mrb[124].mxu0  ;;  %v8505_v58 = vpop.f32.mrb[133].mxu1 }
0x1f8e   :  { %v8506_v62 = vadd.f32 %v8505_v58, %v8504_v33  ;;  %v8527_v8 = vpop.f32.mrb[125].mxu0  ;;  %v8507_v54 = vpop.f32.mrb[134].mxu1  ;;  %v8123_v58 = vld [vmem:[%s11431_s13 + $0x1] ss:$0 sm:$0xff] }
0x1f8f   :  { %v8528_v37 = vadd.f32 %v8527_v8, %v8526_v34  ;;  %v8529_v38 = vpop.f32.mrb[126].mxu0  ;;  %v8508_v63 = vpop.f32.mrb[135].mxu1 }
0x1f90   :  { %v6759_v31 = vadd.f32 %v8506_v62, %v6718_v55  ;;  %v8509_v40 = vadd.f32 %v8508_v63, %v8507_v54  ;;  %v8530_v60 = vpop.f32.mrb[127].mxu0  ;;  %v8124_v54 = vld [vmem:[%s11432_s14 + $0x1] ss:$0 sm:$0xff] }
0x1f91   :  { %v8531_v61 = vadd.f32 %v8530_v60, %v8529_v38 }
0x1f92   :  { %v6800_v45 = vadd.f32 %v8528_v37, %v6759_v31  ;;  %v6762_v41 = vadd.f32 %v8509_v40, %v6721_v2 }
0x1f94   :  { %v6803_v42 = vadd.f32 %v8531_v61, %v6762_v41 }
0x1fac   :  { %v8548_v59 = vpop.f32.mrb[136].mxu1 }
0x1fad   :  { %v8570_v57 = vpop.f32.mrb[128].mxu0  ;;  %v8549_v3 = vpop.f32.mrb[137].mxu1 }
0x1fae   :  { %v8550_v43 = vadd.f32 %v8549_v3, %v8548_v59  ;;  %v8571_v4 = vpop.f32.mrb[129].mxu0  ;;  %v8551_v5 = vpop.f32.mrb[138].mxu1  ;;  %v9209_v3 = vld [vmem:[%s11436_s17] sm:$0xff]  }
0x1faf   :  { %v8572_v15 = vadd.f32 %v8571_v4, %v8570_v57  ;;  %v8573_v18 = vpop.f32.mrb[130].mxu0  ;;  %v8552_v11 = vpop.f32.mrb[139].mxu1  ;;  %v9210_v4 = vld [vmem:[%s11436_s17 + $0x8] sm:$0xff]  }
0x1fb0   :  { %v6841_v13 = vadd.f32 %v8550_v43, %v6800_v45  ;;  %v8553_v27 = vadd.f32 %v8552_v11, %v8551_v5  ;;  %v8574_v6 = vpop.f32.mrb[131].mxu0  ;;  %v9211_v5 = vld [vmem:[%s11436_s17 + $0x10] sm:$0xff]  }
0x1fb1   :  { %v8575_v17 = vadd.f32 %v8574_v6, %v8573_v18  ;;  %v7099_v18 = vld [vmem:[%s11438_s2] sm:$0x3]  ;;  %v9216_v6 = vld [vmem:[%s11437_s19 + $0x18] sm:$0xff]  }
0x1fb2   :  { %v6882_v53 = vadd.f32 %v8572_v15, %v6841_v13  ;;  %v6844_v7 = vadd.f32 %v8553_v27, %v6803_v42  ;;  %v9212_v15 = vld [vmem:[%s11436_s17 + $0x18] sm:$0xff]   ;;  %v7100_v11 = vpack.c.bf16 %v7099_v18, %v7099_v18  ;;  %v9215_v13 = vld [vmem:[%s11437_s19 + $0x10] sm:$0xff]  }
0x1fb3   :  { %8857 = vmatpush3.bf16.msra.mxu0 %v9215_v13 }
0x1fb4   :  { %v6885_v52 = vadd.f32 %v8575_v17, %v6844_v7  ;;  %v6888_v24 = vadd.f32 %v6882_v53, %v10715_v44  ;;  %8858 = vmatprep.subr.bf16.mxu0 %v9302_v12 }
0x1fb6   :  { %v6894_v35 = vsel %vm134_vm0, %v6888_v24, 0.0  ;;  %v6889_v47 = vadd.f32 %v6885_v52, %v10717_v0  ;;  %v9201_v0 = vld [vmem:[%s11433_s16] sm:$0xff]  }
0x1fb7   :  { %6895 = vadd.xlane.f32.xlu0 %v6894_v35  ;;  %8817 = vmatpush3.bf16.msra.mxu1 %v9201_v0  ;;  %v9217_v52 = vld [vmem:[%s11437_s19 + $0x20] sm:$0xff]   ;;  %v9219_v35 = vld [vmem:[%s11437_s19 + $0x30] sm:$0xff]  }
0x1fb8   :  { %v6897_v14 = vsel %vm134_vm0, %v6889_v47, 0.0  ;;  %8818 = vmatprep.subr.bf16.mxu1 %v9302_v12  ;;  %8859 = vmatpush3.bf16.msra.mxu0 %v9216_v6 }
0x1fb9   :  { %6898 = vadd.xlane.f32.xlu1 %v6897_v14  ;;  %8860 = vmatprep.subr.bf16.mxu0 %v9302_v12  ;;  %v26_v14 = vstv %s11439_s20 }
0x1fba   :  { %27 = vst [vmem:[#allocation2] sm:$0x1] %v26_v14 }
0x1fbb   :  { %8819 = vmatpush3.bf16.msra.mxu1 %v9203_v28 }
0x1fbc   :  { %8820 = vmatprep.subr.bf16.mxu1 %v9302_v12  ;;  %8861 = vmatpush3.bf16.msra.mxu0 %v9217_v52 }
0x1fbd   :  { %8862 = vmatprep.subr.bf16.mxu0 %v9302_v12 }
0x1fbf   :  { %8821 = vmatpush3.bf16.msra.mxu1 %v9205_v30 }
0x1fc0   :  { %8822 = vmatprep.subr.bf16.mxu1 %v9302_v12 }
0x1fc1   :  { %v8141_v36 = vld [vmem:[#allocation2] ss:$0 sm:$0xff] }
0x1fc3   :  { %8823 = vmatpush3.bf16.msra.mxu1 %v9207_v39 }
0x1fc4   :  { %8840 = vmatprep.subr.bf16.mxu1 %v9302_v12 }
0x2044   :  { %v6896_v49 = vpop.xlane.xlu0 %6895 }
0x2045   :  { %v6900_v9 = vmul.f32 0.015625, %v6896_v49 }
0x2046   :  { %v6899_v46 = vpop.xlane.xlu1 %6898 }
0x2047   :  { %v6902_v50 = vsub.f32 %v6888_v24, %v6900_v9  ;;  %v6901_v48 = vmul.f32 0.015625, %v6899_v46  ;;  %v9218_v24 = vld [vmem:[%s11437_s19 + $0x28] sm:$0xff]  }
0x2048   :  { %8863 = vmatpush3.bf16.msra.mxu0 %v9218_v24 }
0x2049   :  { %v6903_v10 = vsub.f32 %v6889_v47, %v6901_v48  ;;  %v6904_v32 = vmul.f32 %v6902_v50, %v6902_v50  ;;  %8864 = vmatprep.subr.bf16.mxu0 %v9302_v12  ;;  %v9220_v47 = vld [vmem:[%s11437_s19 + $0x38] sm:$0xff]  }
0x204b   :  { %v6906_v16 = vsel %vm134_vm0, %v6904_v32, 0.0  ;;  %v6905_v20 = vmul.f32 %v6903_v10, %v6903_v10 }
0x204c   :  { %6907 = vadd.xlane.f32.xlu0 %v6906_v16  ;;  %8865 = vmatpush3.bf16.msra.mxu0 %v9219_v35 }
0x204d   :  { %v6909_v44 = vsel %vm134_vm0, %v6905_v20, 0.0  ;;  %8866 = vmatprep.subr.bf16.mxu0 %v9302_v12 }
0x204e   :  { %6910 = vadd.xlane.f32.xlu1 %v6909_v44 }
0x2050   :  { %8867 = vmatpush3.bf16.msra.mxu0 %v9220_v47 }
0x2051   :  { %v7093_v27 = vpop.f32.mrb[132].mxu0 }
0x2052   :  { %v8838_v17 = vpop.f32.mrb[133].mxu0 }
0x2053   :  { %v7096_v53 = vpop.f32.mrb[134].mxu0 }
0x2054   :  { %v8839_v7 = vpop.f32.mrb[135].mxu0 }
0x20d9   :  { %v6908_v26 = vpop.xlane.xlu0 %6907 }
0x20da   :  { %v6912_v23 = vmul.f32 0.015625, %v6908_v26 }
0x20db   :  { %v6911_v55 = vpop.xlane.xlu1 %6910 }
0x20dc   :  { %v6914_v56 = vadd.f32 1e-05, %v6912_v23  ;;  %v6913_v2 = vmul.f32 0.015625, %v6911_v55 }
0x20de   :  { %9297 = vrsqrt.f32 %v6914_v56  ;;  %v6915_v33 = vadd.f32 1e-05, %v6913_v2 }
0x20e0   :  { %9299 = vrsqrt.f32 %v6915_v33 }
0x20e8   :  { %v9298_v34 = vpop.eup %9297 }
0x20e9   :  { %v6918_v62 = vmul.f32 %v9298_v34, %v6902_v50 }
0x20ea   :  { %v9300_v8 = vpop.eup %9299 }
0x20eb   :  { %v6926_v37 = vmul.f32 %v8123_v58, %v6918_v62  ;;  %v6919_v38 = vmul.f32 %v9300_v8, %v6903_v10 }
0x20ed   :  { %v6934_v63 = vadd.f32 %v8124_v54, %v6926_v37  ;;  %v6927_v31 = vmul.f32 %v8123_v58, %v6919_v38 }
0x20ef   :  { %v6946_v40 = vpack.c.bf16 %v6934_v63, %v6934_v63  ;;  %v6935_v60 = vadd.f32 %v8124_v54, %v6927_v31 }
0x20f1   :  { %v6947_v61 = vpack.c.bf16 %v6935_v60, %v6935_v60  ;;  %v6958_v45 = vunpack.c.l.b16 %v6946_v40 }
0x20f3   :  { %v6959_v41 = vunpack.c.l.b16 %v6947_v61  ;;  %v6960_v42 = vrot.slane %v6958_v45, 7 }
0x20f5   :  { %v6961_v59 = vrot.slane %v6959_v41, 6 }
0x20f7   :  { %v6963_v57 = vsel %vm6962_vm7, %v6961_v59, %v6960_v42 }
0x20f8   :  { %v6964_v43 = vpack.c.b16 %v6963_v57, %v6963_v57 }
0x20fa   :  { %8825 = vmatmul.mubr.msk.bf16.vlgmr.msra.gmra.mrb[140].mxu1 %vm134_vm0, %v6964_v43 }
0x20fb   :  { %8841 = vmatpush3.bf16.msra.mxu1 %v9209_v3  ;;  %8848 = vmatprep.mubr.msk.bf16.mxu1 %vm9303_vm1, %v9302_v12 }
0x20fc   :  { %8842 = vmatprep.subr.bf16.mxu1 %v9302_v12 }
0x20ff   :  { %8843 = vmatpush3.bf16.msra.mxu1 %v9210_v4 }
0x2100   :  { %8844 = vmatprep.subr.bf16.mxu1 %v9302_v12 }
0x2103   :  { %8845 = vmatpush3.bf16.msra.mxu1 %v9211_v5 }
0x2104   :  { %8846 = vmatprep.subr.bf16.mxu1 %v9302_v12  ;;  %v8140_v12 = vld [vmem:[%s11440_s18] ss:$0 sm:$0xff] }
0x2107   :  { %8847 = vmatpush3.bf16.msra.mxu1 %v9212_v15 }
0x210a   :  { %8849 = vmatmul.mubr.msk.bf16.vlgmr.msra.gmra.mrb[144].mxu1 %vm134_vm0, %v7100_v11 }
0x21cd   :  { %v7026_v49 = vpop.f32.mrb[140].mxu1 }
0x21ce   :  { %v7094_v9 = vadd.f32 %v7093_v27, %v7026_v49  ;;  %v8826_v46 = vpop.f32.mrb[141].mxu1 }
0x21cf   :  { %v7029_v50 = vpop.f32.mrb[142].mxu1 }
0x21d0   :  { %v8827_v48 = vpop.f32.mrb[143].mxu1 }
0x21dd   :  { %v7170_v10 = vpop.f32.mrb[144].mxu1 }
0x21de   :  { %v7176_v32 = vadd.f32 %v7170_v10, %v7094_v9  ;;  %v8850_v16 = vpop.f32.mrb[145].mxu1 }
0x21df   :  { %v7173_v20 = vpop.f32.mrb[146].mxu1 }
0x21e0   :  { %v7184_v44 = vadd.f32 %v8140_v12, %v7176_v32  ;;  %v8851_v0 = vpop.f32.mrb[147].mxu1 }
0x21e2   :  { %v7185_v25 = vmax.f32 %v7184_v44, 0.0 }
0x21e4   :  { %v7186_v28 = vpack.c.bf16 %v7185_v25, %v7185_v25 }
0x21e6   :  { %8869 = vmatmul.mubr.bf16.vlgmr.msra.gmra.mrb[136].mxu0 %v7186_v28 }
0x22b9   :  { %v7292_v30 = vpop.f32.mrb[136].mxu0 }
0x22ba   :  { %v7293_v29 = vadd.f32 %v8141_v36, %v7292_v30  ;;  %v8870_v39 = vpop.f32.mrb[137].mxu0 }
0x22bb   :  { %v7295_v51 = vpop.f32.mrb[138].mxu0 }
0x22bc   :  { %7300 = vperm.xlu0 %8912, %v7293_v29   ;;  %v8871_v21 = vpop.f32.mrb[139].mxu0 }
0x233b   :  { %v7301_v22 = vpop.permute.xlu0 %7300 }
0x233c   :  { %7303 = vst [vmem:[%s11441_s21] sm:$0x3] %v7301_v22 }

</bundles_post_ra>
